<compile_context>
chip_gen: v6e
topology: v6e:2x2x1
jax: 0.10.0
libtpu: 0.0.40
codegen_flags: <defaults>
</compile_context>

<pallas_src>
import jax
import jax.numpy as jnp
from jax.experimental import pallas as pl
from jax.experimental.pallas import tpu as pltpu

K = 7                     # kernel_size
PAD = K // 2              # padding = 3
CHANNELS = (32, 32, 64, 64)
LATENT = 128
BN_EPS = 1e-5
LANES = 128               # activation lane width (channels zero-padded to 128)


def _conv_plan(input_channels):
    """Out-channels and row offsets (into the packed weight slab) for the 8 convs."""
    cos = list(CHANNELS)                                                  # encoder
    cos += [CHANNELS[i - 1] for i in range(len(CHANNELS) - 1, 0, -1)]     # decoder convT
    cos.append(input_channels)                                            # final convT
    offs, off = [], 0
    for co in cos:
        offs.append(off)
        off += co
    return cos, offs


# --------------------------------------------------------------------------- #
# Pallas kernel                                                                #
# --------------------------------------------------------------------------- #
def make_kernel(N, L, Cin):
    NL = N * L
    cos, offs = _conv_plan(Cin)

    def kernel(x_ref, wc_ref, wfe_ref, wfd_ref, slab_ref, out_ref):
        f32 = jnp.float32

        # -------- hoisted once: per-tap sample-boundary masks (no per-conv rebroadcast)
        pos_l = jax.lax.broadcasted_iota(jnp.int32, (L, LANES), 0)        # row l == l
        pos = jnp.concatenate([pos_l] * N, axis=0)                        # (NL, 128)
        masks = {}
        for k in range(K):
            if k == PAD:
                continue
            t = pos + (k - PAD)
            masks[k] = ((t >= 0) & (t < L)).astype(f32)                   # (NL, 128)
        zeros_row = jnp.zeros((NL, LANES), f32)

        def conv(h2, j):
            """One 'same' conv as a single im2col matmul.
            h2: (NL, 128) with real channels in the low lanes -> (NL, 128)."""
            co, off = cos[j], offs[j]
            cols = []
            for k in range(K):
                if k == PAD:
                    cols.append(h2)
                else:
                    # roll rows by (PAD - k); cross-sample / wrapped rows are masked to 0
                    cols.append(pltpu.roll(h2, (PAD - k) % NL, 0) * masks[k])
            lhs = jnp.concatenate(cols, axis=1)                           # (NL, 7*128), aligned
            w = wc_ref[off:off + co, :]                                   # (co, 7*128)
            out = jax.lax.dot_general(lhs, w, (((1,), (1,)), ((), ())),
                                      preferred_element_type=f32)          # (NL, co)
            if co < LANES:                                                # keep lane-dense slab
                out = jnp.concatenate([out, zeros_row[:, :LANES - co]], axis=1)
            return out

        def bn_relu(h2, seg):
            # BatchNorm1d (training mode: batch stats over the NL rows), affine folded.
            g = slab_ref[seg:seg + 1, :]                                  # (1, 128) gamma
            b = slab_ref[7 + seg:8 + seg, :]                              # (1, 128) beta
            mean = jnp.mean(h2, axis=0, keepdims=True)
            cen = h2 - mean
            var = jnp.mean(cen * cen, axis=0, keepdims=True)
            scale = g * jax.lax.rsqrt(var + BN_EPS)                       # EUP rsqrt, tiny
            return jnp.maximum(cen * scale + b, 0.0)

        h = x_ref[...]                                                    # (NL, 128) f32

        # ---------------- encoder: 4 x (conv + BN + ReLU) -----------------------------
        # (conv bias dropped: a per-channel constant cancels exactly in BN)
        for j in range(4):
            h = bn_relu(conv(h, j), j)

        # ---------------- encoder Linear(C*L -> LATENT): one bf16 matmul --------------
        h3 = h.reshape(N, L, LANES)
        lhs = jnp.concatenate([h3[:, l, :] for l in range(L)], axis=1)    # (N, L*128), aligned
        latent = jnp.dot(lhs.astype(jnp.bfloat16), wfe_ref[...],
                         preferred_element_type=f32) + slab_ref[14:15, :]

        # ---------------- decoder Linear(LATENT -> C*L) + bias + ReLU -----------------
        d = jnp.dot(latent.astype(jnp.bfloat16), wfd_ref[...],
                    preferred_element_type=f32)                           # (N, L*128)
        pieces = [d[:, l * LANES:(l + 1) * LANES] for l in range(L)]      # aligned slices
        h = jnp.stack(pieces, axis=1).reshape(NL, LANES)                  # back to (NL, 128)
        bL = slab_ref[16:16 + L, :]                                       # (L, 128) dec-fc bias
        h = jnp.maximum(h + jnp.concatenate([bL] * N, axis=0), 0.0)

        # ---------------- decoder: 3 x (conv-transpose-as-conv + BN + ReLU) -----------
        for j in range(3):
            h = bn_relu(conv(h, 4 + j), 4 + j)

        # ---------------- final ConvTranspose1d + bias (lane-dense padded output) -----
        out_ref[...] = (conv(h, 7) + slab_ref[15:16, :]).astype(out_ref.dtype)

    return kernel


# --------------------------------------------------------------------------- #
# Parameters (PyTorch layouts) and kernel-layout preparation                   #
# --------------------------------------------------------------------------- #
def init_torch_params(key, input_channels, input_length):
    keys = iter(jax.random.split(key, 64))

    def nrm(shape, scale=0.1):
        return scale * jax.random.normal(next(keys), shape, dtype=jnp.float32)

    L = input_length
    c_last = CHANNELS[-1]
    p = {"enc_convs": [], "dec_convs": []}
    enc_in = (input_channels,) + CHANNELS[:-1]
    for cin, cout in zip(enc_in, CHANNELS):                       # Conv1d: (Co, Ci, K)
        p["enc_convs"].append(dict(w=nrm((cout, cin, K)), b=nrm((cout,)),
                                   gamma=1.0 + nrm((cout,)), beta=nrm((cout,))))
    p["enc_fc_w"] = nrm((LATENT, c_last * L))                     # nn.Linear: (out, in)
    p["enc_fc_b"] = nrm((LATENT,))
    p["dec_fc_w"] = nrm((c_last * L, LATENT))
    p["dec_fc_b"] = nrm((c_last * L,))
    for i in range(len(CHANNELS) - 1, 0, -1):                     # ConvT1d: (Ci, Co, K)
        cin, cout = CHANNELS[i], CHANNELS[i - 1]
        p["dec_convs"].append(dict(w=nrm((cin, cout, K)), b=nrm((cout,)),
                                   gamma=1.0 + nrm((cout,)), beta=nrm((cout,))))
    p["final_w"] = nrm((CHANNELS[0], input_channels, K))
    p["final_b"] = nrm((input_channels,))
    return p


def prepare_kernel_inputs(p, Cin, L):
    c_last = CHANNELS[-1]

    def pad_lanes(v):
        v = jnp.asarray(v, jnp.float32).reshape(-1)
        return jnp.pad(v, (0, LANES - v.shape[0]))

    def conv_w_T(w_pt):
        # Conv1d (Co, Ci, K) -> (Co, K*128): lane k*128+c holds w[co, c, k]
        Co, Ci, _ = w_pt.shape
        m = jnp.transpose(w_pt, (0, 2, 1))                        # (Co, K, Ci)
        m = jnp.pad(m, ((0, 0), (0, 0), (0, LANES - Ci)))
        return m.reshape(Co, K * LANES)

    def convT_w_T(w_pt):
        # ConvT1d (Ci, Co, K): conv with flipped kernel + swapped channel roles
        # -> (Co, K*128): lane k*128+c holds w[c, co, K-1-k]
        Ci, Co, _ = w_pt.shape
        m = jnp.transpose(jnp.flip(w_pt, axis=2), (1, 2, 0))      # (Co, K, Ci)
        m = jnp.pad(m, ((0, 0), (0, 0), (0, LANES - Ci)))
        return m.reshape(Co, K * LANES)

    # one packed conv-weight slab (single DMA, lane-dense), rows in _conv_plan order
    blocks = [conv_w_T(c["w"]) for c in p["enc_convs"]]
    blocks += [convT_w_T(c["w"]) for c in p["dec_convs"]]
    blocks.append(convT_w_T(p["final_w"]))
    w_slab = jnp.concatenate(blocks, axis=0)                      # (sum_Co, 7*128) f32

    # encoder Linear weight (LATENT, C*L); PyTorch flatten index is c*L + l,
    # the kernel LHS index is l*128 + c  -> permute + pad channel axis, bf16
    wfe = p["enc_fc_w"].reshape(LATENT, c_last, L)
    wfe = jnp.transpose(wfe, (2, 1, 0))                           # (L, C, F)
    wfe = jnp.pad(wfe, ((0, 0), (0, LANES - c_last), (0, 0)))
    wfe = wfe.reshape(L * LANES, LATENT).astype(jnp.bfloat16)     # (L*128, LATENT)

    # decoder Linear weight (C*L, LATENT) -> (LATENT, L*128), bf16
    wfd = p["dec_fc_w"].reshape(c_last, L, LATENT)
    wfd = jnp.transpose(wfd, (1, 0, 2))                           # (L, C, F)
    wfd = jnp.pad(wfd, ((0, 0), (0, LANES - c_last), (0, 0)))
    wfd = jnp.transpose(wfd.reshape(L * LANES, LATENT)).astype(jnp.bfloat16)

    # per-channel scalar slab, (16 + L, 128) f32:
    #   rows 0-6 BN gamma, 7-13 BN beta, 14 enc-fc bias, 15 final-conv bias,
    #   rows 16..16+L-1 decoder-fc bias laid out as (position, channel)
    bn = p["enc_convs"] + p["dec_convs"]
    rows = [pad_lanes(c["gamma"]) for c in bn] + [pad_lanes(c["beta"]) for c in bn]
    rows += [pad_lanes(p["enc_fc_b"]), pad_lanes(p["final_b"])]
    bd = jnp.transpose(p["dec_fc_b"].reshape(c_last, L))          # (L, C)
    bd = jnp.pad(bd, ((0, 0), (0, LANES - c_last)))
    slab = jnp.concatenate([jnp.stack(rows, axis=0), bd], axis=0)

    return [w_slab, wfe, wfd, slab]


# --------------------------------------------------------------------------- #
# Wrapper                                                                      #
# --------------------------------------------------------------------------- #
def conv_autoencoder_forward(x_ncl, prepared):
    N, Cin, L = x_ncl.shape
    NL = N * L
    x_flat = jnp.transpose(x_ncl, (0, 2, 1)).reshape(NL, Cin).astype(jnp.float32)
    x_pad = jnp.pad(x_flat, ((0, 0), (0, LANES - Cin)))           # channels-last, lane-dense
    inputs = [x_pad] + list(prepared)
    # NOTE: single ungridded call (one TensorCore); at N*L=32 the work is too small to
    # shard — for many independent batches add a leading "parallel" grid axis instead.
    out_padded = pl.pallas_call(
        make_kernel(N, L, Cin),
        out_shape=jax.ShapeDtypeStruct((NL, LANES), jnp.float32),
        in_specs=[pl.BlockSpec(memory_space=pltpu.MemorySpace.VMEM)] * len(inputs),
        out_specs=pl.BlockSpec(memory_space=pltpu.MemorySpace.VMEM),
        compiler_params=pltpu.CompilerParams(vmem_limit_bytes=32 * 1024 * 1024),
        cost_estimate=pl.CostEstimate(flops=21_000_000, transcendentals=1_000,
                                      bytes_accessed=2_500_000),
    )(*inputs)
    return jnp.transpose(out_padded[:, :Cin].reshape(N, L, Cin), (0, 2, 1))


# --------------------------------------------------------------------------- #
# Pure-JAX reference (independent formulation, PyTorch semantics)              #
# --------------------------------------------------------------------------- #
def reference_forward(x_ncl, p):
    PREC = jax.lax.Precision.HIGHEST
    N, Cin, L = x_ncl.shape

    def conv1d(x, w, b):                                          # w (Co, Ci, K)
        xp = jnp.pad(x, ((0, 0), (0, 0), (PAD, PAD)))
        out = jnp.zeros((N, w.shape[0], L), jnp.float32)
        for k in range(K):
            out = out + jnp.einsum("ncl,oc->nol", xp[:, :, k:k + L], w[:, :, k],
                                   precision=PREC)
        return out + b[None, :, None]

    def conv_t1d(x, w, b):                                        # w (Ci, Co, K)
        Co = w.shape[1]
        out = jnp.zeros((N, Co, L), jnp.float32) + b[None, :, None]
        for k in range(K):
            shift = PAD - k
            lo, hi = max(0, -shift), min(L, L - shift)
            if lo >= hi:
                continue
            contrib = jnp.einsum("ncl,co->nol", x[:, :, lo + shift:hi + shift],
                                 w[:, :, k], precision=PREC)
            out = out.at[:, :, lo:hi].add(contrib)
        return out

    def bn_relu(x, g, be):
        mean = jnp.mean(x, axis=(0, 2), keepdims=True)
        var = jnp.mean((x - mean) ** 2, axis=(0, 2), keepdims=True)
        y = (x - mean) * jax.lax.rsqrt(var + BN_EPS) * g[None, :, None] + be[None, :, None]
        return jnp.maximum(y, 0.0)

    h = x_ncl.astype(jnp.float32)
    for c in p["enc_convs"]:
        h = bn_relu(conv1d(h, c["w"], c["b"]), c["gamma"], c["beta"])
    latent = jnp.matmul(h.reshape(N, -1), p["enc_fc_w"].T, precision=PREC) + p["enc_fc_b"]
    d = jnp.maximum(jnp.matmul(latent, p["dec_fc_w"].T, precision=PREC) + p["dec_fc_b"], 0.0)
    h = d.reshape(N, CHANNELS[-1], L)
    for c in p["dec_convs"]:
        h = bn_relu(conv_t1d(h, c["w"], c["b"]), c["gamma"], c["beta"])
    return conv_t1d(h, p["final_w"], p["final_b"])


if __name__ == "__main__":
    key = jax.random.PRNGKey(0)
    kx, kp = jax.random.split(key)
    N, Cin, L = 2, 4, 16                      # batch=2, input_channels=4, input_length=16
    x = jax.random.normal(kx, (N, Cin, L), dtype=jnp.float32)
    params = init_torch_params(kp, Cin, L)
    prepared = prepare_kernel_inputs(params, Cin, L)

    y = conv_autoencoder_forward(x, prepared)
    jax.block_until_ready(y)
    assert y.shape == (N, Cin, L) and y.dtype == jnp.float32

    y_ref = reference_forward(x, params)
    rel = float(jnp.linalg.norm(y - y_ref)) / (float(jnp.linalg.norm(y_ref)) + 1e-12)
    # Expected error ~1e-3 (bf16 FC weights with f32 accumulation); 2e-2 bound also
    # covers possible bf16 MXU operand rounding of the f32 conv matmuls on all chips,
    # while still catching any structural (mask / permutation / BN-indexing) bug.
    assert rel < 2e-2, f"kernel/reference mismatch, relative L2 error = {rel}"
    print("KERNEL_OK")
</pallas_src>

<mosaic_0001>
module attributes {stable_mosaic.version = 11 : i64} {
  func.func @kernel(%arg0: memref<32x128xf32, #tpu.memory_space<vmem>>, %arg1: memref<324x896xf32, #tpu.memory_space<vmem>>, %arg2: memref<2048x128xbf16, #tpu.memory_space<vmem>>, %arg3: memref<128x2048xbf16, #tpu.memory_space<vmem>>, %arg4: memref<32x128xf32, #tpu.memory_space<vmem>>, %arg5: memref<32x128xf32, #tpu.memory_space<vmem>>) attributes {dimension_semantics = [], scalar_prefetch = 0 : i64, scratch_operands = 0 : i64, tpu.core_type = #tpu.core_type<tc>} {
    %0 = tpu.iota {dimensions = array<i32: 0>} : vector<16x128xi32>
    %1 = tpu.concatenate %0, %0 in 0 : vector<16x128xi32>, vector<16x128xi32> -> vector<32x128xi32>
    %c-3_i32 = arith.constant -3 : i32
    %2 = vector.broadcast %c-3_i32 : i32 to vector<32x128xi32>
    %3 = arith.addi %1, %2 : vector<32x128xi32>
    %c0_i32 = arith.constant 0 : i32
    %4 = vector.broadcast %c0_i32 : i32 to vector<32x128xi32>
    %5 = arith.cmpi sge, %3, %4 : vector<32x128xi32>
    %c16_i32 = arith.constant 16 : i32
    %6 = vector.broadcast %c16_i32 : i32 to vector<32x128xi32>
    %7 = arith.cmpi slt, %3, %6 : vector<32x128xi32>
    %8 = arith.andi %5, %7 : vector<32x128xi1>
    %9 = arith.extui %8 : vector<32x128xi1> to vector<32x128xi32>
    %10 = arith.sitofp %9 : vector<32x128xi32> to vector<32x128xf32>
    %c-2_i32 = arith.constant -2 : i32
    %11 = vector.broadcast %c-2_i32 : i32 to vector<32x128xi32>
    %12 = arith.addi %1, %11 : vector<32x128xi32>
    %c0_i32_0 = arith.constant 0 : i32
    %13 = vector.broadcast %c0_i32_0 : i32 to vector<32x128xi32>
    %14 = arith.cmpi sge, %12, %13 : vector<32x128xi32>
    %c16_i32_1 = arith.constant 16 : i32
    %15 = vector.broadcast %c16_i32_1 : i32 to vector<32x128xi32>
    %16 = arith.cmpi slt, %12, %15 : vector<32x128xi32>
    %17 = arith.andi %14, %16 : vector<32x128xi1>
    %18 = arith.extui %17 : vector<32x128xi1> to vector<32x128xi32>
    %19 = arith.sitofp %18 : vector<32x128xi32> to vector<32x128xf32>
    %c-1_i32 = arith.constant -1 : i32
    %20 = vector.broadcast %c-1_i32 : i32 to vector<32x128xi32>
    %21 = arith.addi %1, %20 : vector<32x128xi32>
    %c0_i32_2 = arith.constant 0 : i32
    %22 = vector.broadcast %c0_i32_2 : i32 to vector<32x128xi32>
    %23 = arith.cmpi sge, %21, %22 : vector<32x128xi32>
    %c16_i32_3 = arith.constant 16 : i32
    %24 = vector.broadcast %c16_i32_3 : i32 to vector<32x128xi32>
    %25 = arith.cmpi slt, %21, %24 : vector<32x128xi32>
    %26 = arith.andi %23, %25 : vector<32x128xi1>
    %27 = arith.extui %26 : vector<32x128xi1> to vector<32x128xi32>
    %28 = arith.sitofp %27 : vector<32x128xi32> to vector<32x128xf32>
    %c1_i32 = arith.constant 1 : i32
    %29 = vector.broadcast %c1_i32 : i32 to vector<32x128xi32>
    %30 = arith.addi %1, %29 : vector<32x128xi32>
    %c0_i32_4 = arith.constant 0 : i32
    %31 = vector.broadcast %c0_i32_4 : i32 to vector<32x128xi32>
    %32 = arith.cmpi sge, %30, %31 : vector<32x128xi32>
    %c16_i32_5 = arith.constant 16 : i32
    %33 = vector.broadcast %c16_i32_5 : i32 to vector<32x128xi32>
    %34 = arith.cmpi slt, %30, %33 : vector<32x128xi32>
    %35 = arith.andi %32, %34 : vector<32x128xi1>
    %36 = arith.extui %35 : vector<32x128xi1> to vector<32x128xi32>
    %37 = arith.sitofp %36 : vector<32x128xi32> to vector<32x128xf32>
    %c2_i32 = arith.constant 2 : i32
    %38 = vector.broadcast %c2_i32 : i32 to vector<32x128xi32>
    %39 = arith.addi %1, %38 : vector<32x128xi32>
    %c0_i32_6 = arith.constant 0 : i32
    %40 = vector.broadcast %c0_i32_6 : i32 to vector<32x128xi32>
    %41 = arith.cmpi sge, %39, %40 : vector<32x128xi32>
    %c16_i32_7 = arith.constant 16 : i32
    %42 = vector.broadcast %c16_i32_7 : i32 to vector<32x128xi32>
    %43 = arith.cmpi slt, %39, %42 : vector<32x128xi32>
    %44 = arith.andi %41, %43 : vector<32x128xi1>
    %45 = arith.extui %44 : vector<32x128xi1> to vector<32x128xi32>
    %46 = arith.sitofp %45 : vector<32x128xi32> to vector<32x128xf32>
    %c3_i32 = arith.constant 3 : i32
    %47 = vector.broadcast %c3_i32 : i32 to vector<32x128xi32>
    %48 = arith.addi %1, %47 : vector<32x128xi32>
    %c0_i32_8 = arith.constant 0 : i32
    %49 = vector.broadcast %c0_i32_8 : i32 to vector<32x128xi32>
    %50 = arith.cmpi sge, %48, %49 : vector<32x128xi32>
    %c16_i32_9 = arith.constant 16 : i32
    %51 = vector.broadcast %c16_i32_9 : i32 to vector<32x128xi32>
    %52 = arith.cmpi slt, %48, %51 : vector<32x128xi32>
    %53 = arith.andi %50, %52 : vector<32x128xi1>
    %54 = arith.extui %53 : vector<32x128xi1> to vector<32x128xi32>
    %55 = arith.sitofp %54 : vector<32x128xi32> to vector<32x128xf32>
    %cst = arith.constant 0.000000e+00 : f32
    %56 = vector.broadcast %cst : f32 to vector<32x128xf32>
    %c0 = arith.constant 0 : index
    %c0_10 = arith.constant 0 : index
    %57 = vector.load %arg0[%c0, %c0_10] : memref<32x128xf32, #tpu.memory_space<vmem>>, vector<32x128xf32>
    %c3_i32_11 = arith.constant 3 : i32
    %58 = tpu.dynamic_rotate %57 by %c3_i32_11 dim 0 : vector<32x128xf32>, i32 -> vector<32x128xf32>
    %59 = arith.mulf %58, %10 : vector<32x128xf32>
    %c2_i32_12 = arith.constant 2 : i32
    %60 = tpu.dynamic_rotate %57 by %c2_i32_12 dim 0 : vector<32x128xf32>, i32 -> vector<32x128xf32>
    %61 = arith.mulf %60, %19 : vector<32x128xf32>
    %c1_i32_13 = arith.constant 1 : i32
    %62 = tpu.dynamic_rotate %57 by %c1_i32_13 dim 0 : vector<32x128xf32>, i32 -> vector<32x128xf32>
    %63 = arith.mulf %62, %28 : vector<32x128xf32>
    %c31_i32 = arith.constant 31 : i32
    %64 = tpu.dynamic_rotate %57 by %c31_i32 dim 0 : vector<32x128xf32>, i32 -> vector<32x128xf32>
    %65 = arith.mulf %64, %37 : vector<32x128xf32>
    %c30_i32 = arith.constant 30 : i32
    %66 = tpu.dynamic_rotate %57 by %c30_i32 dim 0 : vector<32x128xf32>, i32 -> vector<32x128xf32>
    %67 = arith.mulf %66, %46 : vector<32x128xf32>
    %c29_i32 = arith.constant 29 : i32
    %68 = tpu.dynamic_rotate %57 by %c29_i32 dim 0 : vector<32x128xf32>, i32 -> vector<32x128xf32>
    %69 = arith.mulf %68, %55 : vector<32x128xf32>
    %70 = tpu.concatenate %59, %61, %63, %57, %65, %67, %69 in 1 : vector<32x128xf32>, vector<32x128xf32>, vector<32x128xf32>, vector<32x128xf32>, vector<32x128xf32>, vector<32x128xf32>, vector<32x128xf32> -> vector<32x896xf32>
    %c0_14 = arith.constant 0 : index
    %c0_15 = arith.constant 0 : index
    %71 = vector.load %arg1[%c0_14, %c0_15] : memref<324x896xf32, #tpu.memory_space<vmem>>, vector<32x896xf32>
    %cst_16 = arith.constant dense<0.000000e+00> : vector<32x32xf32>
    %72 = tpu.matmul %70, %71, %cst_16 {dimension_numbers = #tpu.dot_dimension_numbers<[1], [1], [0], [0], [0, 0, 1, 0], [], []>} : vector<32x896xf32>, vector<32x896xf32>, vector<32x32xf32> -> vector<32x32xf32>
    %73 = vector.extract_strided_slice %56 {offsets = [0, 0], sizes = [32, 96], strides = [1, 1]} : vector<32x128xf32> to vector<32x96xf32>
    %74 = tpu.concatenate %72, %73 in 1 : vector<32x32xf32>, vector<32x96xf32> -> vector<32x128xf32>
    %c0_17 = arith.constant 0 : index
    %c0_18 = arith.constant 0 : index
    %75 = vector.load %arg4[%c0_17, %c0_18] : memref<32x128xf32, #tpu.memory_space<vmem>>, vector<1x128xf32>
    %c7 = arith.constant 7 : index
    %c0_19 = arith.constant 0 : index
    %76 = vector.load %arg4[%c7, %c0_19] : memref<32x128xf32, #tpu.memory_space<vmem>>, vector<1x128xf32>
    %cst_20 = arith.constant dense<0.000000e+00> : vector<128xf32>
    %77 = vector.multi_reduction <add>, %74, %cst_20 [0] : vector<32x128xf32> to vector<128xf32>
    %78 = vector.shape_cast %77 : vector<128xf32> to vector<1x128xf32>
    %cst_21 = arith.constant 3.200000e+01 : f32
    %79 = vector.broadcast %cst_21 : f32 to vector<1x128xf32>
    %80 = arith.divf %78, %79 : vector<1x128xf32>
    %81 = vector.broadcast %80 : vector<1x128xf32> to vector<32x128xf32>
    %82 = arith.subf %74, %81 : vector<32x128xf32>
    %83 = arith.mulf %82, %82 : vector<32x128xf32>
    %cst_22 = arith.constant dense<0.000000e+00> : vector<128xf32>
    %84 = vector.multi_reduction <add>, %83, %cst_22 [0] : vector<32x128xf32> to vector<128xf32>
    %85 = vector.shape_cast %84 : vector<128xf32> to vector<1x128xf32>
    %cst_23 = arith.constant 3.200000e+01 : f32
    %86 = vector.broadcast %cst_23 : f32 to vector<1x128xf32>
    %87 = arith.divf %85, %86 : vector<1x128xf32>
    %cst_24 = arith.constant 9.99999974E-6 : f32
    %88 = vector.broadcast %cst_24 : f32 to vector<1x128xf32>
    %89 = arith.addf %87, %88 : vector<1x128xf32>
    %90 = math.rsqrt %89 : vector<1x128xf32>
    %91 = arith.mulf %75, %90 : vector<1x128xf32>
    %92 = vector.broadcast %91 : vector<1x128xf32> to vector<32x128xf32>
    %93 = arith.mulf %82, %92 : vector<32x128xf32>
    %94 = vector.broadcast %76 : vector<1x128xf32> to vector<32x128xf32>
    %95 = arith.addf %93, %94 : vector<32x128xf32>
    %cst_25 = arith.constant 0.000000e+00 : f32
    %96 = vector.broadcast %cst_25 : f32 to vector<32x128xf32>
    %97 = arith.maximumf %95, %96 : vector<32x128xf32>
    %c3_i32_26 = arith.constant 3 : i32
    %98 = tpu.dynamic_rotate %97 by %c3_i32_26 dim 0 : vector<32x128xf32>, i32 -> vector<32x128xf32>
    %99 = arith.mulf %98, %10 : vector<32x128xf32>
    %c2_i32_27 = arith.constant 2 : i32
    %100 = tpu.dynamic_rotate %97 by %c2_i32_27 dim 0 : vector<32x128xf32>, i32 -> vector<32x128xf32>
    %101 = arith.mulf %100, %19 : vector<32x128xf32>
    %c1_i32_28 = arith.constant 1 : i32
    %102 = tpu.dynamic_rotate %97 by %c1_i32_28 dim 0 : vector<32x128xf32>, i32 -> vector<32x128xf32>
    %103 = arith.mulf %102, %28 : vector<32x128xf32>
    %c31_i32_29 = arith.constant 31 : i32
    %104 = tpu.dynamic_rotate %97 by %c31_i32_29 dim 0 : vector<32x128xf32>, i32 -> vector<32x128xf32>
    %105 = arith.mulf %104, %37 : vector<32x128xf32>
    %c30_i32_30 = arith.constant 30 : i32
    %106 = tpu.dynamic_rotate %97 by %c30_i32_30 dim 0 : vector<32x128xf32>, i32 -> vector<32x128xf32>
    %107 = arith.mulf %106, %46 : vector<32x128xf32>
    %c29_i32_31 = arith.constant 29 : i32
    %108 = tpu.dynamic_rotate %97 by %c29_i32_31 dim 0 : vector<32x128xf32>, i32 -> vector<32x128xf32>
    %109 = arith.mulf %108, %55 : vector<32x128xf32>
    %110 = tpu.concatenate %99, %101, %103, %97, %105, %107, %109 in 1 : vector<32x128xf32>, vector<32x128xf32>, vector<32x128xf32>, vector<32x128xf32>, vector<32x128xf32>, vector<32x128xf32>, vector<32x128xf32> -> vector<32x896xf32>
    %c32 = arith.constant 32 : index
    %c0_32 = arith.constant 0 : index
    %111 = vector.load %arg1[%c32, %c0_32] : memref<324x896xf32, #tpu.memory_space<vmem>>, vector<32x896xf32>
    %cst_33 = arith.constant dense<0.000000e+00> : vector<32x32xf32>
    %112 = tpu.matmul %110, %111, %cst_33 {dimension_numbers = #tpu.dot_dimension_numbers<[1], [1], [0], [0], [0, 0, 1, 0], [], []>} : vector<32x896xf32>, vector<32x896xf32>, vector<32x32xf32> -> vector<32x32xf32>
    %113 = vector.extract_strided_slice %56 {offsets = [0, 0], sizes = [32, 96], strides = [1, 1]} : vector<32x128xf32> to vector<32x96xf32>
    %114 = tpu.concatenate %112, %113 in 1 : vector<32x32xf32>, vector<32x96xf32> -> vector<32x128xf32>
    %c1 = arith.constant 1 : index
    %c0_34 = arith.constant 0 : index
    %115 = vector.load %arg4[%c1, %c0_34] : memref<32x128xf32, #tpu.memory_space<vmem>>, vector<1x128xf32>
    %c8 = arith.constant 8 : index
    %c0_35 = arith.constant 0 : index
    %116 = vector.load %arg4[%c8, %c0_35] : memref<32x128xf32, #tpu.memory_space<vmem>>, vector<1x128xf32>
    %cst_36 = arith.constant dense<0.000000e+00> : vector<128xf32>
    %117 = vector.multi_reduction <add>, %114, %cst_36 [0] : vector<32x128xf32> to vector<128xf32>
    %118 = vector.shape_cast %117 : vector<128xf32> to vector<1x128xf32>
    %cst_37 = arith.constant 3.200000e+01 : f32
    %119 = vector.broadcast %cst_37 : f32 to vector<1x128xf32>
    %120 = arith.divf %118, %119 : vector<1x128xf32>
    %121 = vector.broadcast %120 : vector<1x128xf32> to vector<32x128xf32>
    %122 = arith.subf %114, %121 : vector<32x128xf32>
    %123 = arith.mulf %122, %122 : vector<32x128xf32>
    %cst_38 = arith.constant dense<0.000000e+00> : vector<128xf32>
    %124 = vector.multi_reduction <add>, %123, %cst_38 [0] : vector<32x128xf32> to vector<128xf32>
    %125 = vector.shape_cast %124 : vector<128xf32> to vector<1x128xf32>
    %cst_39 = arith.constant 3.200000e+01 : f32
    %126 = vector.broadcast %cst_39 : f32 to vector<1x128xf32>
    %127 = arith.divf %125, %126 : vector<1x128xf32>
    %cst_40 = arith.constant 9.99999974E-6 : f32
    %128 = vector.broadcast %cst_40 : f32 to vector<1x128xf32>
    %129 = arith.addf %127, %128 : vector<1x128xf32>
    %130 = math.rsqrt %129 : vector<1x128xf32>
    %131 = arith.mulf %115, %130 : vector<1x128xf32>
    %132 = vector.broadcast %131 : vector<1x128xf32> to vector<32x128xf32>
    %133 = arith.mulf %122, %132 : vector<32x128xf32>
    %134 = vector.broadcast %116 : vector<1x128xf32> to vector<32x128xf32>
    %135 = arith.addf %133, %134 : vector<32x128xf32>
    %cst_41 = arith.constant 0.000000e+00 : f32
    %136 = vector.broadcast %cst_41 : f32 to vector<32x128xf32>
    %137 = arith.maximumf %135, %136 : vector<32x128xf32>
    %c3_i32_42 = arith.constant 3 : i32
    %138 = tpu.dynamic_rotate %137 by %c3_i32_42 dim 0 : vector<32x128xf32>, i32 -> vector<32x128xf32>
    %139 = arith.mulf %138, %10 : vector<32x128xf32>
    %c2_i32_43 = arith.constant 2 : i32
    %140 = tpu.dynamic_rotate %137 by %c2_i32_43 dim 0 : vector<32x128xf32>, i32 -> vector<32x128xf32>
    %141 = arith.mulf %140, %19 : vector<32x128xf32>
    %c1_i32_44 = arith.constant 1 : i32
    %142 = tpu.dynamic_rotate %137 by %c1_i32_44 dim 0 : vector<32x128xf32>, i32 -> vector<32x128xf32>
    %143 = arith.mulf %142, %28 : vector<32x128xf32>
    %c31_i32_45 = arith.constant 31 : i32
    %144 = tpu.dynamic_rotate %137 by %c31_i32_45 dim 0 : vector<32x128xf32>, i32 -> vector<32x128xf32>
    %145 = arith.mulf %144, %37 : vector<32x128xf32>
    %c30_i32_46 = arith.constant 30 : i32
    %146 = tpu.dynamic_rotate %137 by %c30_i32_46 dim 0 : vector<32x128xf32>, i32 -> vector<32x128xf32>
    %147 = arith.mulf %146, %46 : vector<32x128xf32>
    %c29_i32_47 = arith.constant 29 : i32
    %148 = tpu.dynamic_rotate %137 by %c29_i32_47 dim 0 : vector<32x128xf32>, i32 -> vector<32x128xf32>
    %149 = arith.mulf %148, %55 : vector<32x128xf32>
    %150 = tpu.concatenate %139, %141, %143, %137, %145, %147, %149 in 1 : vector<32x128xf32>, vector<32x128xf32>, vector<32x128xf32>, vector<32x128xf32>, vector<32x128xf32>, vector<32x128xf32>, vector<32x128xf32> -> vector<32x896xf32>
    %c64 = arith.constant 64 : index
    %c0_48 = arith.constant 0 : index
    %151 = vector.load %arg1[%c64, %c0_48] : memref<324x896xf32, #tpu.memory_space<vmem>>, vector<64x896xf32>
    %cst_49 = arith.constant dense<0.000000e+00> : vector<32x64xf32>
    %152 = tpu.matmul %150, %151, %cst_49 {dimension_numbers = #tpu.dot_dimension_numbers<[1], [1], [0], [0], [0, 0, 1, 0], [], []>} : vector<32x896xf32>, vector<64x896xf32>, vector<32x64xf32> -> vector<32x64xf32>
    %153 = vector.extract_strided_slice %56 {offsets = [0, 0], sizes = [32, 64], strides = [1, 1]} : vector<32x128xf32> to vector<32x64xf32>
    %154 = tpu.concatenate %152, %153 in 1 : vector<32x64xf32>, vector<32x64xf32> -> vector<32x128xf32>
    %c2 = arith.constant 2 : index
    %c0_50 = arith.constant 0 : index
    %155 = vector.load %arg4[%c2, %c0_50] : memref<32x128xf32, #tpu.memory_space<vmem>>, vector<1x128xf32>
    %c9 = arith.constant 9 : index
    %c0_51 = arith.constant 0 : index
    %156 = vector.load %arg4[%c9, %c0_51] : memref<32x128xf32, #tpu.memory_space<vmem>>, vector<1x128xf32>
    %cst_52 = arith.constant dense<0.000000e+00> : vector<128xf32>
    %157 = vector.multi_reduction <add>, %154, %cst_52 [0] : vector<32x128xf32> to vector<128xf32>
    %158 = vector.shape_cast %157 : vector<128xf32> to vector<1x128xf32>
    %cst_53 = arith.constant 3.200000e+01 : f32
    %159 = vector.broadcast %cst_53 : f32 to vector<1x128xf32>
    %160 = arith.divf %158, %159 : vector<1x128xf32>
    %161 = vector.broadcast %160 : vector<1x128xf32> to vector<32x128xf32>
    %162 = arith.subf %154, %161 : vector<32x128xf32>
    %163 = arith.mulf %162, %162 : vector<32x128xf32>
    %cst_54 = arith.constant dense<0.000000e+00> : vector<128xf32>
    %164 = vector.multi_reduction <add>, %163, %cst_54 [0] : vector<32x128xf32> to vector<128xf32>
    %165 = vector.shape_cast %164 : vector<128xf32> to vector<1x128xf32>
    %cst_55 = arith.constant 3.200000e+01 : f32
    %166 = vector.broadcast %cst_55 : f32 to vector<1x128xf32>
    %167 = arith.divf %165, %166 : vector<1x128xf32>
    %cst_56 = arith.constant 9.99999974E-6 : f32
    %168 = vector.broadcast %cst_56 : f32 to vector<1x128xf32>
    %169 = arith.addf %167, %168 : vector<1x128xf32>
    %170 = math.rsqrt %169 : vector<1x128xf32>
    %171 = arith.mulf %155, %170 : vector<1x128xf32>
    %172 = vector.broadcast %171 : vector<1x128xf32> to vector<32x128xf32>
    %173 = arith.mulf %162, %172 : vector<32x128xf32>
    %174 = vector.broadcast %156 : vector<1x128xf32> to vector<32x128xf32>
    %175 = arith.addf %173, %174 : vector<32x128xf32>
    %cst_57 = arith.constant 0.000000e+00 : f32
    %176 = vector.broadcast %cst_57 : f32 to vector<32x128xf32>
    %177 = arith.maximumf %175, %176 : vector<32x128xf32>
    %c3_i32_58 = arith.constant 3 : i32
    %178 = tpu.dynamic_rotate %177 by %c3_i32_58 dim 0 : vector<32x128xf32>, i32 -> vector<32x128xf32>
    %179 = arith.mulf %178, %10 : vector<32x128xf32>
    %c2_i32_59 = arith.constant 2 : i32
    %180 = tpu.dynamic_rotate %177 by %c2_i32_59 dim 0 : vector<32x128xf32>, i32 -> vector<32x128xf32>
    %181 = arith.mulf %180, %19 : vector<32x128xf32>
    %c1_i32_60 = arith.constant 1 : i32
    %182 = tpu.dynamic_rotate %177 by %c1_i32_60 dim 0 : vector<32x128xf32>, i32 -> vector<32x128xf32>
    %183 = arith.mulf %182, %28 : vector<32x128xf32>
    %c31_i32_61 = arith.constant 31 : i32
    %184 = tpu.dynamic_rotate %177 by %c31_i32_61 dim 0 : vector<32x128xf32>, i32 -> vector<32x128xf32>
    %185 = arith.mulf %184, %37 : vector<32x128xf32>
    %c30_i32_62 = arith.constant 30 : i32
    %186 = tpu.dynamic_rotate %177 by %c30_i32_62 dim 0 : vector<32x128xf32>, i32 -> vector<32x128xf32>
    %187 = arith.mulf %186, %46 : vector<32x128xf32>
    %c29_i32_63 = arith.constant 29 : i32
    %188 = tpu.dynamic_rotate %177 by %c29_i32_63 dim 0 : vector<32x128xf32>, i32 -> vector<32x128xf32>
    %189 = arith.mulf %188, %55 : vector<32x128xf32>
    %190 = tpu.concatenate %179, %181, %183, %177, %185, %187, %189 in 1 : vector<32x128xf32>, vector<32x128xf32>, vector<32x128xf32>, vector<32x128xf32>, vector<32x128xf32>, vector<32x128xf32>, vector<32x128xf32> -> vector<32x896xf32>
    %c128 = arith.constant 128 : index
    %c0_64 = arith.constant 0 : index
    %191 = vector.load %arg1[%c128, %c0_64] : memref<324x896xf32, #tpu.memory_space<vmem>>, vector<64x896xf32>
    %cst_65 = arith.constant dense<0.000000e+00> : vector<32x64xf32>
    %192 = tpu.matmul %190, %191, %cst_65 {dimension_numbers = #tpu.dot_dimension_numbers<[1], [1], [0], [0], [0, 0, 1, 0], [], []>} : vector<32x896xf32>, vector<64x896xf32>, vector<32x64xf32> -> vector<32x64xf32>
    %193 = vector.extract_strided_slice %56 {offsets = [0, 0], sizes = [32, 64], strides = [1, 1]} : vector<32x128xf32> to vector<32x64xf32>
    %194 = tpu.concatenate %192, %193 in 1 : vector<32x64xf32>, vector<32x64xf32> -> vector<32x128xf32>
    %c3 = arith.constant 3 : index
    %c0_66 = arith.constant 0 : index
    %195 = vector.load %arg4[%c3, %c0_66] : memref<32x128xf32, #tpu.memory_space<vmem>>, vector<1x128xf32>
    %c10 = arith.constant 10 : index
    %c0_67 = arith.constant 0 : index
    %196 = vector.load %arg4[%c10, %c0_67] : memref<32x128xf32, #tpu.memory_space<vmem>>, vector<1x128xf32>
    %cst_68 = arith.constant dense<0.000000e+00> : vector<128xf32>
    %197 = vector.multi_reduction <add>, %194, %cst_68 [0] : vector<32x128xf32> to vector<128xf32>
    %198 = vector.shape_cast %197 : vector<128xf32> to vector<1x128xf32>
    %cst_69 = arith.constant 3.200000e+01 : f32
    %199 = vector.broadcast %cst_69 : f32 to vector<1x128xf32>
    %200 = arith.divf %198, %199 : vector<1x128xf32>
    %201 = vector.broadcast %200 : vector<1x128xf32> to vector<32x128xf32>
    %202 = arith.subf %194, %201 : vector<32x128xf32>
    %203 = arith.mulf %202, %202 : vector<32x128xf32>
    %cst_70 = arith.constant dense<0.000000e+00> : vector<128xf32>
    %204 = vector.multi_reduction <add>, %203, %cst_70 [0] : vector<32x128xf32> to vector<128xf32>
    %205 = vector.shape_cast %204 : vector<128xf32> to vector<1x128xf32>
    %cst_71 = arith.constant 3.200000e+01 : f32
    %206 = vector.broadcast %cst_71 : f32 to vector<1x128xf32>
    %207 = arith.divf %205, %206 : vector<1x128xf32>
    %cst_72 = arith.constant 9.99999974E-6 : f32
    %208 = vector.broadcast %cst_72 : f32 to vector<1x128xf32>
    %209 = arith.addf %207, %208 : vector<1x128xf32>
    %210 = math.rsqrt %209 : vector<1x128xf32>
    %211 = arith.mulf %195, %210 : vector<1x128xf32>
    %212 = vector.broadcast %211 : vector<1x128xf32> to vector<32x128xf32>
    %213 = arith.mulf %202, %212 : vector<32x128xf32>
    %214 = vector.broadcast %196 : vector<1x128xf32> to vector<32x128xf32>
    %215 = arith.addf %213, %214 : vector<32x128xf32>
    %cst_73 = arith.constant 0.000000e+00 : f32
    %216 = vector.broadcast %cst_73 : f32 to vector<32x128xf32>
    %217 = arith.maximumf %215, %216 : vector<32x128xf32>
    %218 = vector.shape_cast %217 : vector<32x128xf32> to vector<2x16x128xf32>
    %219 = vector.extract_strided_slice %218 {offsets = [0, 0, 0], sizes = [2, 1, 128], strides = [1, 1, 1]} : vector<2x16x128xf32> to vector<2x1x128xf32>
    %220 = vector.shape_cast %219 : vector<2x1x128xf32> to vector<2x128xf32>
    %221 = vector.extract_strided_slice %218 {offsets = [0, 1, 0], sizes = [2, 1, 128], strides = [1, 1, 1]} : vector<2x16x128xf32> to vector<2x1x128xf32>
    %222 = vector.shape_cast %221 : vector<2x1x128xf32> to vector<2x128xf32>
    %223 = vector.extract_strided_slice %218 {offsets = [0, 2, 0], sizes = [2, 1, 128], strides = [1, 1, 1]} : vector<2x16x128xf32> to vector<2x1x128xf32>
    %224 = vector.shape_cast %223 : vector<2x1x128xf32> to vector<2x128xf32>
    %225 = vector.extract_strided_slice %218 {offsets = [0, 3, 0], sizes = [2, 1, 128], strides = [1, 1, 1]} : vector<2x16x128xf32> to vector<2x1x128xf32>
    %226 = vector.shape_cast %225 : vector<2x1x128xf32> to vector<2x128xf32>
    %227 = vector.extract_strided_slice %218 {offsets = [0, 4, 0], sizes = [2, 1, 128], strides = [1, 1, 1]} : vector<2x16x128xf32> to vector<2x1x128xf32>
    %228 = vector.shape_cast %227 : vector<2x1x128xf32> to vector<2x128xf32>
    %229 = vector.extract_strided_slice %218 {offsets = [0, 5, 0], sizes = [2, 1, 128], strides = [1, 1, 1]} : vector<2x16x128xf32> to vector<2x1x128xf32>
    %230 = vector.shape_cast %229 : vector<2x1x128xf32> to vector<2x128xf32>
    %231 = vector.extract_strided_slice %218 {offsets = [0, 6, 0], sizes = [2, 1, 128], strides = [1, 1, 1]} : vector<2x16x128xf32> to vector<2x1x128xf32>
    %232 = vector.shape_cast %231 : vector<2x1x128xf32> to vector<2x128xf32>
    %233 = vector.extract_strided_slice %218 {offsets = [0, 7, 0], sizes = [2, 1, 128], strides = [1, 1, 1]} : vector<2x16x128xf32> to vector<2x1x128xf32>
    %234 = vector.shape_cast %233 : vector<2x1x128xf32> to vector<2x128xf32>
    %235 = vector.extract_strided_slice %218 {offsets = [0, 8, 0], sizes = [2, 1, 128], strides = [1, 1, 1]} : vector<2x16x128xf32> to vector<2x1x128xf32>
    %236 = vector.shape_cast %235 : vector<2x1x128xf32> to vector<2x128xf32>
    %237 = vector.extract_strided_slice %218 {offsets = [0, 9, 0], sizes = [2, 1, 128], strides = [1, 1, 1]} : vector<2x16x128xf32> to vector<2x1x128xf32>
    %238 = vector.shape_cast %237 : vector<2x1x128xf32> to vector<2x128xf32>
    %239 = vector.extract_strided_slice %218 {offsets = [0, 10, 0], sizes = [2, 1, 128], strides = [1, 1, 1]} : vector<2x16x128xf32> to vector<2x1x128xf32>
    %240 = vector.shape_cast %239 : vector<2x1x128xf32> to vector<2x128xf32>
    %241 = vector.extract_strided_slice %218 {offsets = [0, 11, 0], sizes = [2, 1, 128], strides = [1, 1, 1]} : vector<2x16x128xf32> to vector<2x1x128xf32>
    %242 = vector.shape_cast %241 : vector<2x1x128xf32> to vector<2x128xf32>
    %243 = vector.extract_strided_slice %218 {offsets = [0, 12, 0], sizes = [2, 1, 128], strides = [1, 1, 1]} : vector<2x16x128xf32> to vector<2x1x128xf32>
    %244 = vector.shape_cast %243 : vector<2x1x128xf32> to vector<2x128xf32>
    %245 = vector.extract_strided_slice %218 {offsets = [0, 13, 0], sizes = [2, 1, 128], strides = [1, 1, 1]} : vector<2x16x128xf32> to vector<2x1x128xf32>
    %246 = vector.shape_cast %245 : vector<2x1x128xf32> to vector<2x128xf32>
    %247 = vector.extract_strided_slice %218 {offsets = [0, 14, 0], sizes = [2, 1, 128], strides = [1, 1, 1]} : vector<2x16x128xf32> to vector<2x1x128xf32>
    %248 = vector.shape_cast %247 : vector<2x1x128xf32> to vector<2x128xf32>
    %249 = vector.extract_strided_slice %218 {offsets = [0, 15, 0], sizes = [2, 1, 128], strides = [1, 1, 1]} : vector<2x16x128xf32> to vector<2x1x128xf32>
    %250 = vector.shape_cast %249 : vector<2x1x128xf32> to vector<2x128xf32>
    %251 = tpu.concatenate %220, %222, %224, %226, %228, %230, %232, %234, %236, %238, %240, %242, %244, %246, %248, %250 in 1 : vector<2x128xf32>, vector<2x128xf32>, vector<2x128xf32>, vector<2x128xf32>, vector<2x128xf32>, vector<2x128xf32>, vector<2x128xf32>, vector<2x128xf32>, vector<2x128xf32>, vector<2x128xf32>, vector<2x128xf32>, vector<2x128xf32>, vector<2x128xf32>, vector<2x128xf32>, vector<2x128xf32>, vector<2x128xf32> -> vector<2x2048xf32>
    %252 = arith.truncf %251 : vector<2x2048xf32> to vector<2x2048xbf16>
    %c0_74 = arith.constant 0 : index
    %c0_75 = arith.constant 0 : index
    %253 = vector.load %arg2[%c0_74, %c0_75] : memref<2048x128xbf16, #tpu.memory_space<vmem>>, vector<2048x128xbf16>
    %cst_76 = arith.constant dense<0.000000e+00> : vector<2x128xf32>
    %254 = tpu.matmul %252, %253, %cst_76 {dimension_numbers = #tpu.dot_dimension_numbers<[1], [0], [0], [1], [0, 0, 1, 1], [], []>} : vector<2x2048xbf16>, vector<2048x128xbf16>, vector<2x128xf32> -> vector<2x128xf32>
    %c14 = arith.constant 14 : index
    %c0_77 = arith.constant 0 : index
    %255 = vector.load %arg4[%c14, %c0_77] : memref<32x128xf32, #tpu.memory_space<vmem>>, vector<1x128xf32>
    %256 = vector.broadcast %255 : vector<1x128xf32> to vector<2x128xf32>
    %257 = arith.addf %254, %256 : vector<2x128xf32>
    %258 = arith.truncf %257 : vector<2x128xf32> to vector<2x128xbf16>
    %c0_78 = arith.constant 0 : index
    %c0_79 = arith.constant 0 : index
    %259 = vector.load %arg3[%c0_78, %c0_79] : memref<128x2048xbf16, #tpu.memory_space<vmem>>, vector<128x2048xbf16>
    %cst_80 = arith.constant dense<0.000000e+00> : vector<2x2048xf32>
    %260 = tpu.matmul %258, %259, %cst_80 {dimension_numbers = #tpu.dot_dimension_numbers<[1], [0], [0], [1], [0, 0, 1, 1], [], []>} : vector<2x128xbf16>, vector<128x2048xbf16>, vector<2x2048xf32> -> vector<2x2048xf32>
    %261 = vector.extract_strided_slice %260 {offsets = [0, 0], sizes = [2, 128], strides = [1, 1]} : vector<2x2048xf32> to vector<2x128xf32>
    %262 = vector.extract_strided_slice %260 {offsets = [0, 128], sizes = [2, 128], strides = [1, 1]} : vector<2x2048xf32> to vector<2x128xf32>
    %263 = vector.extract_strided_slice %260 {offsets = [0, 256], sizes = [2, 128], strides = [1, 1]} : vector<2x2048xf32> to vector<2x128xf32>
    %264 = vector.extract_strided_slice %260 {offsets = [0, 384], sizes = [2, 128], strides = [1, 1]} : vector<2x2048xf32> to vector<2x128xf32>
    %265 = vector.extract_strided_slice %260 {offsets = [0, 512], sizes = [2, 128], strides = [1, 1]} : vector<2x2048xf32> to vector<2x128xf32>
    %266 = vector.extract_strided_slice %260 {offsets = [0, 640], sizes = [2, 128], strides = [1, 1]} : vector<2x2048xf32> to vector<2x128xf32>
    %267 = vector.extract_strided_slice %260 {offsets = [0, 768], sizes = [2, 128], strides = [1, 1]} : vector<2x2048xf32> to vector<2x128xf32>
    %268 = vector.extract_strided_slice %260 {offsets = [0, 896], sizes = [2, 128], strides = [1, 1]} : vector<2x2048xf32> to vector<2x128xf32>
    %269 = vector.extract_strided_slice %260 {offsets = [0, 1024], sizes = [2, 128], strides = [1, 1]} : vector<2x2048xf32> to vector<2x128xf32>
    %270 = vector.extract_strided_slice %260 {offsets = [0, 1152], sizes = [2, 128], strides = [1, 1]} : vector<2x2048xf32> to vector<2x128xf32>
    %271 = vector.extract_strided_slice %260 {offsets = [0, 1280], sizes = [2, 128], strides = [1, 1]} : vector<2x2048xf32> to vector<2x128xf32>
    %272 = vector.extract_strided_slice %260 {offsets = [0, 1408], sizes = [2, 128], strides = [1, 1]} : vector<2x2048xf32> to vector<2x128xf32>
    %273 = vector.extract_strided_slice %260 {offsets = [0, 1536], sizes = [2, 128], strides = [1, 1]} : vector<2x2048xf32> to vector<2x128xf32>
    %274 = vector.extract_strided_slice %260 {offsets = [0, 1664], sizes = [2, 128], strides = [1, 1]} : vector<2x2048xf32> to vector<2x128xf32>
    %275 = vector.extract_strided_slice %260 {offsets = [0, 1792], sizes = [2, 128], strides = [1, 1]} : vector<2x2048xf32> to vector<2x128xf32>
    %276 = vector.extract_strided_slice %260 {offsets = [0, 1920], sizes = [2, 128], strides = [1, 1]} : vector<2x2048xf32> to vector<2x128xf32>
    %277 = vector.shape_cast %261 : vector<2x128xf32> to vector<2x1x128xf32>
    %278 = vector.shape_cast %262 : vector<2x128xf32> to vector<2x1x128xf32>
    %279 = vector.shape_cast %263 : vector<2x128xf32> to vector<2x1x128xf32>
    %280 = vector.shape_cast %264 : vector<2x128xf32> to vector<2x1x128xf32>
    %281 = vector.shape_cast %265 : vector<2x128xf32> to vector<2x1x128xf32>
    %282 = vector.shape_cast %266 : vector<2x128xf32> to vector<2x1x128xf32>
    %283 = vector.shape_cast %267 : vector<2x128xf32> to vector<2x1x128xf32>
    %284 = vector.shape_cast %268 : vector<2x128xf32> to vector<2x1x128xf32>
    %285 = vector.shape_cast %269 : vector<2x128xf32> to vector<2x1x128xf32>
    %286 = vector.shape_cast %270 : vector<2x128xf32> to vector<2x1x128xf32>
    %287 = vector.shape_cast %271 : vector<2x128xf32> to vector<2x1x128xf32>
    %288 = vector.shape_cast %272 : vector<2x128xf32> to vector<2x1x128xf32>
    %289 = vector.shape_cast %273 : vector<2x128xf32> to vector<2x1x128xf32>
    %290 = vector.shape_cast %274 : vector<2x128xf32> to vector<2x1x128xf32>
    %291 = vector.shape_cast %275 : vector<2x128xf32> to vector<2x1x128xf32>
    %292 = vector.shape_cast %276 : vector<2x128xf32> to vector<2x1x128xf32>
    %293 = tpu.concatenate %277, %278, %279, %280, %281, %282, %283, %284, %285, %286, %287, %288, %289, %290, %291, %292 in 1 : vector<2x1x128xf32>, vector<2x1x128xf32>, vector<2x1x128xf32>, vector<2x1x128xf32>, vector<2x1x128xf32>, vector<2x1x128xf32>, vector<2x1x128xf32>, vector<2x1x128xf32>, vector<2x1x128xf32>, vector<2x1x128xf32>, vector<2x1x128xf32>, vector<2x1x128xf32>, vector<2x1x128xf32>, vector<2x1x128xf32>, vector<2x1x128xf32>, vector<2x1x128xf32> -> vector<2x16x128xf32>
    %294 = vector.shape_cast %293 : vector<2x16x128xf32> to vector<32x128xf32>
    %c16 = arith.constant 16 : index
    %c0_81 = arith.constant 0 : index
    %295 = vector.load %arg4[%c16, %c0_81] : memref<32x128xf32, #tpu.memory_space<vmem>>, vector<16x128xf32>
    %296 = tpu.concatenate %295, %295 in 0 : vector<16x128xf32>, vector<16x128xf32> -> vector<32x128xf32>
    %297 = arith.addf %294, %296 : vector<32x128xf32>
    %cst_82 = arith.constant 0.000000e+00 : f32
    %298 = vector.broadcast %cst_82 : f32 to vector<32x128xf32>
    %299 = arith.maximumf %297, %298 : vector<32x128xf32>
    %c3_i32_83 = arith.constant 3 : i32
    %300 = tpu.dynamic_rotate %299 by %c3_i32_83 dim 0 : vector<32x128xf32>, i32 -> vector<32x128xf32>
    %301 = arith.mulf %300, %10 : vector<32x128xf32>
    %c2_i32_84 = arith.constant 2 : i32
    %302 = tpu.dynamic_rotate %299 by %c2_i32_84 dim 0 : vector<32x128xf32>, i32 -> vector<32x128xf32>
    %303 = arith.mulf %302, %19 : vector<32x128xf32>
    %c1_i32_85 = arith.constant 1 : i32
    %304 = tpu.dynamic_rotate %299 by %c1_i32_85 dim 0 : vector<32x128xf32>, i32 -> vector<32x128xf32>
    %305 = arith.mulf %304, %28 : vector<32x128xf32>
    %c31_i32_86 = arith.constant 31 : i32
    %306 = tpu.dynamic_rotate %299 by %c31_i32_86 dim 0 : vector<32x128xf32>, i32 -> vector<32x128xf32>
    %307 = arith.mulf %306, %37 : vector<32x128xf32>
    %c30_i32_87 = arith.constant 30 : i32
    %308 = tpu.dynamic_rotate %299 by %c30_i32_87 dim 0 : vector<32x128xf32>, i32 -> vector<32x128xf32>
    %309 = arith.mulf %308, %46 : vector<32x128xf32>
    %c29_i32_88 = arith.constant 29 : i32
    %310 = tpu.dynamic_rotate %299 by %c29_i32_88 dim 0 : vector<32x128xf32>, i32 -> vector<32x128xf32>
    %311 = arith.mulf %310, %55 : vector<32x128xf32>
    %312 = tpu.concatenate %301, %303, %305, %299, %307, %309, %311 in 1 : vector<32x128xf32>, vector<32x128xf32>, vector<32x128xf32>, vector<32x128xf32>, vector<32x128xf32>, vector<32x128xf32>, vector<32x128xf32> -> vector<32x896xf32>
    %c192 = arith.constant 192 : index
    %c0_89 = arith.constant 0 : index
    %313 = vector.load %arg1[%c192, %c0_89] : memref<324x896xf32, #tpu.memory_space<vmem>>, vector<64x896xf32>
    %cst_90 = arith.constant dense<0.000000e+00> : vector<32x64xf32>
    %314 = tpu.matmul %312, %313, %cst_90 {dimension_numbers = #tpu.dot_dimension_numbers<[1], [1], [0], [0], [0, 0, 1, 0], [], []>} : vector<32x896xf32>, vector<64x896xf32>, vector<32x64xf32> -> vector<32x64xf32>
    %315 = vector.extract_strided_slice %56 {offsets = [0, 0], sizes = [32, 64], strides = [1, 1]} : vector<32x128xf32> to vector<32x64xf32>
    %316 = tpu.concatenate %314, %315 in 1 : vector<32x64xf32>, vector<32x64xf32> -> vector<32x128xf32>
    %c4 = arith.constant 4 : index
    %c0_91 = arith.constant 0 : index
    %317 = vector.load %arg4[%c4, %c0_91] : memref<32x128xf32, #tpu.memory_space<vmem>>, vector<1x128xf32>
    %c11 = arith.constant 11 : index
    %c0_92 = arith.constant 0 : index
    %318 = vector.load %arg4[%c11, %c0_92] : memref<32x128xf32, #tpu.memory_space<vmem>>, vector<1x128xf32>
    %cst_93 = arith.constant dense<0.000000e+00> : vector<128xf32>
    %319 = vector.multi_reduction <add>, %316, %cst_93 [0] : vector<32x128xf32> to vector<128xf32>
    %320 = vector.shape_cast %319 : vector<128xf32> to vector<1x128xf32>
    %cst_94 = arith.constant 3.200000e+01 : f32
    %321 = vector.broadcast %cst_94 : f32 to vector<1x128xf32>
    %322 = arith.divf %320, %321 : vector<1x128xf32>
    %323 = vector.broadcast %322 : vector<1x128xf32> to vector<32x128xf32>
    %324 = arith.subf %316, %323 : vector<32x128xf32>
    %325 = arith.mulf %324, %324 : vector<32x128xf32>
    %cst_95 = arith.constant dense<0.000000e+00> : vector<128xf32>
    %326 = vector.multi_reduction <add>, %325, %cst_95 [0] : vector<32x128xf32> to vector<128xf32>
    %327 = vector.shape_cast %326 : vector<128xf32> to vector<1x128xf32>
    %cst_96 = arith.constant 3.200000e+01 : f32
    %328 = vector.broadcast %cst_96 : f32 to vector<1x128xf32>
    %329 = arith.divf %327, %328 : vector<1x128xf32>
    %cst_97 = arith.constant 9.99999974E-6 : f32
    %330 = vector.broadcast %cst_97 : f32 to vector<1x128xf32>
    %331 = arith.addf %329, %330 : vector<1x128xf32>
    %332 = math.rsqrt %331 : vector<1x128xf32>
    %333 = arith.mulf %317, %332 : vector<1x128xf32>
    %334 = vector.broadcast %333 : vector<1x128xf32> to vector<32x128xf32>
    %335 = arith.mulf %324, %334 : vector<32x128xf32>
    %336 = vector.broadcast %318 : vector<1x128xf32> to vector<32x128xf32>
    %337 = arith.addf %335, %336 : vector<32x128xf32>
    %cst_98 = arith.constant 0.000000e+00 : f32
    %338 = vector.broadcast %cst_98 : f32 to vector<32x128xf32>
    %339 = arith.maximumf %337, %338 : vector<32x128xf32>
    %c3_i32_99 = arith.constant 3 : i32
    %340 = tpu.dynamic_rotate %339 by %c3_i32_99 dim 0 : vector<32x128xf32>, i32 -> vector<32x128xf32>
    %341 = arith.mulf %340, %10 : vector<32x128xf32>
    %c2_i32_100 = arith.constant 2 : i32
    %342 = tpu.dynamic_rotate %339 by %c2_i32_100 dim 0 : vector<32x128xf32>, i32 -> vector<32x128xf32>
    %343 = arith.mulf %342, %19 : vector<32x128xf32>
    %c1_i32_101 = arith.constant 1 : i32
    %344 = tpu.dynamic_rotate %339 by %c1_i32_101 dim 0 : vector<32x128xf32>, i32 -> vector<32x128xf32>
    %345 = arith.mulf %344, %28 : vector<32x128xf32>
    %c31_i32_102 = arith.constant 31 : i32
    %346 = tpu.dynamic_rotate %339 by %c31_i32_102 dim 0 : vector<32x128xf32>, i32 -> vector<32x128xf32>
    %347 = arith.mulf %346, %37 : vector<32x128xf32>
    %c30_i32_103 = arith.constant 30 : i32
    %348 = tpu.dynamic_rotate %339 by %c30_i32_103 dim 0 : vector<32x128xf32>, i32 -> vector<32x128xf32>
    %349 = arith.mulf %348, %46 : vector<32x128xf32>
    %c29_i32_104 = arith.constant 29 : i32
    %350 = tpu.dynamic_rotate %339 by %c29_i32_104 dim 0 : vector<32x128xf32>, i32 -> vector<32x128xf32>
    %351 = arith.mulf %350, %55 : vector<32x128xf32>
    %352 = tpu.concatenate %341, %343, %345, %339, %347, %349, %351 in 1 : vector<32x128xf32>, vector<32x128xf32>, vector<32x128xf32>, vector<32x128xf32>, vector<32x128xf32>, vector<32x128xf32>, vector<32x128xf32> -> vector<32x896xf32>
    %c256 = arith.constant 256 : index
    %c0_105 = arith.constant 0 : index
    %353 = vector.load %arg1[%c256, %c0_105] : memref<324x896xf32, #tpu.memory_space<vmem>>, vector<32x896xf32>
    %cst_106 = arith.constant dense<0.000000e+00> : vector<32x32xf32>
    %354 = tpu.matmul %352, %353, %cst_106 {dimension_numbers = #tpu.dot_dimension_numbers<[1], [1], [0], [0], [0, 0, 1, 0], [], []>} : vector<32x896xf32>, vector<32x896xf32>, vector<32x32xf32> -> vector<32x32xf32>
    %355 = vector.extract_strided_slice %56 {offsets = [0, 0], sizes = [32, 96], strides = [1, 1]} : vector<32x128xf32> to vector<32x96xf32>
    %356 = tpu.concatenate %354, %355 in 1 : vector<32x32xf32>, vector<32x96xf32> -> vector<32x128xf32>
    %c5 = arith.constant 5 : index
    %c0_107 = arith.constant 0 : index
    %357 = vector.load %arg4[%c5, %c0_107] : memref<32x128xf32, #tpu.memory_space<vmem>>, vector<1x128xf32>
    %c12 = arith.constant 12 : index
    %c0_108 = arith.constant 0 : index
    %358 = vector.load %arg4[%c12, %c0_108] : memref<32x128xf32, #tpu.memory_space<vmem>>, vector<1x128xf32>
    %cst_109 = arith.constant dense<0.000000e+00> : vector<128xf32>
    %359 = vector.multi_reduction <add>, %356, %cst_109 [0] : vector<32x128xf32> to vector<128xf32>
    %360 = vector.shape_cast %359 : vector<128xf32> to vector<1x128xf32>
    %cst_110 = arith.constant 3.200000e+01 : f32
    %361 = vector.broadcast %cst_110 : f32 to vector<1x128xf32>
    %362 = arith.divf %360, %361 : vector<1x128xf32>
    %363 = vector.broadcast %362 : vector<1x128xf32> to vector<32x128xf32>
    %364 = arith.subf %356, %363 : vector<32x128xf32>
    %365 = arith.mulf %364, %364 : vector<32x128xf32>
    %cst_111 = arith.constant dense<0.000000e+00> : vector<128xf32>
    %366 = vector.multi_reduction <add>, %365, %cst_111 [0] : vector<32x128xf32> to vector<128xf32>
    %367 = vector.shape_cast %366 : vector<128xf32> to vector<1x128xf32>
    %cst_112 = arith.constant 3.200000e+01 : f32
    %368 = vector.broadcast %cst_112 : f32 to vector<1x128xf32>
    %369 = arith.divf %367, %368 : vector<1x128xf32>
    %cst_113 = arith.constant 9.99999974E-6 : f32
    %370 = vector.broadcast %cst_113 : f32 to vector<1x128xf32>
    %371 = arith.addf %369, %370 : vector<1x128xf32>
    %372 = math.rsqrt %371 : vector<1x128xf32>
    %373 = arith.mulf %357, %372 : vector<1x128xf32>
    %374 = vector.broadcast %373 : vector<1x128xf32> to vector<32x128xf32>
    %375 = arith.mulf %364, %374 : vector<32x128xf32>
    %376 = vector.broadcast %358 : vector<1x128xf32> to vector<32x128xf32>
    %377 = arith.addf %375, %376 : vector<32x128xf32>
    %cst_114 = arith.constant 0.000000e+00 : f32
    %378 = vector.broadcast %cst_114 : f32 to vector<32x128xf32>
    %379 = arith.maximumf %377, %378 : vector<32x128xf32>
    %c3_i32_115 = arith.constant 3 : i32
    %380 = tpu.dynamic_rotate %379 by %c3_i32_115 dim 0 : vector<32x128xf32>, i32 -> vector<32x128xf32>
    %381 = arith.mulf %380, %10 : vector<32x128xf32>
    %c2_i32_116 = arith.constant 2 : i32
    %382 = tpu.dynamic_rotate %379 by %c2_i32_116 dim 0 : vector<32x128xf32>, i32 -> vector<32x128xf32>
    %383 = arith.mulf %382, %19 : vector<32x128xf32>
    %c1_i32_117 = arith.constant 1 : i32
    %384 = tpu.dynamic_rotate %379 by %c1_i32_117 dim 0 : vector<32x128xf32>, i32 -> vector<32x128xf32>
    %385 = arith.mulf %384, %28 : vector<32x128xf32>
    %c31_i32_118 = arith.constant 31 : i32
    %386 = tpu.dynamic_rotate %379 by %c31_i32_118 dim 0 : vector<32x128xf32>, i32 -> vector<32x128xf32>
    %387 = arith.mulf %386, %37 : vector<32x128xf32>
    %c30_i32_119 = arith.constant 30 : i32
    %388 = tpu.dynamic_rotate %379 by %c30_i32_119 dim 0 : vector<32x128xf32>, i32 -> vector<32x128xf32>
    %389 = arith.mulf %388, %46 : vector<32x128xf32>
    %c29_i32_120 = arith.constant 29 : i32
    %390 = tpu.dynamic_rotate %379 by %c29_i32_120 dim 0 : vector<32x128xf32>, i32 -> vector<32x128xf32>
    %391 = arith.mulf %390, %55 : vector<32x128xf32>
    %392 = tpu.concatenate %381, %383, %385, %379, %387, %389, %391 in 1 : vector<32x128xf32>, vector<32x128xf32>, vector<32x128xf32>, vector<32x128xf32>, vector<32x128xf32>, vector<32x128xf32>, vector<32x128xf32> -> vector<32x896xf32>
    %c288 = arith.constant 288 : index
    %c0_121 = arith.constant 0 : index
    %393 = vector.load %arg1[%c288, %c0_121] : memref<324x896xf32, #tpu.memory_space<vmem>>, vector<32x896xf32>
    %cst_122 = arith.constant dense<0.000000e+00> : vector<32x32xf32>
    %394 = tpu.matmul %392, %393, %cst_122 {dimension_numbers = #tpu.dot_dimension_numbers<[1], [1], [0], [0], [0, 0, 1, 0], [], []>} : vector<32x896xf32>, vector<32x896xf32>, vector<32x32xf32> -> vector<32x32xf32>
    %395 = vector.extract_strided_slice %56 {offsets = [0, 0], sizes = [32, 96], strides = [1, 1]} : vector<32x128xf32> to vector<32x96xf32>
    %396 = tpu.concatenate %394, %395 in 1 : vector<32x32xf32>, vector<32x96xf32> -> vector<32x128xf32>
    %c6 = arith.constant 6 : index
    %c0_123 = arith.constant 0 : index
    %397 = vector.load %arg4[%c6, %c0_123] : memref<32x128xf32, #tpu.memory_space<vmem>>, vector<1x128xf32>
    %c13 = arith.constant 13 : index
    %c0_124 = arith.constant 0 : index
    %398 = vector.load %arg4[%c13, %c0_124] : memref<32x128xf32, #tpu.memory_space<vmem>>, vector<1x128xf32>
    %cst_125 = arith.constant dense<0.000000e+00> : vector<128xf32>
    %399 = vector.multi_reduction <add>, %396, %cst_125 [0] : vector<32x128xf32> to vector<128xf32>
    %400 = vector.shape_cast %399 : vector<128xf32> to vector<1x128xf32>
    %cst_126 = arith.constant 3.200000e+01 : f32
    %401 = vector.broadcast %cst_126 : f32 to vector<1x128xf32>
    %402 = arith.divf %400, %401 : vector<1x128xf32>
    %403 = vector.broadcast %402 : vector<1x128xf32> to vector<32x128xf32>
    %404 = arith.subf %396, %403 : vector<32x128xf32>
    %405 = arith.mulf %404, %404 : vector<32x128xf32>
    %cst_127 = arith.constant dense<0.000000e+00> : vector<128xf32>
    %406 = vector.multi_reduction <add>, %405, %cst_127 [0] : vector<32x128xf32> to vector<128xf32>
    %407 = vector.shape_cast %406 : vector<128xf32> to vector<1x128xf32>
    %cst_128 = arith.constant 3.200000e+01 : f32
    %408 = vector.broadcast %cst_128 : f32 to vector<1x128xf32>
    %409 = arith.divf %407, %408 : vector<1x128xf32>
    %cst_129 = arith.constant 9.99999974E-6 : f32
    %410 = vector.broadcast %cst_129 : f32 to vector<1x128xf32>
    %411 = arith.addf %409, %410 : vector<1x128xf32>
    %412 = math.rsqrt %411 : vector<1x128xf32>
    %413 = arith.mulf %397, %412 : vector<1x128xf32>
    %414 = vector.broadcast %413 : vector<1x128xf32> to vector<32x128xf32>
    %415 = arith.mulf %404, %414 : vector<32x128xf32>
    %416 = vector.broadcast %398 : vector<1x128xf32> to vector<32x128xf32>
    %417 = arith.addf %415, %416 : vector<32x128xf32>
    %cst_130 = arith.constant 0.000000e+00 : f32
    %418 = vector.broadcast %cst_130 : f32 to vector<32x128xf32>
    %419 = arith.maximumf %417, %418 : vector<32x128xf32>
    %c3_i32_131 = arith.constant 3 : i32
    %420 = tpu.dynamic_rotate %419 by %c3_i32_131 dim 0 : vector<32x128xf32>, i32 -> vector<32x128xf32>
    %421 = arith.mulf %420, %10 : vector<32x128xf32>
    %c2_i32_132 = arith.constant 2 : i32
    %422 = tpu.dynamic_rotate %419 by %c2_i32_132 dim 0 : vector<32x128xf32>, i32 -> vector<32x128xf32>
    %423 = arith.mulf %422, %19 : vector<32x128xf32>
    %c1_i32_133 = arith.constant 1 : i32
    %424 = tpu.dynamic_rotate %419 by %c1_i32_133 dim 0 : vector<32x128xf32>, i32 -> vector<32x128xf32>
    %425 = arith.mulf %424, %28 : vector<32x128xf32>
    %c31_i32_134 = arith.constant 31 : i32
    %426 = tpu.dynamic_rotate %419 by %c31_i32_134 dim 0 : vector<32x128xf32>, i32 -> vector<32x128xf32>
    %427 = arith.mulf %426, %37 : vector<32x128xf32>
    %c30_i32_135 = arith.constant 30 : i32
    %428 = tpu.dynamic_rotate %419 by %c30_i32_135 dim 0 : vector<32x128xf32>, i32 -> vector<32x128xf32>
    %429 = arith.mulf %428, %46 : vector<32x128xf32>
    %c29_i32_136 = arith.constant 29 : i32
    %430 = tpu.dynamic_rotate %419 by %c29_i32_136 dim 0 : vector<32x128xf32>, i32 -> vector<32x128xf32>
    %431 = arith.mulf %430, %55 : vector<32x128xf32>
    %432 = tpu.concatenate %421, %423, %425, %419, %427, %429, %431 in 1 : vector<32x128xf32>, vector<32x128xf32>, vector<32x128xf32>, vector<32x128xf32>, vector<32x128xf32>, vector<32x128xf32>, vector<32x128xf32> -> vector<32x896xf32>
    %c320 = arith.constant 320 : index
    %c0_137 = arith.constant 0 : index
    %433 = vector.load %arg1[%c320, %c0_137] : memref<324x896xf32, #tpu.memory_space<vmem>>, vector<4x896xf32>
    %cst_138 = arith.constant dense<0.000000e+00> : vector<32x4xf32>
    %434 = tpu.matmul %432, %433, %cst_138 {dimension_numbers = #tpu.dot_dimension_numbers<[1], [1], [0], [0], [0, 0, 1, 0], [], []>} : vector<32x896xf32>, vector<4x896xf32>, vector<32x4xf32> -> vector<32x4xf32>
    %435 = vector.extract_strided_slice %56 {offsets = [0, 0], sizes = [32, 124], strides = [1, 1]} : vector<32x128xf32> to vector<32x124xf32>
    %436 = tpu.concatenate %434, %435 in 1 : vector<32x4xf32>, vector<32x124xf32> -> vector<32x128xf32>
    %c15 = arith.constant 15 : index
    %c0_139 = arith.constant 0 : index
    %437 = vector.load %arg4[%c15, %c0_139] : memref<32x128xf32, #tpu.memory_space<vmem>>, vector<1x128xf32>
    %438 = vector.broadcast %437 : vector<1x128xf32> to vector<32x128xf32>
    %439 = arith.addf %436, %438 : vector<32x128xf32>
    %c0_140 = arith.constant 0 : index
    %c0_141 = arith.constant 0 : index
    %440 = vector.load %arg5[%c0_140, %c0_141] : memref<32x128xf32, #tpu.memory_space<vmem>>, vector<32x128xf32>
    tpu.vector_store %arg5[%c0_140, %c0_141], %439 {strides = array<i32>} : memref<32x128xf32, #tpu.memory_space<vmem>>, vector<32x128xf32>,
    return
  }
}

</mosaic_0001>

<bundles_post_ra>
// kernel: tpu_custom_call.1
= control target key start
LH: loop header
LB: loop body
LE: loop exit
PB: predicated region body
PF: predicated region fallthrough
CT: control target
= control target key end

     0   :  { %10 = vsyncpa [#allocation3], 0  ;;  %s9529_s0 = inlined_call_operand.hbm [shape: f32[32,128], index: 0, kind: input, shape index: {}]   ;;  %s9530_s1 = inlined_call_operand.hbm [shape: f32[324,896], index: 1, kind: input, shape index: {}]   ;;  %s9531_s2 = inlined_call_operand.hbm [shape: bf16[2048,128], index: 2, kind: input, shape index: {}]   ;;  %s9532_s3 = inlined_call_operand.hbm [shape: bf16[128,2048], index: 3, kind: input, shape index: {}]   ;;  %s9533_s4 = inlined_call_operand.hbm [shape: f32[32,128], index: 4, kind: input, shape index: {}]   ;;  %s9534_s5 = inlined_call_operand.hbm [shape: f32[32,128], index: 5, kind: output, shape index: {}]  }
   0x1   :  { %11 = vsyncpa [#allocation6], 0 }
   0x2   :  { %12 = vsyncpa [#allocation9], 0 }
   0x3   :  { %13 = vsyncpa [#allocation4], 0  ;;  %s8217_s18 = smov [#allocation5]  }
   0x4   :  { %s31_s19 = sshll.u32 %s8217_s18, 4  ;;  %s32_s19 = int_to_ptr.vmem [resolvable:$true] %s31_s19 }
   0x5   :  { %s8097_s20 = scalar_lea.vmem %s32_s19, 36736  ;;  %p8102_p1 = scmp.lt.s32.totalorder %s32_s19, %s32_s19 }
   0x6   :  { %p8098_p0 = scmp.ne.s32.totalorder %s32_s19, %s8097_s20  ;;  %p8103_p2 = scmp.lt.s32.totalorder %s8097_s20, %s8097_s20 }
   0x8   :  { %p8104_p3 = por %p8103_p2, %p8102_p1 }
   0xa   :  { %p8105_p4 = pnand %p8104_p3, %p8098_p0 }
   0xc   :  { %8108 = shalt.err (!%p8105_p4)
}
   0xd   :  { %s8218_s21 = smov 896   ;;  %s8219_s22 = smov 56  }
   0xe   :  { %37 = dma.hbm_to_vmem [thread:$0]  %s9530_s1, 36736, %s32_s19, [#allocation6], %s8218_s21, %s8218_s21, %s8219_s22  }
   0xf   :  { %s8220_s25 = smov [#allocation8]   ;;  %s8221_s27 = smov [#allocation2]  }
  0x10   :  { %s55_s26 = sshll.u32 %s8220_s25, 4  ;;  %s19_s28 = sshll.u32 %s8221_s27, 4  ;;  %s56_s26 = int_to_ptr.vmem [resolvable:$true] %s55_s26  ;;  %s20_s28 = int_to_ptr.vmem [resolvable:$true] %s19_s28 }
  0x11   :  { %s8117_s29 = scalar_lea.vmem %s56_s26, 16384  ;;  %p8122_p6 = scmp.lt.s32.totalorder %s56_s26, %s56_s26 }
  0x12   :  { %p8118_p5 = scmp.ne.s32.totalorder %s56_s26, %s8117_s29  ;;  %p8123_p7 = scmp.lt.s32.totalorder %s8117_s29, %s8117_s29 }
  0x14   :  { %p8124_p8 = por %p8123_p7, %p8122_p6 }
  0x16   :  { %p8125_p9 = pnand %p8124_p8, %p8118_p5 }
  0x18   :  { %8128 = shalt.err (!%p8125_p9)
}
  0x19   :  { %s8222_s30 = smov 1024   ;;  %s8223_s6 = smov 64  }
  0x1a   :  { %61 = dma.hbm_to_vmem [thread:$0]  %s9532_s3, 16384, %s56_s26, [#allocation9], %s8222_s30, %s8222_s30, %s8223_s6  }
  0x1b   :  { %s8137_s1 = scalar_lea.vmem %s20_s28, 512  ;;  %p8142_p11 = scmp.lt.s32.totalorder %s20_s28, %s20_s28 }
  0x1c   :  { %p8138_p10 = scmp.ne.s32.totalorder %s20_s28, %s8137_s1  ;;  %p8143_p12 = scmp.lt.s32.totalorder %s8137_s1, %s8137_s1 }
  0x1e   :  { %p8144_p13 = por %p8143_p12, %p8142_p11 }
  0x20   :  { %p8145_p0 = pnand %p8144_p13, %p8138_p10 }
  0x22   :  { %8148 = shalt.err (!%p8145_p0)
}
  0x23   :  { %s8224_s9 = smov 128   ;;  %s8225_s10 = smov 8  }
  0x24   :  { %25 = dma.hbm_to_vmem [thread:$0]  %s9529_s0, 512, %s20_s28, [#allocation3], %s8224_s9, %s8224_s9, %s8225_s10  }
  0x25   :  { %s8226_s13 = smov [#allocation7]  }
  0x26   :  { %s43_s14 = sshll.u32 %s8226_s13, 4  ;;  %s44_s14 = int_to_ptr.vmem [resolvable:$true] %s43_s14 }
  0x27   :  { %s8157_s3 = scalar_lea.vmem %s44_s14, 16384  ;;  %p8162_p2 = scmp.lt.s32.totalorder %s44_s14, %s44_s14 }
  0x28   :  { %p8158_p1 = scmp.ne.s32.totalorder %s44_s14, %s8157_s3  ;;  %p8163_p3 = scmp.lt.s32.totalorder %s8157_s3, %s8157_s3 }
  0x2a   :  { %p8164_p4 = por %p8163_p3, %p8162_p2 }
  0x2c   :  { %p8165_p5 = pnand %p8164_p4, %p8158_p1 }
  0x2e   :  { %8168 = shalt.err (!%p8165_p5)
}
  0x2f   :  { %s8227_s15 = smov 4   ;;  %s8228_s18 = smov [#allocation10]  }
  0x30   :  { %49 = dma.hbm_to_vmem [thread:$0]  %s9531_s2, 16384, %s44_s14, [#allocation6], %s8223_s6, %s8223_s6, %s8227_s15  }
  0x31   :  { %s67_s19 = sshll.u32 %s8228_s18, 4  ;;  %s68_s19 = int_to_ptr.vmem [resolvable:$true] %s67_s19 }
  0x32   :  { %s8177_s20 = scalar_lea.vmem %s68_s19, 512  ;;  %p8182_p7 = scmp.lt.s32.totalorder %s68_s19, %s68_s19 }
  0x33   :  { %p8178_p6 = scmp.ne.s32.totalorder %s68_s19, %s8177_s20  ;;  %p8183_p8 = scmp.lt.s32.totalorder %s8177_s20, %s8177_s20 }
  0x35   :  { %p8184_p9 = por %p8183_p8, %p8182_p7 }
  0x37   :  { %p8185_p10 = pnand %p8184_p9, %p8178_p6 }
  0x39   :  { %8188 = shalt.err (!%p8185_p10)
}
  0x3a   :  { %73 = dma.hbm_to_vmem [thread:$0]  %s9533_s4, 512, %s68_s19, [#allocation9], %s8224_s9, %s8224_s9, %s8225_s10  }
  0x3b   :  { %8209 = dma.done.wait [#allocation3], 512  }
  0x3c   :  { %8210 = vsyncadd [#allocation3], 4294966784 }
  0x3d   :  { %8211 = dma.done.wait [#allocation6], 53120  }
  0x3e   :  { %8212 = vsyncadd [#allocation6], 4294914176 }
  0x3f   :  { %8213 = dma.done.wait [#allocation9], 16896  }
  0x40   :  { %8214 = vsyncadd [#allocation9], 4294950400  ;;  %v90_v0 = vlaneseq  ;;  %v269_v3 = vld [vmem:[#allocation5 + $0xb0] sm:$0xff]  ;;  %v271_v4 = vld [vmem:[#allocation5 + $0xc0] sm:$0xff]  ;;  %v8229_v17 = vmov 0.0   ;;  %vm615_vm12 = vcmask 261120  }
  0x41   :  { %v268_v5 = vld [vmem:[#allocation5 + $0xa8] sm:$0xff]  ;;  %299 = vmatprep.subr.mxu0 %v269_v3  ;;  %384 = vmatprep.subr.mxu1 %v271_v4  ;;  %v270_v8 = vld [vmem:[#allocation5 + $0xb8] sm:$0xff]  ;;  %v261_v13 = vld [vmem:[#allocation5 + $0x70] sm:$0xff]  ;;  %vm1639_vm13 = vcmask 523264   ;;  %vm2225_vm14 = vcmask 1041409   ;;  %vm5261_vm15 = vcmask 1040384  }
  0x42   :  { %v8284_v1 = vshrl.u32 %v90_v0, 7  ;;  %v262_v9 = vld [vmem:[#allocation5 + $0x78] sm:$0xff]  ;;  %v264_v10 = vld [vmem:[#allocation5 + $0x88] sm:$0xff]  ;;  %300 = vmatpush1.xpose.msra.mxu0 %v268_v5  ;;  %385 = vmatpush1.xpose.msra.mxu1 %v270_v8  ;;  %v263_v14 = vld [vmem:[#allocation5 + $0x80] sm:$0xff]  ;;  %s8232_s2 = smov [#allocation11]  }
  0x43   :  { %301 = vmatprep.subr.mxu0 %v262_v9  ;;  %386 = vmatprep.subr.mxu1 %v264_v10  ;;  %v255_v15 = vld [vmem:[#allocation5 + $0x40] sm:$0xff]  ;;  %v257_v16 = vld [vmem:[#allocation5 + $0x50] sm:$0xff]  ;;  %v8297_v20 = vld [vmem:[#allocation2 + $0x18] sm:$0xff]  ;;  %s7267_s4 = sshll.u32 %s8232_s2, 4  ;;  %s7268_s4 = int_to_ptr.vmem [resolvable:$true] %s7267_s4 }
  0x44   :  { %v105_v2 = vadd.s32 4294967294, %v8284_v1  ;;  %v93_v6 = vadd.s32 4294967293, %v8284_v1  ;;  %v92_v7 = vadd.s32 8, %v8284_v1  ;;  %v117_v11 = vadd.s32 4294967295, %v8284_v1  ;;  %v8295_v19 = vld [vmem:[#allocation2] sm:$0xff]  ;;  %v254_v27 = vld [vmem:[#allocation5 + $0x38] sm:$0xff]  ;;  %p8194_p12 = scmp.lt.s32.totalorder %s7268_s4, %s7268_s4 }
  0x45   :  { %vm173_vm1 = vcmp.lt.s32.totalorder %v8284_v1, 3  ;;  %vm186_vm2 = vcmp.lt.s32.totalorder %v8284_v1, 2  ;;  %v182_v23 = vrot.slane %v8295_v19, 6  ;;  %v185_v24 = vrot.slane %v8297_v20, 6  ;;  %v256_v28 = vld [vmem:[#allocation5 + $0x48] sm:$0xff]  ;;  %v250_v33 = vld [vmem:[#allocation5 + $0x18] sm:$0xff]  ;;  %424 = vmatprep.mubr.f32.mxu1 %v8295_v19 }
  0x46   :  { %vm107_vm0 = vcmp.ge.s32.totalorder %v105_v2, 0  ;;  %v154_v12 = vadd.s32 3, %v92_v7  ;;  %vm95_vm3 = vcmp.ge.s32.totalorder %v93_v6, 0  ;;  %vm119_vm4 = vcmp.ge.s32.totalorder %v117_v11, 0  ;;  %302 = vmatpush1.xpose.msra.mxu0 %v261_v13  ;;  %387 = vmatpush1.xpose.msra.mxu1 %v263_v14  ;;  %v8310_v31 = vld [vmem:[#allocation2 + $0x8] sm:$0xff]  ;;  %v8325_v37 = vld [vmem:[#allocation2 + $0x10] sm:$0xff] }
  0x47   :  { %v8291_v18 = vsel %vm107_vm0, 1.0, %v8229_v17  ;;  %v8299_v21 = vadd.s32 2, %v92_v7  ;;  %v8301_v22 = vadd.s32 1, %v92_v7  ;;  %v169_v25 = vrot.slane %v8295_v19, 5  ;;  %303 = vmatprep.subr.mxu0 %v255_v15  ;;  %388 = vmatprep.subr.mxu1 %v257_v16  ;;  %v248_v32 = vld [vmem:[#allocation5 + $0x8] sm:$0xff]  ;;  %v247_v38 = vld [vmem:[#allocation5] sm:$0xff] }
  0x48   :  { %vm158_vm5 = vcmp.lt.s32.totalorder %v154_v12, 16  ;;  %v172_v26 = vrot.slane %v8297_v20, 5  ;;  %vm199_vm6 = vcmp.lt.s32.totalorder %v8284_v1, 1  ;;  %v195_v29 = vrot.slane %v8295_v19, 7  ;;  %v249_v41 = vld [vmem:[#allocation5 + $0x10] sm:$0xff]  ;;  %v274_v45 = vld [vmem:[#allocation5 + $0xd8] sm:$0xff] }
  0x49   :  { %v198_v30 = vrot.slane %v8297_v20, 7  ;;  %v190_v34 = vsel %vm186_vm2, %v185_v24, %v182_v23  ;;  %v8319_v35 = vsel %vm95_vm3, 1.0, %v8229_v17  ;;  %v8323_v36 = vsel %vm119_vm4, 1.0, %v8229_v17  ;;  %v273_v44 = vld [vmem:[#allocation5 + $0xd0] sm:$0xff]  ;;  %v272_v56 = vld [vmem:[#allocation5 + $0xc8] sm:$0xff]  ;;  %v266_v60 = vld [vmem:[#allocation5 + $0x98] sm:$0xff] }
  0x4a   :  { %v191_v39 = vmul.f32 %v8291_v18, %v190_v34  ;;  %v8330_v40 = vsel %vm158_vm5, 1.0, %v8229_v17  ;;  %vm146_vm7 = vcmp.lt.s32.totalorder %v8299_v21, 16  ;;  %vm134_vm8 = vcmp.lt.s32.totalorder %v8301_v22, 16  ;;  %304 = vmatpush1.xpose.msra.mxu0 %v254_v27  ;;  %389 = vmatpush1.xpose.msra.mxu1 %v256_v28  ;;  %v267_v61 = vld [vmem:[#allocation5 + $0xa0] sm:$0xff]  ;;  %v265_v8 = vld [vmem:[#allocation5 + $0x90] sm:$0xff]  ;;  %s8189_s22 = scalar_lea.vmem %s7268_s4, 512 }
  0x4b   :  { %v177_v42 = vsel %vm173_vm1, %v172_v26, %v169_v25  ;;  %v203_v43 = vsel %vm199_vm6, %v198_v30, %v195_v29  ;;  %v183_v46 = vrot.slane %v8310_v31, 6  ;;  %v221_v47 = vrot.slane %v8295_v19, 2  ;;  %305 = vmatprep.subr.mxu0 %v248_v32  ;;  %390 = vmatprep.subr.mxu1 %v250_v33  ;;  %v259_v16 = vld [vmem:[#allocation5 + $0x60] sm:$0xff]  ;;  %v253_v27 = vld [vmem:[#allocation5 + $0x30] sm:$0xff]  ;;  %p8190_p11 = scmp.ne.s32.totalorder %s7268_s4, %s8189_s22  ;;  %p8195_p13 = scmp.lt.s32.totalorder %s8189_s22, %s8189_s22 }
  0x4c   :  { %v170_v48 = vrot.slane %v8310_v31, 5  ;;  %v196_v49 = vrot.slane %v8310_v31, 7  ;;  %v184_v50 = vrot.slane %v8325_v37, 6  ;;  %v171_v51 = vrot.slane %v8325_v37, 5  ;;  %339 = vmatprep.mubr.f32.mxu0 %v191_v39 }
  0x4d   :  { %v197_v52 = vrot.slane %v8325_v37, 7  ;;  %v222_v53 = vrot.slane %v8310_v31, 2  ;;  %v178_v54 = vmul.f32 %v8319_v35, %v177_v42  ;;  %v204_v55 = vmul.f32 %v8323_v36, %v203_v43  ;;  %p8196_p0 = por %p8195_p13, %p8194_p12 }
  0x4e   :  { %306 = vmatpush1.xpose.msra.mxu0 %v247_v38  ;;  %391 = vmatpush1.xpose.msra.mxu1 %v249_v41  ;;  %v234_v57 = vrot.slane %v8295_v19, 3  ;;  %v235_v58 = vrot.slane %v8310_v31, 3  ;;  %vm238_vm9 = vcmp.lt.s32.totalorder %v8284_v1, 5  ;;  %v189_v59 = vsel %vm186_vm2, %v182_v23, %v183_v46  ;;  %v258_v23 = vld [vmem:[#allocation5 + $0x58] sm:$0xff] }
  0x4f   :  { %469 = vmatprep.subr.mxu0 %v273_v44  ;;  %7801 = vmatprep.subr.mxu1 %v274_v45  ;;  %v188_v62 = vsel %vm186_vm2, %v183_v46, %v184_v50  ;;  %v236_v63 = vrot.slane %v8325_v37, 3  ;;  %v208_v0 = vrot.slane %v8295_v19, 1  ;;  %v209_v2 = vrot.slane %v8310_v31, 1  ;;  %v761_v19 = vld [vmem:[#allocation5 + $0x158] sm:$0xff]  ;;  %p8197_p1 = pnand %p8196_p0, %p8190_p11 }
  0x50   :  { %v8367_v3 = vsel %vm146_vm7, 1.0, %v8229_v17  ;;  %v223_v4 = vrot.slane %v8325_v37, 2  ;;  %v8373_v5 = vsel %vm134_vm8, 1.0, %v8229_v17  ;;  %vm225_vm10 = vcmp.lt.s32.totalorder %v8284_v1, 6  ;;  %v260_v17 = vld [vmem:[#allocation5 + $0x68] sm:$0xff] }
  0x51   :  { %340 = vmatmul.mubr.f32.vlgmr.msra.gmra.mxu0 %v178_v54  ;;  %425 = vmatmul.mubr.f32.vlgmr.msra.gmra.mxu1 %v204_v55  ;;  %v176_v6 = vsel %vm173_vm1, %v169_v25, %v170_v48  ;;  %v202_v7 = vsel %vm199_vm6, %v195_v29, %v196_v49  ;;  %v210_v9 = vrot.slane %v8325_v37, 1  ;;  %v224_v10 = vrot.slane %v8297_v20, 2  ;;  %v252_v25 = vld [vmem:[#allocation5 + $0x28] sm:$0xff]  ;;  %v251_v29 = vld [vmem:[#allocation5 + $0x20] sm:$0xff] }
  0x52   :  { %vm212_vm11 = vcmp.lt.s32.totalorder %v8284_v1, 7  ;;  %470 = vmatpush1.xpose.msra.mxu0 %v272_v56  ;;  %7802 = vmatpush3.xpose.msra.mxu1 %v274_v45  ;;  %v175_v11 = vsel %vm173_vm1, %v170_v48, %v171_v51  ;;  %v201_v12 = vsel %vm199_vm6, %v196_v49, %v197_v52  ;;  %v237_v13 = vrot.slane %v8297_v20, 3  ;;  %v767_v54 = vld [vmem:[#allocation5 + $0x188] sm:$0xff]  ;;  %v760_v56 = vld [vmem:[#allocation5 + $0x150] sm:$0xff] }
  0x53   :  { %v211_v14 = vrot.slane %v8297_v20, 1  ;;  %344 = vmatprep.mubr.f32.mxu0 %v189_v59  ;;  %429 = vmatprep.mubr.f32.mxu1 %v8310_v31  ;;  %v193_v15 = vmul.f32 %v8291_v18, %v188_v62  ;;  %v180_v21 = vmul.f32 %v8319_v35, %v175_v11  ;;  %v206_v22 = vmul.f32 %v8323_v36, %v201_v12  ;;  %v763_v55 = vld [vmem:[#allocation5 + $0x168] sm:$0xff] }
  0x54   :  { %471 = vmatprep.subr.mxu0 %v266_v60  ;;  %7803 = vmatprep.subr.mxu1 %v267_v61  ;;  %v187_v28 = vsel %vm186_vm2, %v184_v50, %v185_v24  ;;  %v174_v32 = vsel %vm173_vm1, %v171_v51, %v172_v26  ;;  %v200_v33 = vsel %vm199_vm6, %v197_v52, %v198_v30  ;;  %v770_v52 = vld [vmem:[#allocation5 + $0x1a0] sm:$0xff]  ;;  %v755_v59 = vld [vmem:[#allocation5 + $0x128] sm:$0xff]  ;;  %v753_v60 = vld [vmem:[#allocation5 + $0x118] sm:$0xff]  ;;  %vm5264_vm0 = vcmask 1041408  }
  0x55   :  { %345 = vmatmul.mubr.f32.gmra.mxu0 %v176_v6  ;;  %430 = vmatmul.mubr.f32.gmra.mxu1 %v202_v7  ;;  %v240_v24 = vsel %vm238_vm9, %v235_v58, %v236_v63  ;;  %v227_v26 = vsel %vm225_vm10, %v222_v53, %v223_v4  ;;  %v228_v30 = vsel %vm225_vm10, %v221_v47, %v222_v53  ;;  %v769_v53 = vld [vmem:[#allocation5 + $0x198] sm:$0xff]  ;;  %v747_v62 = vld [vmem:[#allocation5 + $0xe8] sm:$0xff]  ;;  %vm5267_vm3 = vcmask 1042432  }
  0x56   :  { %472 = vmatpush1.xpose.msra.mxu0 %v265_v8  ;;  %7804 = vmatpush3.xpose.msra.mxu1 %v267_v61  ;;  %v241_v34 = vsel %vm238_vm9, %v234_v57, %v235_v58  ;;  %v244_v38 = vmul.f32 %v8330_v40, %v240_v24  ;;  %v215_v39 = vsel %vm212_vm11, %v208_v0, %v209_v2  ;;  %v754_v58 = vld [vmem:[#allocation5 + $0x120] sm:$0xff]  ;;  %v749_v61 = vld [vmem:[#allocation5 + $0xf8] sm:$0xff]  ;;  %vm5270_vm4 = vcmask 1043456  }
  0x57   :  { %349 = vmatprep.mubr.f32.mxu0 %v193_v15  ;;  %434 = vmatprep.mubr.f32.mxu1 %v8325_v37  ;;  %v231_v41 = vmul.f32 %v8367_v3, %v227_v26  ;;  %v214_v42 = vsel %vm212_vm11, %v209_v2, %v210_v9  ;;  %v242_v43 = vsel %vm238_vm9, %v237_v13, %v234_v57  ;;  %v768_v37 = vld [vmem:[#allocation5 + $0x190] sm:$0xff]  ;;  %v8491_v2 = vld [vmem:[#allocation5 + $0x1b8] sm:$0xff]  ;;  %vm5273_vm5 = vcmask 1044480  }
  0x58   :  { %473 = vmatprep.subr.mxu0 %v259_v16  ;;  %7805 = vmatprep.subr.mxu1 %v260_v17  ;;  %v239_v44 = vsel %vm238_vm9, %v236_v63, %v237_v13  ;;  %v218_v45 = vmul.f32 %v8373_v5, %v214_v42  ;;  %v246_v31 = vmul.f32 %v8330_v40, %v242_v43  ;;  %v756_v57 = vld [vmem:[#allocation5 + $0x130] sm:$0xff]  ;;  %vm5276_vm7 = vcmask 1045504  }
  0x59   :  { %350 = vmatmul.mubr.f32.gmra.mxu0 %v180_v21  ;;  %435 = vmatmul.mubr.f32.gmra.mxu1 %v206_v22  ;;  %v226_v46 = vsel %vm225_vm10, %v223_v4, %v224_v10  ;;  %v229_v48 = vsel %vm225_vm10, %v224_v10, %v221_v47  ;;  %v213_v49 = vsel %vm212_vm11, %v210_v9, %v211_v14  ;;  %v748_v63 = vld [vmem:[#allocation5 + $0xf0] sm:$0xff]  ;;  %vm5279_vm8 = vcmask 1046528  }
  0x5a   :  { %474 = vmatpush1.xpose.msra.mxu0 %v258_v23  ;;  %7806 = vmatpush3.xpose.msra.mxu1 %v260_v17  ;;  %v233_v50 = vmul.f32 %v8367_v3, %v229_v48  ;;  %v216_v51 = vsel %vm212_vm11, %v211_v14, %v208_v0  ;;  %v746_v0 = vld [vmem:[#allocation5 + $0xe0] sm:$0xff]  ;;  %v772_v4 = vld [vmem:[#allocation5 + $0x1b0] sm:$0xff] }
  0x5b   :  { %354 = vmatprep.mubr.f32.mxu0 %v187_v28  ;;  %439 = vmatprep.mubr.f32.mxu1 %v8297_v20  ;;  %v220_v47 = vmul.f32 %v8373_v5, %v216_v51  ;;  %v762_v20 = vld [vmem:[#allocation5 + $0x160] sm:$0xff] }
  0x5c   :  { %475 = vmatprep.subr.mxu0 %v252_v25  ;;  %7807 = vmatprep.subr.mxu1 %v253_v27 }
  0x5d   :  { %355 = vmatmul.mubr.f32.gmra.mxu0 %v174_v32  ;;  %440 = vmatmul.mubr.f32.gmra.mxu1 %v200_v33 }
  0x5e   :  { %476 = vmatpush1.xpose.msra.mxu0 %v251_v29  ;;  %7808 = vmatpush3.xpose.msra.mxu1 %v253_v27 }
  0x5f   :  { %509 = vmatprep.mubr.f32.mxu0 %v228_v30  ;;  %7809 = vmatprep.mubr.f32.mxu1 %v241_v34 }
  0x60   :  { %883 = vmatprep.subr.mxu1 %v770_v52  ;;  %798 = vmatprep.subr.mxu0 %v768_v37 }
  0x61   :  { %510 = vmatmul.mubr.f32.vlgmr.msra.gmra.mxu0 %v215_v39  ;;  %7810 = vmatmul.mubr.f32.vlgmr.msra.gmra.mxu1 %v244_v38 }
  0x62   :  { %514 = vmatprep.mubr.f32.mxu0 %v231_v41  ;;  %7812 = vmatprep.mubr.f32.mxu1 %v239_v44 }
  0x63   :  { %884 = vmatpush1.xpose.msra.mxu1 %v769_v53  ;;  %799 = vmatpush1.xpose.msra.mxu0 %v767_v54 }
  0x64   :  { %885 = vmatprep.subr.mxu1 %v763_v55  ;;  %800 = vmatprep.subr.mxu0 %v761_v19 }
  0x65   :  { %515 = vmatmul.mubr.f32.gmra.mxu0 %v218_v45  ;;  %7813 = vmatmul.mubr.f32.gmra.mxu1 %v246_v31 }
  0x66   :  { %519 = vmatprep.mubr.f32.mxu0 %v226_v46 }
  0x67   :  { %886 = vmatpush1.xpose.msra.mxu1 %v762_v20  ;;  %801 = vmatpush1.xpose.msra.mxu0 %v760_v56 }
  0x68   :  { %887 = vmatprep.subr.mxu1 %v756_v57  ;;  %802 = vmatprep.subr.mxu0 %v754_v58 }
  0x69   :  { %520 = vmatmul.mubr.f32.gmra.mxu0 %v213_v49 }
  0x6a   :  { %524 = vmatprep.mubr.f32.mxu0 %v233_v50 }
  0x6b   :  { %888 = vmatpush1.xpose.msra.mxu1 %v755_v59  ;;  %803 = vmatpush1.xpose.msra.mxu0 %v753_v60 }
  0x6c   :  { %889 = vmatprep.subr.mxu1 %v749_v61  ;;  %804 = vmatprep.subr.mxu0 %v747_v62 }
  0x6d   :  { %525 = vmatmul.mubr.f32.gmra.mxu0 %v220_v47 }
  0x6f   :  { %890 = vmatpush1.xpose.msra.mxu1 %v748_v63  ;;  %805 = vmatpush1.xpose.msra.mxu0 %v746_v0 }
  0x70   :  { %7815 = vmatprep.subr.mxu1 %v8491_v2  ;;  %968 = vmatprep.subr.mxu0 %v772_v4 }
 0x111   :  { %v341_v6 = vpop.f32.mrf.mxu0  ;;  %v426_v7 = vpop.f32.mrf.mxu1 }
 0x112   :  { %v427_v33 = vadd.f32 %v426_v7, %v341_v6 }
 0x113   :  { %v343_v8 = vpop.f32.mrf.mxu0  ;;  %v428_v9 = vpop.f32.mrf.mxu1 }
 0x115   :  { %v346_v10 = vpop.f32.mrf.mxu0  ;;  %v431_v11 = vpop.f32.mrf.mxu1 }
 0x116   :  { %v432_v24 = vadd.f32 %v431_v11, %v346_v10 }
 0x117   :  { %v348_v12 = vpop.f32.mrf.mxu0  ;;  %v433_v13 = vpop.f32.mrf.mxu1 }
 0x119   :  { %v351_v14 = vpop.f32.mrf.mxu0  ;;  %v436_v15 = vpop.f32.mrf.mxu1 }
 0x11a   :  { %v437_v41 = vadd.f32 %v436_v15, %v351_v14 }
 0x11b   :  { %v353_v16 = vpop.f32.mrf.mxu0  ;;  %v438_v17 = vpop.f32.mrf.mxu1 }
 0x11d   :  { %v356_v21 = vpop.f32.mrf.mxu0  ;;  %v441_v22 = vpop.f32.mrf.mxu1 }
 0x11e   :  { %v442_v48 = vadd.f32 %v441_v22, %v356_v21 }
 0x11f   :  { %v358_v23 = vpop.f32.mrf.mxu0  ;;  %v443_v25 = vpop.f32.mrf.mxu1 }
 0x121   :  { %v511_v27 = vpop.f32.mrf.mxu0  ;;  %v7811_v28 = vpop.f32.mrf.mxu1 }
 0x122   :  { %v512_v34 = vadd.f32 %v511_v27, %v427_v33 }
 0x123   :  { %v513_v29 = vpop.f32.mrf.mxu0  ;;  %v596_v32 = vpop.f32.mrf.mxu1 }
 0x124   :  { %v597_v45 = vadd.f32 %v596_v32, %v512_v34  ;;  %v8499_v29 = vsub.s32 0, %v8284_v1 }
 0x125   :  { %v516_v26 = vpop.f32.mrf.mxu0  ;;  %v7814_v30 = vpop.f32.mrf.mxu1 }
 0x126   :  { %v517_v38 = vadd.f32 %v516_v26, %v432_v24  ;;  %v616_v47 = vsel %vm615_vm12, %v597_v45, 0.0  ;;  %v7287_v26 = vld [vmem:[#allocation10 + $0x7] ss:$0 sm:$0xff] }
 0x127   :  { %v518_v39 = vpop.f32.mrf.mxu0  ;;  %v606_v44 = vpop.f32.mrf.mxu1 }
 0x128   :  { %v602_v42 = vadd.f32 %v7811_v28, %v517_v38  ;;  %v620_v28 = vld [vmem:[#allocation10] sm:$0x1] }
 0x129   :  { %v521_v43 = vpop.f32.mrf.mxu0 }
 0x12a   :  { %v522_v31 = vadd.f32 %v521_v43, %v437_v41  ;;  %v617_v49 = vsel %vm615_vm12, %v602_v42, 0.0 }
 0x12b   :  { %v523_v46 = vpop.f32.mrf.mxu0  ;;  %v622_v53 = vadd.f32 %v617_v49, %v616_v47 }
 0x12c   :  { %v607_v50 = vadd.f32 %v606_v44, %v522_v31 }
 0x12d   :  { %v526_v51 = vpop.f32.mrf.mxu0 }
 0x12e   :  { %v618_v52 = vsel %vm615_vm12, %v607_v50, 0.0  ;;  %v527_v37 = vadd.f32 %v526_v51, %v442_v48 }
 0x12f   :  { %v528_v54 = vpop.f32.mrf.mxu0  ;;  %v623_v19 = vadd.f32 %v622_v53, %v618_v52 }
 0x130   :  { %v612_v55 = vadd.f32 %v7814_v30, %v527_v37 }
 0x132   :  { %v619_v20 = vsel %vm615_vm12, %v612_v55, 0.0 }
 0x133   :  { %v624_v56 = vadd.f32 %v623_v19, %v619_v20 }
 0x135   :  { %v625_v57 = vrot.slane %v624_v56, 4 }
 0x137   :  { %v626_v58 = vadd.f32 %v625_v57, %v624_v56 }
 0x139   :  { %v627_v59 = vrot.slane %v626_v58, 2 }
 0x13b   :  { %v628_v60 = vadd.f32 %v627_v59, %v626_v58 }
 0x13d   :  { %v629_v61 = vrot.slane %v628_v60, 1 }
 0x13f   :  { %v630_v62 = vadd.f32 %v629_v61, %v628_v60  ;;  %v771_v60 = vld [vmem:[#allocation5 + $0x1a8] sm:$0xff]  ;;  %v766_v61 = vld [vmem:[#allocation5 + $0x180] sm:$0xff] }
 0x141   :  { %v632_v63 = vmul.f32 0.03125, %v630_v62 }
 0x143   :  { %v633_v0 = vsub.f32 %v616_v47, %v632_v63  ;;  %v634_v4 = vsub.f32 %v617_v49, %v632_v63  ;;  %v635_v6 = vsub.f32 %v618_v52, %v632_v63  ;;  %v636_v7 = vsub.f32 %v619_v20, %v632_v63 }
 0x145   :  { %v637_v8 = vmul.f32 %v633_v0, %v633_v0  ;;  %v638_v9 = vmul.f32 %v634_v4, %v634_v4  ;;  %v639_v10 = vmul.f32 %v635_v6, %v635_v6  ;;  %v640_v12 = vmul.f32 %v636_v7, %v636_v7 }
 0x147   :  { %v641_v11 = vadd.f32 %v638_v9, %v637_v8 }
 0x149   :  { %v642_v13 = vadd.f32 %v641_v11, %v639_v10 }
 0x14b   :  { %v643_v14 = vadd.f32 %v642_v13, %v640_v12  ;;  %v764_v12 = vld [vmem:[#allocation5 + $0x170] sm:$0xff]  ;;  %v759_v13 = vld [vmem:[#allocation5 + $0x148] sm:$0xff] }
 0x14d   :  { %v644_v15 = vrot.slane %v643_v14, 4 }
 0x14f   :  { %v645_v16 = vadd.f32 %v644_v15, %v643_v14  ;;  %v758_v14 = vld [vmem:[#allocation5 + $0x140] sm:$0xff] }
 0x151   :  { %v646_v17 = vrot.slane %v645_v16, 2 }
 0x153   :  { %v647_v21 = vadd.f32 %v646_v17, %v645_v16  ;;  %v757_v17 = vld [vmem:[#allocation5 + $0x138] sm:$0xff] }
 0x155   :  { %v648_v22 = vrot.slane %v647_v21, 1 }
 0x157   :  { %v649_v23 = vadd.f32 %v648_v22, %v647_v21  ;;  %v752_v21 = vld [vmem:[#allocation5 + $0x110] sm:$0xff] }
 0x159   :  { %v650_v25 = vmul.f32 0.03125, %v649_v23 }
 0x15b   :  { %v651_v27 = vadd.f32 1e-05, %v650_v25 }
 0x15d   :  { %8075 = vrsqrt.f32 %v651_v27 }
 0x16a   :  { %v8076_v32 = vpop.eup %8075 }
 0x16b   :  { %v653_v33 = vmul.f32 %v8076_v32, %v620_v28  ;;  %v751_v28 = vld [vmem:[#allocation5 + $0x108] sm:$0xff] }
 0x16d   :  { %v657_v24 = vrot.slane %v653_v33, %v8499_v29 }
 0x16f   :  { %v658_v30 = vmul.f32 %v657_v24, %v633_v0  ;;  %v659_v34 = vmul.f32 %v657_v24, %v634_v4  ;;  %v660_v38 = vmul.f32 %v657_v24, %v635_v6  ;;  %v661_v39 = vmul.f32 %v657_v24, %v636_v7  ;;  %v765_v6 = vld [vmem:[#allocation5 + $0x178] sm:$0xff] }
 0x171   :  { %v666_v41 = vadd.f32 %v7287_v26, %v658_v30  ;;  %v667_v42 = vadd.f32 %v7287_v26, %v659_v34  ;;  %v668_v43 = vadd.f32 %v7287_v26, %v660_v38  ;;  %v669_v44 = vadd.f32 %v7287_v26, %v661_v39  ;;  %v750_v39 = vld [vmem:[#allocation5 + $0x100] sm:$0xff] }
 0x173   :  { %v8502_v45 = vmax.f32 %v666_v41, 0.0  ;;  %v8504_v31 = vmax.f32 %v667_v42, 0.0  ;;  %v8506_v46 = vmax.f32 %v668_v43, 0.0  ;;  %v8508_v48 = vmax.f32 %v669_v44, 0.0 }
 0x175   :  { %923 = vmatprep.mubr.f32.mxu1 %v8502_v45  ;;  %v686_v49 = vrot.slane %v8502_v45, 6  ;;  %v689_v50 = vrot.slane %v8508_v48, 6  ;;  %v698_v51 = vrot.slane %v8502_v45, 7  ;;  %v701_v47 = vrot.slane %v8508_v48, 7 }
 0x176   :  { %v674_v52 = vrot.slane %v8502_v45, 5  ;;  %v677_v37 = vrot.slane %v8508_v48, 5  ;;  %v687_v55 = vrot.slane %v8504_v31, 6  ;;  %v688_v19 = vrot.slane %v8506_v46, 6 }
 0x177   :  { %v693_v53 = vsel %vm186_vm2, %v689_v50, %v686_v49  ;;  %v705_v54 = vsel %vm199_vm6, %v701_v47, %v698_v51  ;;  %v699_v59 = vrot.slane %v8504_v31, 7  ;;  %v675_v62 = vrot.slane %v8504_v31, 5 }
 0x178   :  { %v694_v20 = vmul.f32 %v8291_v18, %v693_v53  ;;  %v706_v56 = vmul.f32 %v8323_v36, %v705_v54  ;;  %v681_v57 = vsel %vm173_vm1, %v677_v37, %v674_v52  ;;  %v700_v63 = vrot.slane %v8506_v46, 7 }
 0x179   :  { %v682_v58 = vmul.f32 %v8319_v35, %v681_v57  ;;  %v676_v0 = vrot.slane %v8506_v46, 5  ;;  %v692_v4 = vsel %vm186_vm2, %v686_v49, %v687_v55  ;;  %v691_v7 = vsel %vm186_vm2, %v687_v55, %v688_v19 }
 0x17a   :  { %838 = vmatprep.mubr.f32.mxu0 %v694_v20  ;;  %924 = vmatmul.mubr.f32.vlgmr.msra.gmra.mxu1 %v706_v56  ;;  %v704_v8 = vsel %vm199_vm6, %v698_v51, %v699_v59  ;;  %v703_v9 = vsel %vm199_vm6, %v699_v59, %v700_v63  ;;  %v680_v10 = vsel %vm173_vm1, %v674_v52, %v675_v62  ;;  %v734_v22 = vrot.slane %v8502_v45, 3  ;;  %v1295_v59 = vld [vmem:[#allocation5 + $0x360] sm:$0xff] }
 0x17b   :  { %839 = vmatmul.mubr.f32.vlgmr.msra.gmra.mxu0 %v682_v58  ;;  %928 = vmatprep.mubr.f32.mxu1 %v8504_v31  ;;  %v696_v11 = vmul.f32 %v8291_v18, %v691_v7  ;;  %v708_v15 = vmul.f32 %v8323_v36, %v703_v9  ;;  %v735_v23 = vrot.slane %v8504_v31, 3  ;;  %v736_v25 = vrot.slane %v8506_v46, 3  ;;  %v1281_v7 = vld [vmem:[#allocation5 + $0x2f0] sm:$0xff]  ;;  %v1280_v9 = vld [vmem:[#allocation5 + $0x2e8] sm:$0xff] }
 0x17c   :  { %7816 = vmatpush3.xpose.msra.mxu1 %v8491_v2  ;;  %843 = vmatprep.mubr.f32.mxu0 %v692_v4  ;;  %v679_v2 = vsel %vm173_vm1, %v675_v62, %v676_v0  ;;  %v690_v27 = vsel %vm186_vm2, %v688_v19, %v689_v50  ;;  %v722_v32 = vrot.slane %v8502_v45, 2  ;;  %v723_v33 = vrot.slane %v8504_v31, 2  ;;  %v1292_v62 = vld [vmem:[#allocation5 + $0x348] sm:$0xff]  ;;  %v1287_v4 = vld [vmem:[#allocation5 + $0x320] sm:$0xff] }
 0x17d   :  { %969 = vmatpush1.xpose.msra.mxu0 %v771_v60  ;;  %7817 = vmatprep.subr.mxu1 %v766_v61  ;;  %v684_v16 = vmul.f32 %v8319_v35, %v679_v2  ;;  %v724_v24 = vrot.slane %v8506_v46, 2  ;;  %v702_v26 = vsel %vm199_vm6, %v700_v63, %v701_v47  ;;  %v678_v30 = vsel %vm173_vm1, %v676_v0, %v677_v37  ;;  %v1293_v60 = vld [vmem:[#allocation5 + $0x350] sm:$0xff]  ;;  %v1288_v63 = vld [vmem:[#allocation5 + $0x328] sm:$0xff]  ;;  %v1286_v0 = vld [vmem:[#allocation5 + $0x318] sm:$0xff] }
 0x17e   :  { %929 = vmatmul.mubr.f32.gmra.mxu1 %v704_v8  ;;  %970 = vmatprep.subr.mxu0 %v765_v6  ;;  %v739_v34 = vsel %vm238_vm9, %v735_v23, %v736_v25  ;;  %v740_v38 = vsel %vm238_vm9, %v734_v22, %v735_v23  ;;  %v737_v41 = vrot.slane %v8508_v48, 3  ;;  %v728_v42 = vsel %vm225_vm10, %v722_v32, %v723_v33  ;;  %v1285_v6 = vld [vmem:[#allocation5 + $0x310] sm:$0xff]  ;;  %v1279_v8 = vld [vmem:[#allocation5 + $0x2e0] sm:$0xff] }
 0x17f   :  { %844 = vmatmul.mubr.f32.gmra.mxu0 %v680_v10  ;;  %933 = vmatprep.mubr.f32.mxu1 %v8506_v46  ;;  %v710_v43 = vrot.slane %v8502_v45, 1  ;;  %v711_v44 = vrot.slane %v8504_v31, 1  ;;  %v712_v49 = vrot.slane %v8506_v46, 1  ;;  %v727_v50 = vsel %vm225_vm10, %v723_v33, %v724_v24  ;;  %v1278_v10 = vld [vmem:[#allocation5 + $0x2d8] sm:$0xff]  ;;  %v1271_v2 = vld [vmem:[#allocation5 + $0x2a0] sm:$0xff] }
 0x180   :  { %7818 = vmatpush3.xpose.msra.mxu1 %v766_v61  ;;  %848 = vmatprep.mubr.f32.mxu0 %v696_v11  ;;  %v743_v51 = vmul.f32 %v8330_v40, %v739_v34  ;;  %v741_v47 = vsel %vm238_vm9, %v737_v41, %v734_v22  ;;  %v738_v45 = vsel %vm238_vm9, %v736_v25, %v737_v41  ;;  %v725_v37 = vrot.slane %v8508_v48, 2  ;;  %v1294_v61 = vld [vmem:[#allocation5 + $0x358] sm:$0xff]  ;;  %v1259_v23 = vld [vmem:[#allocation5 + $0x240] sm:$0xff]  ;;  %v1257_v25 = vld [vmem:[#allocation5 + $0x230] sm:$0xff] }
 0x181   :  { %971 = vmatpush1.xpose.msra.mxu0 %v764_v12  ;;  %7819 = vmatprep.subr.mxu1 %v759_v13  ;;  %v716_v52 = vsel %vm212_vm11, %v710_v43, %v711_v44  ;;  %v731_v31 = vmul.f32 %v8367_v3, %v727_v50  ;;  %v715_v46 = vsel %vm212_vm11, %v711_v44, %v712_v49  ;;  %v713_v55 = vrot.slane %v8508_v48, 1  ;;  %v1274_v11 = vld [vmem:[#allocation5 + $0x2b8] sm:$0xff]  ;;  %v1272_v12 = vld [vmem:[#allocation5 + $0x2a8] sm:$0xff]  ;;  %v1243_v34 = vld [vmem:[#allocation5 + $0x1c0] sm:$0xff] }
 0x182   :  { %934 = vmatmul.mubr.f32.gmra.mxu1 %v708_v15  ;;  %972 = vmatprep.subr.mxu0 %v758_v14  ;;  %v745_v53 = vmul.f32 %v8330_v40, %v741_v47  ;;  %v719_v54 = vmul.f32 %v8373_v5, %v715_v46  ;;  %v726_v19 = vsel %vm225_vm10, %v724_v24, %v725_v37  ;;  %v1267_v14 = vld [vmem:[#allocation5 + $0x280] sm:$0xff]  ;;  %v1265_v15 = vld [vmem:[#allocation5 + $0x270] sm:$0xff]  ;;  %v1258_v22 = vld [vmem:[#allocation5 + $0x238] sm:$0xff] }
 0x183   :  { %849 = vmatmul.mubr.f32.gmra.mxu0 %v684_v16  ;;  %938 = vmatprep.mubr.f32.mxu1 %v8508_v48  ;;  %v729_v20 = vsel %vm225_vm10, %v725_v37, %v722_v32  ;;  %v714_v56 = vsel %vm212_vm11, %v712_v49, %v713_v55  ;;  %v717_v58 = vsel %vm212_vm11, %v713_v55, %v710_v43  ;;  %v1266_v16 = vld [vmem:[#allocation5 + $0x278] sm:$0xff]  ;;  %v1252_v32 = vld [vmem:[#allocation5 + $0x208] sm:$0xff] }
 0x184   :  { %7820 = vmatpush3.xpose.msra.mxu1 %v759_v13  ;;  %853 = vmatprep.mubr.f32.mxu0 %v690_v27  ;;  %v733_v57 = vmul.f32 %v8367_v3, %v729_v20  ;;  %v721_v48 = vmul.f32 %v8373_v5, %v717_v58  ;;  %v1273_v13 = vld [vmem:[#allocation5 + $0x2b0] sm:$0xff]  ;;  %v1250_v33 = vld [vmem:[#allocation5 + $0x1f8] sm:$0xff] }
 0x185   :  { %973 = vmatpush1.xpose.msra.mxu0 %v757_v17  ;;  %7821 = vmatprep.subr.mxu1 %v752_v21  ;;  %v1264_v17 = vld [vmem:[#allocation5 + $0x268] sm:$0xff]  ;;  %v1253_v27 = vld [vmem:[#allocation5 + $0x210] sm:$0xff]  ;;  %v1246_v24 = vld [vmem:[#allocation5 + $0x1d8] sm:$0xff] }
 0x186   :  { %939 = vmatmul.mubr.f32.gmra.mxu1 %v702_v26  ;;  %974 = vmatprep.subr.mxu0 %v751_v28  ;;  %v1251_v28 = vld [vmem:[#allocation5 + $0x200] sm:$0xff]  ;;  %v1244_v26 = vld [vmem:[#allocation5 + $0x1c8] sm:$0xff] }
 0x187   :  { %854 = vmatmul.mubr.f32.gmra.mxu0 %v678_v30  ;;  %7823 = vmatprep.mubr.f32.mxu1 %v740_v38  ;;  %v1245_v30 = vld [vmem:[#allocation5 + $0x1d0] sm:$0xff]  ;;  %v8607_v38 = vld [vmem:[#allocation5 + $0x378] sm:$0xff] }
 0x188   :  { %7822 = vmatpush3.xpose.msra.mxu1 %v752_v21  ;;  %1008 = vmatprep.mubr.f32.mxu0 %v728_v42  ;;  %v1260_v21 = vld [vmem:[#allocation5 + $0x248] sm:$0xff] }
 0x189   :  { %975 = vmatpush1.xpose.msra.mxu0 %v750_v39  ;;  %1400 = vmatprep.subr.mxu1 %v1295_v59  ;;  %v1297_v39 = vld [vmem:[#allocation5 + $0x370] sm:$0xff] }
 0x18a   :  { %1315 = vmatprep.subr.mxu0 %v1293_v60 }
 0x18b   :  { %7824 = vmatmul.mubr.f32.vlgmr.msra.gmra.mxu1 %v743_v51 }
 0x18c   :  { %1009 = vmatmul.mubr.f32.vlgmr.msra.gmra.mxu0 %v716_v52  ;;  %7826 = vmatprep.mubr.f32.mxu1 %v738_v45 }
 0x18d   :  { %1013 = vmatprep.mubr.f32.mxu0 %v731_v31  ;;  %1401 = vmatpush1.xpose.msra.mxu1 %v1294_v61 }
 0x18e   :  { %1316 = vmatpush1.xpose.msra.mxu0 %v1292_v62  ;;  %1402 = vmatprep.subr.mxu1 %v1288_v63 }
 0x18f   :  { %7827 = vmatmul.mubr.f32.gmra.mxu1 %v745_v53  ;;  %1317 = vmatprep.subr.mxu0 %v1286_v0 }
 0x190   :  { %1014 = vmatmul.mubr.f32.gmra.mxu0 %v719_v54 }
 0x191   :  { %1018 = vmatprep.mubr.f32.mxu0 %v726_v19  ;;  %1403 = vmatpush1.xpose.msra.mxu1 %v1287_v4 }
 0x192   :  { %1318 = vmatpush1.xpose.msra.mxu0 %v1285_v6  ;;  %1404 = vmatprep.subr.mxu1 %v1281_v7 }
 0x193   :  { %1319 = vmatprep.subr.mxu0 %v1279_v8 }
 0x194   :  { %1019 = vmatmul.mubr.f32.gmra.mxu0 %v714_v56 }
 0x195   :  { %1023 = vmatprep.mubr.f32.mxu0 %v733_v57  ;;  %1405 = vmatpush1.xpose.msra.mxu1 %v1280_v9 }
 0x196   :  { %1320 = vmatpush1.xpose.msra.mxu0 %v1278_v10  ;;  %1406 = vmatprep.subr.mxu1 %v1274_v11 }
 0x197   :  { %1321 = vmatprep.subr.mxu0 %v1272_v12 }
 0x198   :  { %1024 = vmatmul.mubr.f32.gmra.mxu0 %v721_v48 }
 0x199   :  { %1407 = vmatpush1.xpose.msra.mxu1 %v1273_v13 }
 0x19a   :  { %1322 = vmatpush1.xpose.msra.mxu0 %v1271_v2  ;;  %1408 = vmatprep.subr.mxu1 %v1267_v14 }
 0x19b   :  { %1323 = vmatprep.subr.mxu0 %v1265_v15 }
 0x19d   :  { %1409 = vmatpush1.xpose.msra.mxu1 %v1266_v16 }
 0x19e   :  { %1324 = vmatpush1.xpose.msra.mxu0 %v1264_v17  ;;  %1410 = vmatprep.subr.mxu1 %v1260_v21 }
 0x19f   :  { %1325 = vmatprep.subr.mxu0 %v1258_v22 }
 0x1a1   :  { %1411 = vmatpush1.xpose.msra.mxu1 %v1259_v23 }
 0x1a2   :  { %1326 = vmatpush1.xpose.msra.mxu0 %v1257_v25  ;;  %1412 = vmatprep.subr.mxu1 %v1253_v27 }
 0x1a3   :  { %1327 = vmatprep.subr.mxu0 %v1251_v28 }
 0x1a5   :  { %1413 = vmatpush1.xpose.msra.mxu1 %v1252_v32 }
 0x1a6   :  { %1328 = vmatpush1.xpose.msra.mxu0 %v1250_v33  ;;  %1414 = vmatprep.subr.mxu1 %v1246_v24 }
 0x1a7   :  { %1329 = vmatprep.subr.mxu0 %v1244_v26 }
 0x1a9   :  { %1415 = vmatpush1.xpose.msra.mxu1 %v1245_v30 }
 0x1aa   :  { %1330 = vmatpush1.xpose.msra.mxu0 %v1243_v34  ;;  %7829 = vmatprep.subr.mxu1 %v8607_v38 }
 0x1ab   :  { %1485 = vmatprep.subr.mxu0 %v1297_v39 }
 0x23a   :  { %v925_v41 = vpop.f32.mrf.mxu1 }
 0x23b   :  { %v840_v42 = vpop.f32.mrf.mxu0 }
 0x23c   :  { %v927_v43 = vpop.f32.mrf.mxu1  ;;  %v926_v58 = vadd.f32 %v925_v41, %v840_v42 }
 0x23d   :  { %v842_v44 = vpop.f32.mrf.mxu0 }
 0x23e   :  { %v930_v49 = vpop.f32.mrf.mxu1 }
 0x23f   :  { %v845_v50 = vpop.f32.mrf.mxu0 }
 0x240   :  { %v932_v51 = vpop.f32.mrf.mxu1  ;;  %v931_v48 = vadd.f32 %v930_v49, %v845_v50 }
 0x241   :  { %v847_v47 = vpop.f32.mrf.mxu0 }
 0x242   :  { %v935_v52 = vpop.f32.mrf.mxu1 }
 0x243   :  { %v850_v45 = vpop.f32.mrf.mxu0 }
 0x244   :  { %v937_v31 = vpop.f32.mrf.mxu1  ;;  %v936_v0 = vadd.f32 %v935_v52, %v850_v45 }
 0x245   :  { %v852_v46 = vpop.f32.mrf.mxu0 }
 0x246   :  { %v940_v37 = vpop.f32.mrf.mxu1 }
 0x247   :  { %v855_v53 = vpop.f32.mrf.mxu0 }
 0x248   :  { %v942_v54 = vpop.f32.mrf.mxu1  ;;  %v941_v11 = vadd.f32 %v940_v37, %v855_v53 }
 0x249   :  { %v857_v55 = vpop.f32.mrf.mxu0 }
 0x24b   :  { %v7825_v19 = vpop.f32.mrf.mxu1 }
 0x24c   :  { %v1010_v20 = vpop.f32.mrf.mxu0 }
 0x24d   :  { %v1095_v56 = vpop.f32.mrf.mxu1  ;;  %v1011_v60 = vadd.f32 %v1010_v20, %v926_v58 }
 0x24e   :  { %v1012_v57 = vpop.f32.mrf.mxu0 }
 0x24f   :  { %v7828_v62 = vpop.f32.mrf.mxu1  ;;  %v1096_v7 = vadd.f32 %v1095_v56, %v1011_v60  ;;  %v1118_v56 = vld [vmem:[#allocation10 + $0x1] sm:$0x1] }
 0x250   :  { %v1015_v59 = vpop.f32.mrf.mxu0 }
 0x251   :  { %v1016_v61 = vadd.f32 %v1015_v59, %v931_v48  ;;  %v1105_v9 = vpop.f32.mrf.mxu1  ;;  %v1114_v14 = vsel %vm615_vm12, %v1096_v7, 0.0  ;;  %v7288_v59 = vld [vmem:[#allocation10 + $0x8] ss:$0 sm:$0xff] }
 0x252   :  { %v1017_v63 = vpop.f32.mrf.mxu0 }
 0x253   :  { %v1101_v4 = vadd.f32 %v7825_v19, %v1016_v61 }
 0x254   :  { %v1020_v6 = vpop.f32.mrf.mxu0 }
 0x255   :  { %v1021_v8 = vadd.f32 %v1020_v6, %v936_v0  ;;  %v1115_v12 = vsel %vm615_vm12, %v1101_v4, 0.0 }
 0x256   :  { %v1022_v10 = vpop.f32.mrf.mxu0  ;;  %v1120_v17 = vadd.f32 %v1115_v12, %v1114_v14 }
 0x257   :  { %v1106_v13 = vadd.f32 %v1105_v9, %v1021_v8 }
 0x258   :  { %v1025_v2 = vpop.f32.mrf.mxu0 }
 0x259   :  { %v1116_v15 = vsel %vm615_vm12, %v1106_v13, 0.0  ;;  %v1026_v16 = vadd.f32 %v1025_v2, %v941_v11 }
 0x25a   :  { %v1027_v21 = vpop.f32.mrf.mxu0  ;;  %v1121_v23 = vadd.f32 %v1120_v17, %v1116_v15 }
 0x25b   :  { %v1111_v22 = vadd.f32 %v7828_v62, %v1026_v16 }
 0x25d   :  { %v1117_v25 = vsel %vm615_vm12, %v1111_v22, 0.0 }
 0x25e   :  { %v1122_v27 = vadd.f32 %v1121_v23, %v1117_v25 }
 0x260   :  { %v1123_v28 = vrot.slane %v1122_v27, 4 }
 0x262   :  { %v1124_v32 = vadd.f32 %v1123_v28, %v1122_v27 }
 0x264   :  { %v1125_v33 = vrot.slane %v1124_v32, 2 }
 0x266   :  { %v1126_v24 = vadd.f32 %v1125_v33, %v1124_v32  ;;  %v1296_v33 = vld [vmem:[#allocation5 + $0x368] sm:$0xff] }
 0x268   :  { %v1127_v26 = vrot.slane %v1126_v24, 1 }
 0x26a   :  { %v1128_v30 = vadd.f32 %v1127_v26, %v1126_v24  ;;  %v1291_v26 = vld [vmem:[#allocation5 + $0x340] sm:$0xff] }
 0x26c   :  { %v1129_v34 = vmul.f32 0.03125, %v1128_v30 }
 0x26e   :  { %v1130_v39 = vsub.f32 %v1114_v14, %v1129_v34  ;;  %v1131_v41 = vsub.f32 %v1115_v12, %v1129_v34  ;;  %v1132_v42 = vsub.f32 %v1116_v15, %v1129_v34  ;;  %v1133_v43 = vsub.f32 %v1117_v25, %v1129_v34 }
 0x270   :  { %v1134_v44 = vmul.f32 %v1130_v39, %v1130_v39  ;;  %v1135_v49 = vmul.f32 %v1131_v41, %v1131_v41  ;;  %v1136_v50 = vmul.f32 %v1132_v42, %v1132_v42  ;;  %v1137_v47 = vmul.f32 %v1133_v43, %v1133_v43 }
 0x272   :  { %v1138_v51 = vadd.f32 %v1135_v49, %v1134_v44  ;;  %v1289_v49 = vld [vmem:[#allocation5 + $0x330] sm:$0xff] }
 0x274   :  { %v1139_v52 = vadd.f32 %v1138_v51, %v1136_v50  ;;  %v1284_v51 = vld [vmem:[#allocation5 + $0x308] sm:$0xff] }
 0x276   :  { %v1140_v45 = vadd.f32 %v1139_v52, %v1137_v47 }
 0x278   :  { %v1141_v31 = vrot.slane %v1140_v45, 4 }
 0x27a   :  { %v1142_v46 = vadd.f32 %v1141_v31, %v1140_v45  ;;  %v1283_v45 = vld [vmem:[#allocation5 + $0x300] sm:$0xff] }
 0x27c   :  { %v1143_v37 = vrot.slane %v1142_v46, 2 }
 0x27e   :  { %v1144_v53 = vadd.f32 %v1143_v37, %v1142_v46  ;;  %v1282_v37 = vld [vmem:[#allocation5 + $0x2f8] sm:$0xff] }
 0x280   :  { %v1145_v54 = vrot.slane %v1144_v53, 1 }
 0x282   :  { %v1146_v55 = vadd.f32 %v1145_v54, %v1144_v53  ;;  %v1277_v53 = vld [vmem:[#allocation5 + $0x2d0] sm:$0xff]  ;;  %v1276_v54 = vld [vmem:[#allocation5 + $0x2c8] sm:$0xff] }
 0x284   :  { %v1147_v19 = vmul.f32 0.03125, %v1146_v55 }
 0x286   :  { %v1148_v20 = vadd.f32 1e-05, %v1147_v19 }
 0x288   :  { %8077 = vrsqrt.f32 %v1148_v20 }
 0x295   :  { %v8078_v57 = vpop.eup %8077 }
 0x296   :  { %v1150_v58 = vmul.f32 %v8078_v57, %v1118_v56 }
 0x298   :  { %v1154_v48 = vrot.slane %v1150_v58, %v8499_v29 }
 0x29a   :  { %v1155_v60 = vmul.f32 %v1154_v48, %v1130_v39  ;;  %v1156_v61 = vmul.f32 %v1154_v48, %v1131_v41  ;;  %v1157_v62 = vmul.f32 %v1154_v48, %v1132_v42  ;;  %v1158_v63 = vmul.f32 %v1154_v48, %v1133_v43  ;;  %v1290_v41 = vld [vmem:[#allocation5 + $0x338] sm:$0xff]  ;;  %v1275_v48 = vld [vmem:[#allocation5 + $0x2c0] sm:$0xff] }
 0x29c   :  { %v1163_v0 = vadd.f32 %v7288_v59, %v1155_v60  ;;  %v1164_v4 = vadd.f32 %v7288_v59, %v1156_v61  ;;  %v1165_v6 = vadd.f32 %v7288_v59, %v1157_v62  ;;  %v1166_v7 = vadd.f32 %v7288_v59, %v1158_v63  ;;  %v1270_v60 = vld [vmem:[#allocation5 + $0x298] sm:$0xff]  ;;  %v1269_v62 = vld [vmem:[#allocation5 + $0x290] sm:$0xff] }
 0x29e   :  { %v8615_v8 = vmax.f32 %v1163_v0, 0.0  ;;  %v8617_v9 = vmax.f32 %v1164_v4, 0.0  ;;  %v8619_v10 = vmax.f32 %v1166_v7, 0.0  ;;  %v8621_v11 = vmax.f32 %v1165_v6, 0.0  ;;  %v1268_v0 = vld [vmem:[#allocation5 + $0x288] sm:$0xff]  ;;  %v1263_v4 = vld [vmem:[#allocation5 + $0x260] sm:$0xff] }
 0x29f   :  { %v1262_v6 = vld [vmem:[#allocation5 + $0x258] sm:$0xff]  ;;  %v1261_v7 = vld [vmem:[#allocation5 + $0x250] sm:$0xff] }
 0x2a0   :  { %1448 = vmatprep.mubr.f32.mxu1 %v8615_v8  ;;  %v1183_v12 = vrot.slane %v8615_v8, 6  ;;  %v1186_v13 = vrot.slane %v8619_v10, 6  ;;  %v1195_v2 = vrot.slane %v8615_v8, 7  ;;  %v1198_v14 = vrot.slane %v8619_v10, 7 }
 0x2a1   :  { %v1171_v15 = vrot.slane %v8615_v8, 5  ;;  %v1174_v16 = vrot.slane %v8619_v10, 5  ;;  %v1184_v22 = vrot.slane %v8617_v9, 6  ;;  %v1185_v28 = vrot.slane %v8621_v11, 6 }
 0x2a2   :  { %v1190_v17 = vsel %vm186_vm2, %v1186_v13, %v1183_v12  ;;  %v1202_v21 = vsel %vm199_vm6, %v1198_v14, %v1195_v2  ;;  %v1196_v24 = vrot.slane %v8617_v9, 7  ;;  %v1172_v30 = vrot.slane %v8617_v9, 5 }
 0x2a3   :  { %v1191_v23 = vmul.f32 %v8291_v18, %v1190_v17  ;;  %v1203_v25 = vmul.f32 %v8323_v36, %v1202_v21  ;;  %v1178_v27 = vsel %vm173_vm1, %v1174_v16, %v1171_v15  ;;  %v1197_v34 = vrot.slane %v8621_v11, 7 }
 0x2a4   :  { %v1179_v32 = vmul.f32 %v8319_v35, %v1178_v27  ;;  %v1173_v39 = vrot.slane %v8621_v11, 5  ;;  %v1189_v42 = vsel %vm186_vm2, %v1183_v12, %v1184_v22  ;;  %v1188_v43 = vsel %vm186_vm2, %v1184_v22, %v1185_v28  ;;  %v1256_v12 = vld [vmem:[#allocation5 + $0x228] sm:$0xff]  ;;  %v1247_v22 = vld [vmem:[#allocation5 + $0x1e0] sm:$0xff] }
 0x2a5   :  { %1363 = vmatprep.mubr.f32.mxu0 %v1191_v23  ;;  %1449 = vmatmul.mubr.f32.vlgmr.msra.gmra.mxu1 %v1203_v25  ;;  %v1201_v44 = vsel %vm199_vm6, %v1195_v2, %v1196_v24  ;;  %v1177_v50 = vsel %vm173_vm1, %v1171_v15, %v1172_v30  ;;  %v1193_v52 = vmul.f32 %v8291_v18, %v1188_v43  ;;  %v1231_v55 = vrot.slane %v8615_v8, 3  ;;  %v1249_v15 = vld [vmem:[#allocation5 + $0x1f0] sm:$0xff] }
 0x2a6   :  { %7830 = vmatpush3.xpose.msra.mxu1 %v8607_v38  ;;  %1364 = vmatmul.mubr.f32.vlgmr.msra.gmra.mxu0 %v1179_v32  ;;  %v1200_v38 = vsel %vm199_vm6, %v1196_v24, %v1197_v34  ;;  %v1176_v47 = vsel %vm173_vm1, %v1172_v30, %v1173_v39  ;;  %v1232_v19 = vrot.slane %v8617_v9, 3  ;;  %v1187_v20 = vsel %vm186_vm2, %v1185_v28, %v1186_v13  ;;  %v1255_v13 = vld [vmem:[#allocation5 + $0x220] sm:$0xff] }
 0x2a7   :  { %1453 = vmatprep.mubr.f32.mxu1 %v8617_v9  ;;  %1486 = vmatpush1.xpose.msra.mxu0 %v1296_v33  ;;  %v1205_v31 = vmul.f32 %v8323_v36, %v1200_v38  ;;  %v1181_v46 = vmul.f32 %v8319_v35, %v1176_v47  ;;  %v1219_v56 = vrot.slane %v8615_v8, 2  ;;  %v1220_v57 = vrot.slane %v8617_v9, 2  ;;  %v1820_v47 = vld [vmem:[#allocation5 + $0x518] sm:$0xff] }
 0x2a8   :  { %1368 = vmatprep.mubr.f32.mxu0 %v1189_v42  ;;  %7831 = vmatprep.subr.mxu1 %v1291_v26  ;;  %v1199_v58 = vsel %vm199_vm6, %v1197_v34, %v1198_v14  ;;  %v1175_v59 = vsel %vm173_vm1, %v1173_v39, %v1174_v16  ;;  %v1237_v61 = vsel %vm238_vm9, %v1231_v55, %v1232_v19  ;;  %v1233_v2 = vrot.slane %v8621_v11, 3  ;;  %v1254_v14 = vld [vmem:[#allocation5 + $0x218] sm:$0xff]  ;;  %v1248_v16 = vld [vmem:[#allocation5 + $0x1e8] sm:$0xff] }
 0x2a9   :  { %1454 = vmatmul.mubr.f32.gmra.mxu1 %v1201_v44  ;;  %1487 = vmatprep.subr.mxu0 %v1290_v41  ;;  %v1225_v63 = vsel %vm225_vm10, %v1219_v56, %v1220_v57  ;;  %v1221_v17 = vrot.slane %v8621_v11, 2  ;;  %v1234_v23 = vrot.slane %v8619_v10, 3  ;;  %v1207_v25 = vrot.slane %v8615_v8, 1  ;;  %v1819_v8 = vld [vmem:[#allocation5 + $0x510] sm:$0xff] }
 0x2aa   :  { %7832 = vmatpush3.xpose.msra.mxu1 %v1291_v26  ;;  %1369 = vmatmul.mubr.f32.gmra.mxu0 %v1177_v50  ;;  %v1236_v21 = vsel %vm238_vm9, %v1232_v19, %v1233_v2  ;;  %v1208_v27 = vrot.slane %v8617_v9, 1  ;;  %v1209_v28 = vrot.slane %v8621_v11, 1  ;;  %v1222_v34 = vrot.slane %v8619_v10, 2  ;;  %v1804_v19 = vld [vmem:[#allocation5 + $0x498] sm:$0xff] }
 0x2ab   :  { %1458 = vmatprep.mubr.f32.mxu1 %v8621_v11  ;;  %1488 = vmatpush1.xpose.msra.mxu0 %v1289_v49  ;;  %v1224_v32 = vsel %vm225_vm10, %v1220_v57, %v1221_v17  ;;  %v1240_v33 = vmul.f32 %v8330_v40, %v1236_v21  ;;  %v1238_v24 = vsel %vm238_vm9, %v1234_v23, %v1231_v55  ;;  %v1210_v42 = vrot.slane %v8619_v10, 1  ;;  %v1806_v55 = vld [vmem:[#allocation5 + $0x4a8] sm:$0xff]  ;;  %v1799_v57 = vld [vmem:[#allocation5 + $0x470] sm:$0xff]  ;;  %v8724_v21 = vld [vmem:[#allocation5 + $0x538] sm:$0xff] }
 0x2ac   :  { %1373 = vmatprep.mubr.f32.mxu0 %v1193_v52  ;;  %7833 = vmatprep.subr.mxu1 %v1284_v51  ;;  %v1213_v26 = vsel %vm212_vm11, %v1207_v25, %v1208_v27  ;;  %v1235_v30 = vsel %vm238_vm9, %v1233_v2, %v1234_v23  ;;  %v1228_v9 = vmul.f32 %v8367_v3, %v1224_v32  ;;  %v1818_v52 = vld [vmem:[#allocation5 + $0x508] sm:$0xff]  ;;  %v1772_v2 = vld [vmem:[#allocation5 + $0x398] sm:$0xff]  ;;  %v1823_v23 = vld [vmem:[#allocation5 + $0x530] sm:$0xff] }
 0x2ad   :  { %1459 = vmatmul.mubr.f32.gmra.mxu1 %v1205_v31  ;;  %1489 = vmatprep.subr.mxu0 %v1283_v45  ;;  %v1212_v11 = vsel %vm212_vm11, %v1208_v27, %v1209_v28  ;;  %v1242_v39 = vmul.f32 %v8330_v40, %v1238_v24  ;;  %v1223_v43 = vsel %vm225_vm10, %v1221_v17, %v1222_v34  ;;  %v1814_v45 = vld [vmem:[#allocation5 + $0x4e8] sm:$0xff]  ;;  %v1812_v31 = vld [vmem:[#allocation5 + $0x4d8] sm:$0xff]  ;;  %v1769_v17 = vld [vmem:[#allocation5 + $0x380] sm:$0xff] }
 0x2ae   :  { %7834 = vmatpush3.xpose.msra.mxu1 %v1284_v51  ;;  %1374 = vmatmul.mubr.f32.gmra.mxu0 %v1181_v46  ;;  %v1216_v41 = vmul.f32 %v8373_v5, %v1212_v11  ;;  %v1226_v44 = vsel %vm225_vm10, %v1222_v34, %v1219_v56  ;;  %v1211_v49 = vsel %vm212_vm11, %v1209_v28, %v1210_v42  ;;  %v1821_v51 = vld [vmem:[#allocation5 + $0x520] sm:$0xff]  ;;  %v1798_v56 = vld [vmem:[#allocation5 + $0x468] sm:$0xff] }
 0x2af   :  { %1463 = vmatprep.mubr.f32.mxu1 %v8619_v10  ;;  %1490 = vmatpush1.xpose.msra.mxu0 %v1282_v37  ;;  %v1230_v38 = vmul.f32 %v8367_v3, %v1226_v44  ;;  %v1214_v50 = vsel %vm212_vm11, %v1210_v42, %v1207_v25  ;;  %v1813_v46 = vld [vmem:[#allocation5 + $0x4e0] sm:$0xff]  ;;  %v1811_v37 = vld [vmem:[#allocation5 + $0x4d0] sm:$0xff] }
 0x2b0   :  { %1378 = vmatprep.mubr.f32.mxu0 %v1187_v20  ;;  %7835 = vmatprep.subr.mxu1 %v1277_v53  ;;  %v1218_v10 = vmul.f32 %v8373_v5, %v1214_v50  ;;  %v1800_v20 = vld [vmem:[#allocation5 + $0x478] sm:$0xff] }
 0x2b1   :  { %1464 = vmatmul.mubr.f32.gmra.mxu1 %v1199_v58  ;;  %1491 = vmatprep.subr.mxu0 %v1276_v54  ;;  %v1805_v54 = vld [vmem:[#allocation5 + $0x4a0] sm:$0xff] }
 0x2b2   :  { %7836 = vmatpush3.xpose.msra.mxu1 %v1277_v53  ;;  %1379 = vmatmul.mubr.f32.gmra.mxu0 %v1175_v59  ;;  %v1807_v53 = vld [vmem:[#allocation5 + $0x4b0] sm:$0xff]  ;;  %v1797_v58 = vld [vmem:[#allocation5 + $0x460] sm:$0xff] }
 0x2b3   :  { %1492 = vmatpush1.xpose.msra.mxu0 %v1275_v48  ;;  %7845 = vmatprep.mubr.f32.mxu1 %v1237_v61  ;;  %v1793_v48 = vld [vmem:[#allocation5 + $0x440] sm:$0xff]  ;;  %v1791_v59 = vld [vmem:[#allocation5 + $0x430] sm:$0xff]  ;;  %v1790_v61 = vld [vmem:[#allocation5 + $0x428] sm:$0xff] }
 0x2b4   :  { %1533 = vmatprep.mubr.f32.mxu0 %v1225_v63  ;;  %7837 = vmatprep.subr.mxu1 %v1270_v60  ;;  %v1784_v63 = vld [vmem:[#allocation5 + $0x3f8] sm:$0xff] }
 0x2b5   :  { %1493 = vmatprep.subr.mxu0 %v1269_v62  ;;  %v1786_v62 = vld [vmem:[#allocation5 + $0x408] sm:$0xff] }
 0x2b6   :  { %7838 = vmatpush3.xpose.msra.mxu1 %v1270_v60  ;;  %v1792_v60 = vld [vmem:[#allocation5 + $0x438] sm:$0xff] }
 0x2b7   :  { %1494 = vmatpush1.xpose.msra.mxu0 %v1268_v0  ;;  %7839 = vmatprep.subr.mxu1 %v1263_v4  ;;  %v1785_v0 = vld [vmem:[#allocation5 + $0x400] sm:$0xff] }
 0x2b8   :  { %1495 = vmatprep.subr.mxu0 %v1262_v6  ;;  %v1779_v6 = vld [vmem:[#allocation5 + $0x3d0] sm:$0xff] }
 0x2ba   :  { %7840 = vmatpush3.xpose.msra.mxu1 %v1263_v4  ;;  %v1783_v4 = vld [vmem:[#allocation5 + $0x3f0] sm:$0xff] }
 0x2bb   :  { %1496 = vmatpush1.xpose.msra.mxu0 %v1261_v7  ;;  %7841 = vmatprep.subr.mxu1 %v1256_v12  ;;  %v1777_v7 = vld [vmem:[#allocation5 + $0x3c0] sm:$0xff] }
 0x2bc   :  { %1497 = vmatprep.subr.mxu0 %v1255_v13  ;;  %v1776_v13 = vld [vmem:[#allocation5 + $0x3b8] sm:$0xff] }
 0x2be   :  { %7842 = vmatpush3.xpose.msra.mxu1 %v1256_v12  ;;  %v1778_v12 = vld [vmem:[#allocation5 + $0x3c8] sm:$0xff] }
 0x2bf   :  { %1498 = vmatpush1.xpose.msra.mxu0 %v1254_v14  ;;  %7843 = vmatprep.subr.mxu1 %v1249_v15  ;;  %v1770_v14 = vld [vmem:[#allocation5 + $0x388] sm:$0xff] }
 0x2c0   :  { %1499 = vmatprep.subr.mxu0 %v1248_v16 }
 0x2c2   :  { %7844 = vmatpush3.xpose.msra.mxu1 %v1249_v15  ;;  %v1771_v15 = vld [vmem:[#allocation5 + $0x390] sm:$0xff] }
 0x2c3   :  { %1500 = vmatpush1.xpose.msra.mxu0 %v1247_v22  ;;  %1926 = vmatprep.subr.mxu1 %v1821_v51 }
 0x2c4   :  { %1841 = vmatprep.subr.mxu0 %v1819_v8 }
 0x2c5   :  { %7846 = vmatmul.mubr.f32.vlgmr.msra.gmra.mxu1 %v1240_v33 }
 0x2c6   :  { %1534 = vmatmul.mubr.f32.vlgmr.msra.gmra.mxu0 %v1213_v26  ;;  %7848 = vmatprep.mubr.f32.mxu1 %v1235_v30 }
 0x2c7   :  { %1538 = vmatprep.mubr.f32.mxu0 %v1228_v9  ;;  %1927 = vmatpush1.xpose.msra.mxu1 %v1820_v47 }
 0x2c8   :  { %1842 = vmatpush1.xpose.msra.mxu0 %v1818_v52  ;;  %1928 = vmatprep.subr.mxu1 %v1814_v45 }
 0x2c9   :  { %7849 = vmatmul.mubr.f32.gmra.mxu1 %v1242_v39  ;;  %1843 = vmatprep.subr.mxu0 %v1812_v31 }
 0x2ca   :  { %1539 = vmatmul.mubr.f32.gmra.mxu0 %v1216_v41 }
 0x2cb   :  { %1543 = vmatprep.mubr.f32.mxu0 %v1223_v43  ;;  %1929 = vmatpush1.xpose.msra.mxu1 %v1813_v46 }
 0x2cc   :  { %1844 = vmatpush1.xpose.msra.mxu0 %v1811_v37  ;;  %1930 = vmatprep.subr.mxu1 %v1807_v53 }
 0x2cd   :  { %1845 = vmatprep.subr.mxu0 %v1805_v54 }
 0x2ce   :  { %1544 = vmatmul.mubr.f32.gmra.mxu0 %v1211_v49 }
 0x2cf   :  { %1548 = vmatprep.mubr.f32.mxu0 %v1230_v38  ;;  %1931 = vmatpush1.xpose.msra.mxu1 %v1806_v55 }
 0x2d0   :  { %1846 = vmatpush1.xpose.msra.mxu0 %v1804_v19  ;;  %1932 = vmatprep.subr.mxu1 %v1800_v20 }
 0x2d1   :  { %1847 = vmatprep.subr.mxu0 %v1798_v56 }
 0x2d2   :  { %1549 = vmatmul.mubr.f32.gmra.mxu0 %v1218_v10 }
 0x2d3   :  { %1933 = vmatpush1.xpose.msra.mxu1 %v1799_v57 }
 0x2d4   :  { %1848 = vmatpush1.xpose.msra.mxu0 %v1797_v58  ;;  %1934 = vmatprep.subr.mxu1 %v1793_v48 }
 0x2d5   :  { %1849 = vmatprep.subr.mxu0 %v1791_v59 }
 0x2d7   :  { %1935 = vmatpush1.xpose.msra.mxu1 %v1792_v60 }
 0x2d8   :  { %1850 = vmatpush1.xpose.msra.mxu0 %v1790_v61  ;;  %1936 = vmatprep.subr.mxu1 %v1786_v62 }
 0x2d9   :  { %1851 = vmatprep.subr.mxu0 %v1784_v63 }
 0x2db   :  { %1937 = vmatpush1.xpose.msra.mxu1 %v1785_v0 }
 0x2dc   :  { %1852 = vmatpush1.xpose.msra.mxu0 %v1783_v4  ;;  %1938 = vmatprep.subr.mxu1 %v1779_v6 }
 0x2dd   :  { %1853 = vmatprep.subr.mxu0 %v1777_v7 }
 0x2df   :  { %1939 = vmatpush1.xpose.msra.mxu1 %v1778_v12 }
 0x2e0   :  { %1854 = vmatpush1.xpose.msra.mxu0 %v1776_v13  ;;  %1940 = vmatprep.subr.mxu1 %v1772_v2 }
 0x2e1   :  { %1855 = vmatprep.subr.mxu0 %v1770_v14 }
 0x2e3   :  { %1941 = vmatpush1.xpose.msra.mxu1 %v1771_v15 }
 0x2e4   :  { %1856 = vmatpush1.xpose.msra.mxu0 %v1769_v17  ;;  %7851 = vmatprep.subr.mxu1 %v8724_v21 }
 0x2e5   :  { %2011 = vmatprep.subr.mxu0 %v1823_v23 }
 0x365   :  { %v1450_v16 = vpop.f32.mrf.mxu1 }
 0x366   :  { %v1365_v22 = vpop.f32.mrf.mxu0 }
 0x367   :  { %v1452_v25 = vpop.f32.mrf.mxu1  ;;  %v1451_v50 = vadd.f32 %v1450_v16, %v1365_v22 }
 0x368   :  { %v1367_v27 = vpop.f32.mrf.mxu0 }
 0x369   :  { %v1455_v28 = vpop.f32.mrf.mxu1 }
 0x36a   :  { %v1370_v32 = vpop.f32.mrf.mxu0 }
 0x36b   :  { %v1457_v33 = vpop.f32.mrf.mxu1  ;;  %v1456_v10 = vadd.f32 %v1455_v28, %v1370_v32 }
 0x36c   :  { %v1372_v24 = vpop.f32.mrf.mxu0 }
 0x36d   :  { %v1460_v26 = vpop.f32.mrf.mxu1 }
 0x36e   :  { %v1375_v30 = vpop.f32.mrf.mxu0 }
 0x36f   :  { %v1462_v9 = vpop.f32.mrf.mxu1  ;;  %v1461_v31 = vadd.f32 %v1460_v26, %v1375_v30 }
 0x370   :  { %v1377_v11 = vpop.f32.mrf.mxu0 }
 0x371   :  { %v1465_v34 = vpop.f32.mrf.mxu1 }
 0x372   :  { %v1380_v39 = vpop.f32.mrf.mxu0 }
 0x373   :  { %v1467_v41 = vpop.f32.mrf.mxu1  ;;  %v1466_v20 = vadd.f32 %v1465_v34, %v1380_v39 }
 0x374   :  { %v1382_v42 = vpop.f32.mrf.mxu0 }
 0x385   :  { %v7847_v43 = vpop.f32.mrf.mxu1 }
 0x386   :  { %v1535_v44 = vpop.f32.mrf.mxu0 }
 0x387   :  { %v1620_v49 = vpop.f32.mrf.mxu1  ;;  %v1536_v8 = vadd.f32 %v1535_v44, %v1451_v50 }
 0x388   :  { %v1537_v38 = vpop.f32.mrf.mxu0 }
 0x389   :  { %v7850_v52 = vpop.f32.mrf.mxu1  ;;  %v1621_v53 = vadd.f32 %v1620_v49, %v1536_v8  ;;  %v1644_v49 = vld [vmem:[#allocation10 + $0x2] sm:$0x1] }
 0x38a   :  { %v1540_v51 = vpop.f32.mrf.mxu0 }
 0x38b   :  { %v1541_v47 = vadd.f32 %v1540_v51, %v1456_v10  ;;  %v1630_v55 = vpop.f32.mrf.mxu1  ;;  %v1640_v48 = vsel %vm1639_vm13, %v1621_v53, 0.0  ;;  %v7289_v51 = vld [vmem:[#allocation10 + $0x9] ss:$0 sm:$0xff] }
 0x38c   :  { %v1542_v45 = vpop.f32.mrf.mxu0 }
 0x38d   :  { %v1626_v46 = vadd.f32 %v7847_v43, %v1541_v47 }
 0x38e   :  { %v1545_v37 = vpop.f32.mrf.mxu0 }
 0x38f   :  { %v1546_v54 = vadd.f32 %v1545_v37, %v1461_v31  ;;  %v1641_v56 = vsel %vm1639_vm13, %v1626_v46, 0.0 }
 0x390   :  { %v1547_v19 = vpop.f32.mrf.mxu0  ;;  %v1646_v61 = vadd.f32 %v1641_v56, %v1640_v48 }
 0x391   :  { %v1631_v57 = vadd.f32 %v1630_v55, %v1546_v54 }
 0x392   :  { %v1550_v58 = vpop.f32.mrf.mxu0 }
 0x393   :  { %v1642_v59 = vsel %vm1639_vm13, %v1631_v57, 0.0  ;;  %v1551_v60 = vadd.f32 %v1550_v58, %v1466_v20 }
 0x394   :  { %v1552_v62 = vpop.f32.mrf.mxu0  ;;  %v1647_v0 = vadd.f32 %v1646_v61, %v1642_v59 }
 0x395   :  { %v1636_v63 = vadd.f32 %v7850_v52, %v1551_v60 }
 0x397   :  { %v1643_v4 = vsel %vm1639_vm13, %v1636_v63, 0.0 }
 0x398   :  { %v1648_v6 = vadd.f32 %v1647_v0, %v1643_v4 }
 0x39a   :  { %v1649_v7 = vrot.slane %v1648_v6, 4 }
 0x39c   :  { %v1650_v12 = vadd.f32 %v1649_v7, %v1648_v6 }
 0x39e   :  { %v1651_v13 = vrot.slane %v1650_v12, 2 }
 0x3a0   :  { %v1652_v2 = vadd.f32 %v1651_v13, %v1650_v12  ;;  %v1822_v13 = vld [vmem:[#allocation5 + $0x528] sm:$0xff] }
 0x3a2   :  { %v1653_v14 = vrot.slane %v1652_v2, 1 }
 0x3a4   :  { %v1654_v15 = vadd.f32 %v1653_v14, %v1652_v2  ;;  %v1817_v14 = vld [vmem:[#allocation5 + $0x500] sm:$0xff] }
 0x3a6   :  { %v1655_v16 = vmul.f32 0.03125, %v1654_v15 }
 0x3a8   :  { %v1656_v17 = vsub.f32 %v1640_v48, %v1655_v16  ;;  %v1657_v22 = vsub.f32 %v1641_v56, %v1655_v16  ;;  %v1658_v23 = vsub.f32 %v1642_v59, %v1655_v16  ;;  %v1659_v25 = vsub.f32 %v1643_v4, %v1655_v16 }
 0x3aa   :  { %v1660_v27 = vmul.f32 %v1656_v17, %v1656_v17  ;;  %v1661_v28 = vmul.f32 %v1657_v22, %v1657_v22  ;;  %v1662_v32 = vmul.f32 %v1658_v23, %v1658_v23  ;;  %v1663_v24 = vmul.f32 %v1659_v25, %v1659_v25 }
 0x3ac   :  { %v1664_v33 = vadd.f32 %v1661_v28, %v1660_v27  ;;  %v1815_v28 = vld [vmem:[#allocation5 + $0x4f0] sm:$0xff] }
 0x3ae   :  { %v1665_v26 = vadd.f32 %v1664_v33, %v1662_v32  ;;  %v1810_v33 = vld [vmem:[#allocation5 + $0x4c8] sm:$0xff] }
 0x3b0   :  { %v1666_v30 = vadd.f32 %v1665_v26, %v1663_v24 }
 0x3b2   :  { %v1667_v9 = vrot.slane %v1666_v30, 4 }
 0x3b4   :  { %v1668_v11 = vadd.f32 %v1667_v9, %v1666_v30  ;;  %v1809_v30 = vld [vmem:[#allocation5 + $0x4c0] sm:$0xff] }
 0x3b6   :  { %v1669_v34 = vrot.slane %v1668_v11, 2 }
 0x3b8   :  { %v1670_v39 = vadd.f32 %v1669_v34, %v1668_v11  ;;  %v1808_v34 = vld [vmem:[#allocation5 + $0x4b8] sm:$0xff] }
 0x3ba   :  { %v1671_v41 = vrot.slane %v1670_v39, 1 }
 0x3bc   :  { %v1672_v42 = vadd.f32 %v1671_v41, %v1670_v39  ;;  %v1803_v39 = vld [vmem:[#allocation5 + $0x490] sm:$0xff]  ;;  %v1802_v41 = vld [vmem:[#allocation5 + $0x488] sm:$0xff] }
 0x3be   :  { %v1673_v43 = vmul.f32 0.03125, %v1672_v42 }
 0x3c0   :  { %v1674_v44 = vadd.f32 1e-05, %v1673_v43 }
 0x3c2   :  { %8079 = vrsqrt.f32 %v1674_v44 }
 0x3cf   :  { %v8080_v38 = vpop.eup %8079 }
 0x3d0   :  { %v1676_v50 = vmul.f32 %v8080_v38, %v1644_v49 }
 0x3d2   :  { %v1680_v10 = vrot.slane %v1676_v50, %v8499_v29 }
 0x3d4   :  { %v1681_v8 = vmul.f32 %v1680_v10, %v1656_v17  ;;  %v1682_v47 = vmul.f32 %v1680_v10, %v1657_v22  ;;  %v1683_v52 = vmul.f32 %v1680_v10, %v1658_v23  ;;  %v1684_v45 = vmul.f32 %v1680_v10, %v1659_v25  ;;  %v1816_v22 = vld [vmem:[#allocation5 + $0x4f8] sm:$0xff]  ;;  %v1801_v10 = vld [vmem:[#allocation5 + $0x480] sm:$0xff] }
 0x3d6   :  { %v1689_v31 = vadd.f32 %v7289_v51, %v1681_v8  ;;  %v1690_v46 = vadd.f32 %v7289_v51, %v1682_v47  ;;  %v1691_v37 = vadd.f32 %v7289_v51, %v1683_v52  ;;  %v1692_v53 = vadd.f32 %v7289_v51, %v1684_v45  ;;  %v1796_v8 = vld [vmem:[#allocation5 + $0x458] sm:$0xff]  ;;  %v1795_v52 = vld [vmem:[#allocation5 + $0x450] sm:$0xff] }
 0x3d8   :  { %v8732_v54 = vmax.f32 %v1689_v31, 0.0  ;;  %v8734_v55 = vmax.f32 %v1690_v46, 0.0  ;;  %v8736_v19 = vmax.f32 %v1692_v53, 0.0  ;;  %v8738_v20 = vmax.f32 %v1691_v37, 0.0  ;;  %v1794_v31 = vld [vmem:[#allocation5 + $0x448] sm:$0xff]  ;;  %v1789_v46 = vld [vmem:[#allocation5 + $0x420] sm:$0xff] }
 0x3d9   :  { %v1788_v37 = vld [vmem:[#allocation5 + $0x418] sm:$0xff]  ;;  %v1787_v53 = vld [vmem:[#allocation5 + $0x410] sm:$0xff] }
 0x3da   :  { %1974 = vmatprep.mubr.f32.mxu1 %v8732_v54  ;;  %v1709_v56 = vrot.slane %v8732_v54, 6  ;;  %v1712_v57 = vrot.slane %v8736_v19, 6  ;;  %v1721_v58 = vrot.slane %v8732_v54, 7  ;;  %v1724_v48 = vrot.slane %v8736_v19, 7 }
 0x3db   :  { %v1697_v59 = vrot.slane %v8732_v54, 5  ;;  %v1700_v60 = vrot.slane %v8736_v19, 5  ;;  %v1710_v63 = vrot.slane %v8734_v55, 6  ;;  %v1711_v7 = vrot.slane %v8738_v20, 6 }
 0x3dc   :  { %v1716_v61 = vsel %vm186_vm2, %v1712_v57, %v1709_v56  ;;  %v1728_v62 = vsel %vm199_vm6, %v1724_v48, %v1721_v58  ;;  %v1722_v2 = vrot.slane %v8734_v55, 7  ;;  %v1698_v15 = vrot.slane %v8734_v55, 5 }
 0x3dd   :  { %v1717_v0 = vmul.f32 %v8291_v18, %v1716_v61  ;;  %v1729_v4 = vmul.f32 %v8323_v36, %v1728_v62  ;;  %v1704_v6 = vsel %vm173_vm1, %v1700_v60, %v1697_v59  ;;  %v1723_v16 = vrot.slane %v8738_v20, 7 }
 0x3de   :  { %v1705_v12 = vmul.f32 %v8319_v35, %v1704_v6  ;;  %v1699_v17 = vrot.slane %v8738_v20, 5  ;;  %v1715_v23 = vsel %vm186_vm2, %v1709_v56, %v1710_v63  ;;  %v1714_v25 = vsel %vm186_vm2, %v1710_v63, %v1711_v7  ;;  %v1782_v56 = vld [vmem:[#allocation5 + $0x3e8] sm:$0xff]  ;;  %v1773_v63 = vld [vmem:[#allocation5 + $0x3a0] sm:$0xff] }
 0x3df   :  { %1889 = vmatprep.mubr.f32.mxu0 %v1717_v0  ;;  %1975 = vmatmul.mubr.f32.vlgmr.msra.gmra.mxu1 %v1729_v4  ;;  %v1727_v27 = vsel %vm199_vm6, %v1721_v58, %v1722_v2  ;;  %v1703_v32 = vsel %vm173_vm1, %v1697_v59, %v1698_v15  ;;  %v1719_v26 = vmul.f32 %v8291_v18, %v1714_v25  ;;  %v1757_v42 = vrot.slane %v8732_v54, 3  ;;  %v1775_v59 = vld [vmem:[#allocation5 + $0x3b0] sm:$0xff] }
 0x3e0   :  { %7852 = vmatpush3.xpose.msra.mxu1 %v8724_v21  ;;  %1890 = vmatmul.mubr.f32.vlgmr.msra.gmra.mxu0 %v1705_v12  ;;  %v1726_v21 = vsel %vm199_vm6, %v1722_v2, %v1723_v16  ;;  %v1702_v24 = vsel %vm173_vm1, %v1698_v15, %v1699_v17  ;;  %v1758_v43 = vrot.slane %v8734_v55, 3  ;;  %v1713_v44 = vsel %vm186_vm2, %v1711_v7, %v1712_v57  ;;  %v1781_v57 = vld [vmem:[#allocation5 + $0x3e0] sm:$0xff] }
 0x3e1   :  { %1979 = vmatprep.mubr.f32.mxu1 %v8734_v55  ;;  %2012 = vmatpush1.xpose.msra.mxu0 %v1822_v13  ;;  %v1731_v9 = vmul.f32 %v8323_v36, %v1726_v21  ;;  %v1707_v11 = vmul.f32 %v8319_v35, %v1702_v24  ;;  %v1745_v49 = vrot.slane %v8732_v54, 2  ;;  %v1746_v38 = vrot.slane %v8734_v55, 2  ;;  %v7948_v24 = vld [vmem:[#allocation7 + $0xf8] sm:$0xff]  }
 0x3e2   :  { %1894 = vmatprep.mubr.f32.mxu0 %v1715_v23  ;;  %7853 = vmatprep.subr.mxu1 %v1817_v14  ;;  %v1725_v50 = vsel %vm199_vm6, %v1723_v16, %v1724_v48  ;;  %v1701_v51 = vsel %vm173_vm1, %v1699_v17, %v1700_v60  ;;  %v1763_v47 = vsel %vm238_vm9, %v1757_v42, %v1758_v43  ;;  %v1759_v58 = vrot.slane %v8738_v20, 3  ;;  %v1780_v48 = vld [vmem:[#allocation5 + $0x3d8] sm:$0xff]  ;;  %v1774_v60 = vld [vmem:[#allocation5 + $0x3a8] sm:$0xff] }
 0x3e3   :  { %1980 = vmatmul.mubr.f32.gmra.mxu1 %v1727_v27  ;;  %2013 = vmatprep.subr.mxu0 %v1816_v22  ;;  %v1751_v45 = vsel %vm225_vm10, %v1745_v49, %v1746_v38  ;;  %v1747_v61 = vrot.slane %v8738_v20, 2  ;;  %v1760_v0 = vrot.slane %v8736_v19, 3  ;;  %v1733_v4 = vrot.slane %v8732_v54, 1  ;;  %v7949_v54 = vld [vmem:[#allocation7 + $0x38] sm:$0xff]  }
 0x3e4   :  { %7854 = vmatpush3.xpose.msra.mxu1 %v1817_v14  ;;  %1895 = vmatmul.mubr.f32.gmra.mxu0 %v1703_v32  ;;  %v1762_v62 = vsel %vm238_vm9, %v1758_v43, %v1759_v58  ;;  %v1734_v6 = vrot.slane %v8734_v55, 1  ;;  %v1735_v7 = vrot.slane %v8738_v20, 1  ;;  %v1748_v16 = vrot.slane %v8736_v19, 2  ;;  %v7958_v43 = vld [vmem:[#allocation7 + $0xa8] sm:$0xff]  }
 0x3e5   :  { %1984 = vmatprep.mubr.f32.mxu1 %v8738_v20  ;;  %2014 = vmatpush1.xpose.msra.mxu0 %v1815_v28  ;;  %v1750_v12 = vsel %vm225_vm10, %v1746_v38, %v1747_v61  ;;  %v1766_v13 = vmul.f32 %v8330_v40, %v1762_v62  ;;  %v1764_v2 = vsel %vm238_vm9, %v1760_v0, %v1757_v42  ;;  %v1736_v23 = vrot.slane %v8736_v19, 1  ;;  %v7957_v42 = vld [vmem:[#allocation7 + $0x28] sm:$0xff]   ;;  %v7961_v38 = vld [vmem:[#allocation7 + $0x20] sm:$0xff]   ;;  %v7979_v62 = vld [vmem:[#allocation7 + $0x178] sm:$0xff]  }
 0x3e6   :  { %1899 = vmatprep.mubr.f32.mxu0 %v1719_v26  ;;  %7855 = vmatprep.subr.mxu1 %v1810_v33  ;;  %v1739_v14 = vsel %vm212_vm11, %v1733_v4, %v1734_v6  ;;  %v1761_v15 = vsel %vm238_vm9, %v1759_v58, %v1760_v0  ;;  %v1754_v55 = vmul.f32 %v8367_v3, %v1750_v12  ;;  %v7950_v26 = vld [vmem:[#allocation7 + $0xb8] sm:$0xff]   ;;  %v7975_v58 = vld [vmem:[#allocation7 + $0x40] sm:$0xff]  }
 0x3e7   :  { %1985 = vmatmul.mubr.f32.gmra.mxu1 %v1731_v9  ;;  %2015 = vmatprep.subr.mxu0 %v1809_v30  ;;  %v1738_v20 = vsel %vm212_vm11, %v1734_v6, %v1735_v7  ;;  %v1768_v17 = vmul.f32 %v8330_v40, %v1764_v2  ;;  %v1749_v25 = vsel %vm225_vm10, %v1747_v61, %v1748_v16  ;;  %v7951_v30 = vld [vmem:[#allocation7 + $0x70] sm:$0xff]  }
 0x3e8   :  { %7856 = vmatpush3.xpose.msra.mxu1 %v1810_v33  ;;  %1900 = vmatmul.mubr.f32.gmra.mxu0 %v1707_v11  ;;  %v1742_v22 = vmul.f32 %v8373_v5, %v1738_v20  ;;  %v1752_v27 = vsel %vm225_vm10, %v1748_v16, %v1745_v49  ;;  %v1737_v28 = vsel %vm212_vm11, %v1735_v7, %v1736_v23  ;;  %v7947_v33 = vld [vmem:[#allocation7 + $0x78] sm:$0xff]   ;;  %v7952_v9 = vld [vmem:[#allocation7 + $0xf0] sm:$0xff]   ;;  %v7960_v49 = vld [vmem:[#allocation7 + $0xe0] sm:$0xff]  }
 0x3e9   :  { %1989 = vmatprep.mubr.f32.mxu1 %v8736_v19  ;;  %2016 = vmatpush1.xpose.msra.mxu0 %v1808_v34  ;;  %v1756_v21 = vmul.f32 %v8367_v3, %v1752_v27  ;;  %v1740_v32 = vsel %vm212_vm11, %v1736_v23, %v1733_v4  ;;  %v7953_v11 = vld [vmem:[#allocation7 + $0x30] sm:$0xff]  }
 0x3ea   :  { %1904 = vmatprep.mubr.f32.mxu0 %v1713_v44  ;;  %7857 = vmatprep.subr.mxu1 %v1803_v39  ;;  %v1744_v19 = vmul.f32 %v8373_v5, %v1740_v32  ;;  %v7954_v34 = vld [vmem:[#allocation7 + $0xb0] sm:$0xff]   ;;  %v7959_v44 = vld [vmem:[#allocation7 + $0x60] sm:$0xff]  }
 0x3eb   :  { %1990 = vmatmul.mubr.f32.gmra.mxu1 %v1725_v50  ;;  %2017 = vmatprep.subr.mxu0 %v1802_v41  ;;  %v7956_v41 = vld [vmem:[#allocation7 + $0xe8] sm:$0xff]   ;;  %v7962_v50 = vld [vmem:[#allocation7 + $0xa0] sm:$0xff]  }
 0x3ec   :  { %7858 = vmatpush3.xpose.msra.mxu1 %v1803_v39  ;;  %1905 = vmatmul.mubr.f32.gmra.mxu0 %v1701_v51  ;;  %v7955_v39 = vld [vmem:[#allocation7 + $0x68] sm:$0xff]   ;;  %v7964_v51 = vld [vmem:[#allocation7 + $0xd8] sm:$0xff]  }
 0x3ed   :  { %2018 = vmatpush1.xpose.msra.mxu0 %v1801_v10  ;;  %7867 = vmatprep.mubr.f32.mxu1 %v1763_v47  ;;  %v7963_v10 = vld [vmem:[#allocation7 + $0x58] sm:$0xff]  }
 0x3ee   :  { %2059 = vmatprep.mubr.f32.mxu0 %v1751_v45  ;;  %7859 = vmatprep.subr.mxu1 %v1796_v8  ;;  %v7966_v47 = vld [vmem:[#allocation7 + $0x98] sm:$0xff]   ;;  %v7968_v45 = vld [vmem:[#allocation7 + $0xd0] sm:$0xff]  }
 0x3ef   :  { %2019 = vmatprep.subr.mxu0 %v1795_v52  ;;  %v7967_v52 = vld [vmem:[#allocation7 + $0x50] sm:$0xff]  }
 0x3f0   :  { %7860 = vmatpush3.xpose.msra.mxu1 %v1796_v8  ;;  %v7965_v8 = vld [vmem:[#allocation7 + $0x18] sm:$0xff]  }
 0x3f1   :  { %2020 = vmatpush1.xpose.msra.mxu0 %v1794_v31  ;;  %7861 = vmatprep.subr.mxu1 %v1789_v46  ;;  %v7969_v31 = vld [vmem:[#allocation7 + $0x10] sm:$0xff]  }
 0x3f2   :  { %2021 = vmatprep.subr.mxu0 %v1788_v37  ;;  %v7971_v37 = vld [vmem:[#allocation7 + $0x48] sm:$0xff]  }
 0x3f4   :  { %7862 = vmatpush3.xpose.msra.mxu1 %v1789_v46  ;;  %v7970_v46 = vld [vmem:[#allocation7 + $0x90] sm:$0xff]  }
 0x3f5   :  { %2022 = vmatpush1.xpose.msra.mxu0 %v1787_v53  ;;  %7863 = vmatprep.subr.mxu1 %v1782_v56  ;;  %v7972_v53 = vld [vmem:[#allocation7 + $0xc8] sm:$0xff]  }
 0x3f6   :  { %2023 = vmatprep.subr.mxu0 %v1781_v57  ;;  %v7974_v57 = vld [vmem:[#allocation7 + $0x88] sm:$0xff]  }
 0x3f8   :  { %7864 = vmatpush3.xpose.msra.mxu1 %v1782_v56  ;;  %v7973_v56 = vld [vmem:[#allocation7 + $0x8] sm:$0xff]  }
 0x3f9   :  { %2024 = vmatpush1.xpose.msra.mxu0 %v1780_v48  ;;  %7865 = vmatprep.subr.mxu1 %v1775_v59  ;;  %v7976_v48 = vld [vmem:[#allocation7 + $0xc0] sm:$0xff]  }
 0x3fa   :  { %2025 = vmatprep.subr.mxu0 %v1774_v60  ;;  %v7978_v60 = vld [vmem:[#allocation7 + $0x80] sm:$0xff]  }
 0x3fc   :  { %7866 = vmatpush3.xpose.msra.mxu1 %v1775_v59  ;;  %v7977_v59 = vld [vmem:[#allocation7] sm:$0xff]  }
 0x3fd   :  { %2026 = vmatpush1.xpose.msra.mxu0 %v1773_v63  ;;  %7614 = vmatprep.subr.bf16.mxu1 %v7948_v24  ;;  %v7980_v63 = vld [vmem:[#allocation7 + $0x1f8] sm:$0xff]  }
 0x3fe   :  { %7592 = vmatprep.subr.bf16.mxu0 %v7947_v33 }
 0x3ff   :  { %7868 = vmatmul.mubr.f32.vlgmr.msra.gmra.mxu1 %v1766_v13 }
 0x400   :  { %2060 = vmatmul.mubr.f32.vlgmr.msra.gmra.mxu0 %v1739_v14  ;;  %7870 = vmatprep.mubr.f32.mxu1 %v1761_v15 }
 0x401   :  { %2064 = vmatprep.mubr.f32.mxu0 %v1754_v55  ;;  %7593 = vmatpush3.bf16.msra.mxu0 %v7949_v54 }
 0x402   :  { %7615 = vmatpush3.bf16.msra.mxu1 %v7950_v26  ;;  %7594 = vmatprep.subr.bf16.mxu0 %v7951_v30 }
 0x403   :  { %7871 = vmatmul.mubr.f32.gmra.mxu1 %v1768_v17  ;;  %7616 = vmatprep.subr.bf16.mxu1 %v7952_v9 }
 0x404   :  { %2065 = vmatmul.mubr.f32.gmra.mxu0 %v1742_v22 }
 0x405   :  { %2069 = vmatprep.mubr.f32.mxu0 %v1749_v25  ;;  %7595 = vmatpush3.bf16.msra.mxu0 %v7953_v11 }
 0x406   :  { %7617 = vmatpush3.bf16.msra.mxu1 %v7954_v34  ;;  %7596 = vmatprep.subr.bf16.mxu0 %v7955_v39 }
 0x407   :  { %7618 = vmatprep.subr.bf16.mxu1 %v7956_v41 }
 0x408   :  { %2070 = vmatmul.mubr.f32.gmra.mxu0 %v1737_v28 }
 0x409   :  { %2074 = vmatprep.mubr.f32.mxu0 %v1756_v21  ;;  %7597 = vmatpush3.bf16.msra.mxu0 %v7957_v42 }
 0x40a   :  { %7619 = vmatpush3.bf16.msra.mxu1 %v7958_v43  ;;  %7598 = vmatprep.subr.bf16.mxu0 %v7959_v44 }
 0x40b   :  { %7620 = vmatprep.subr.bf16.mxu1 %v7960_v49 }
 0x40c   :  { %2075 = vmatmul.mubr.f32.gmra.mxu0 %v1744_v19 }
 0x40d   :  { %7599 = vmatpush3.bf16.msra.mxu0 %v7961_v38 }
 0x40e   :  { %7621 = vmatpush3.bf16.msra.mxu1 %v7962_v50  ;;  %7600 = vmatprep.subr.bf16.mxu0 %v7963_v10 }
 0x40f   :  { %7622 = vmatprep.subr.bf16.mxu1 %v7964_v51 }
 0x411   :  { %7601 = vmatpush3.bf16.msra.mxu0 %v7965_v8 }
 0x412   :  { %7623 = vmatpush3.bf16.msra.mxu1 %v7966_v47  ;;  %7602 = vmatprep.subr.bf16.mxu0 %v7967_v52 }
 0x413   :  { %7624 = vmatprep.subr.bf16.mxu1 %v7968_v45 }
 0x415   :  { %7603 = vmatpush3.bf16.msra.mxu0 %v7969_v31 }
 0x416   :  { %7625 = vmatpush3.bf16.msra.mxu1 %v7970_v46  ;;  %7604 = vmatprep.subr.bf16.mxu0 %v7971_v37 }
 0x417   :  { %7626 = vmatprep.subr.bf16.mxu1 %v7972_v53 }
 0x419   :  { %7605 = vmatpush3.bf16.msra.mxu0 %v7973_v56 }
 0x41a   :  { %7627 = vmatpush3.bf16.msra.mxu1 %v7974_v57  ;;  %7606 = vmatprep.subr.bf16.mxu0 %v7975_v58 }
 0x41b   :  { %7628 = vmatprep.subr.bf16.mxu1 %v7976_v48 }
 0x41d   :  { %7607 = vmatpush3.bf16.msra.mxu0 %v7977_v59 }
 0x41e   :  { %7629 = vmatpush3.bf16.msra.mxu1 %v7978_v60  ;;  %7636 = vmatprep.subr.bf16.mxu0 %v7979_v62 }
 0x41f   :  { %7658 = vmatprep.subr.bf16.mxu1 %v7980_v63 }
 0x49f   :  { %v1976_v61 = vpop.f32.mrf.mxu1 }
 0x4a0   :  { %v1891_v0 = vpop.f32.mrf.mxu0 }
 0x4a1   :  { %v1978_v4 = vpop.f32.mrf.mxu1  ;;  %v1977_v32 = vadd.f32 %v1976_v61, %v1891_v0 }
 0x4a2   :  { %v1893_v6 = vpop.f32.mrf.mxu0 }
 0x4a3   :  { %v1981_v7 = vpop.f32.mrf.mxu1 }
 0x4a4   :  { %v1896_v12 = vpop.f32.mrf.mxu0 }
 0x4a5   :  { %v1983_v13 = vpop.f32.mrf.mxu1  ;;  %v1982_v19 = vadd.f32 %v1981_v7, %v1896_v12 }
 0x4a6   :  { %v1898_v2 = vpop.f32.mrf.mxu0 }
 0x4a7   :  { %v1986_v14 = vpop.f32.mrf.mxu1 }
 0x4a8   :  { %v1901_v15 = vpop.f32.mrf.mxu0 }
 0x4a9   :  { %v1988_v55 = vpop.f32.mrf.mxu1  ;;  %v1987_v9 = vadd.f32 %v1986_v14, %v1901_v15 }
 0x4aa   :  { %v1903_v20 = vpop.f32.mrf.mxu0 }
 0x4ab   :  { %v1991_v16 = vpop.f32.mrf.mxu1 }
 0x4ac   :  { %v1906_v17 = vpop.f32.mrf.mxu0 }
 0x4ad   :  { %v1993_v22 = vpop.f32.mrf.mxu1  ;;  %v1992_v44 = vadd.f32 %v1991_v16, %v1906_v17 }
 0x4ae   :  { %v1908_v23 = vpop.f32.mrf.mxu0 }
 0x4bf   :  { %v7869_v25 = vpop.f32.mrf.mxu1 }
 0x4c0   :  { %v2061_v27 = vpop.f32.mrf.mxu0 }
 0x4c1   :  { %v2146_v28 = vpop.f32.mrf.mxu1  ;;  %v2062_v24 = vadd.f32 %v2061_v27, %v1977_v32  ;;  %v2169_v27 = vld [vmem:[#allocation10 + $0x3] sm:$0x1] }
 0x4c2   :  { %v2063_v21 = vpop.f32.mrf.mxu0 }
 0x4c3   :  { %v7872_v26 = vpop.f32.mrf.mxu1  ;;  %v2147_v39 = vadd.f32 %v2146_v28, %v2062_v24 }
 0x4c4   :  { %v2066_v33 = vpop.f32.mrf.mxu0 }
 0x4c5   :  { %v2067_v54 = vadd.f32 %v2066_v33, %v1982_v19  ;;  %v2156_v42 = vpop.f32.mrf.mxu1  ;;  %v2165_v10 = vsel %vm1639_vm13, %v2147_v39, 0.0  ;;  %v7290_v19 = vld [vmem:[#allocation10 + $0xa] ss:$0 sm:$0xff] }
 0x4c6   :  { %v2068_v30 = vpop.f32.mrf.mxu0 }
 0x4c7   :  { %v2152_v11 = vadd.f32 %v7869_v25, %v2067_v54 }
 0x4c8   :  { %v2071_v34 = vpop.f32.mrf.mxu0 }
 0x4c9   :  { %v2072_v41 = vadd.f32 %v2071_v34, %v1987_v9  ;;  %v2166_v49 = vsel %vm1639_vm13, %v2152_v11, 0.0 }
 0x4ca   :  { %v2073_v43 = vpop.f32.mrf.mxu0  ;;  %v2171_v47 = vadd.f32 %v2166_v49, %v2165_v10 }
 0x4cb   :  { %v2157_v38 = vadd.f32 %v2156_v42, %v2072_v41 }
 0x4cc   :  { %v2076_v50 = vpop.f32.mrf.mxu0 }
 0x4cd   :  { %v2167_v51 = vsel %vm1639_vm13, %v2157_v38, 0.0  ;;  %v2077_v8 = vadd.f32 %v2076_v50, %v1992_v44 }
 0x4ce   :  { %v2078_v52 = vpop.f32.mrf.mxu0  ;;  %v2172_v31 = vadd.f32 %v2171_v47, %v2167_v51 }
 0x4cf   :  { %v2162_v45 = vadd.f32 %v7872_v26, %v2077_v8 }
 0x4d1   :  { %v2168_v46 = vsel %vm1639_vm13, %v2162_v45, 0.0 }
 0x4d2   :  { %v2173_v37 = vadd.f32 %v2172_v31, %v2168_v46 }
 0x4d4   :  { %v2174_v53 = vrot.slane %v2173_v37, 4 }
 0x4d6   :  { %v2175_v56 = vadd.f32 %v2174_v53, %v2173_v37 }
 0x4d8   :  { %v2176_v57 = vrot.slane %v2175_v56, 2 }
 0x4da   :  { %v2177_v58 = vadd.f32 %v2176_v57, %v2175_v56 }
 0x4dc   :  { %v2178_v48 = vrot.slane %v2177_v58, 1 }
 0x4de   :  { %v2179_v59 = vadd.f32 %v2178_v48, %v2177_v58  ;;  %v7981_v58 = vld [vmem:[#allocation7 + $0x138] sm:$0xff]  }
 0x4df   :  { %v7982_v48 = vld [vmem:[#allocation7 + $0x1b8] sm:$0xff]  }
 0x4e0   :  { %v2180_v60 = vmul.f32 0.03125, %v2179_v59 }
 0x4e2   :  { %v2181_v61 = vsub.f32 %v2165_v10, %v2180_v60  ;;  %v2182_v62 = vsub.f32 %v2166_v49, %v2180_v60  ;;  %v2183_v63 = vsub.f32 %v2167_v51, %v2180_v60  ;;  %v2184_v0 = vsub.f32 %v2168_v46, %v2180_v60 }
 0x4e4   :  { %v2185_v4 = vmul.f32 %v2181_v61, %v2181_v61  ;;  %v2186_v6 = vmul.f32 %v2182_v62, %v2182_v62  ;;  %v2187_v7 = vmul.f32 %v2183_v63, %v2183_v63  ;;  %v2188_v13 = vmul.f32 %v2184_v0, %v2184_v0 }
 0x4e6   :  { %v2189_v12 = vadd.f32 %v2186_v6, %v2185_v4 }
 0x4e8   :  { %v2190_v2 = vadd.f32 %v2189_v12, %v2187_v7 }
 0x4ea   :  { %v2191_v14 = vadd.f32 %v2190_v2, %v2188_v13  ;;  %v7985_v2 = vld [vmem:[#allocation7 + $0x130] sm:$0xff]  }
 0x4ec   :  { %v2192_v15 = vrot.slane %v2191_v14, 4 }
 0x4ee   :  { %v2193_v55 = vadd.f32 %v2192_v15, %v2191_v14  ;;  %v7986_v14 = vld [vmem:[#allocation7 + $0x1b0] sm:$0xff]  }
 0x4f0   :  { %v2194_v20 = vrot.slane %v2193_v55, 2 }
 0x4f2   :  { %v2195_v16 = vadd.f32 %v2194_v20, %v2193_v55  ;;  %v7987_v55 = vld [vmem:[#allocation7 + $0x168] sm:$0xff]  }
 0x4f3   :  { %v7988_v20 = vld [vmem:[#allocation7 + $0x1e8] sm:$0xff]  }
 0x4f4   :  { %v2196_v17 = vrot.slane %v2195_v16, 1 }
 0x4f6   :  { %v2197_v22 = vadd.f32 %v2196_v17, %v2195_v16 }
 0x4f8   :  { %v2198_v23 = vmul.f32 0.03125, %v2197_v22 }
 0x4fa   :  { %v2199_v25 = vadd.f32 1e-05, %v2198_v23 }
 0x4fc   :  { %8081 = vrsqrt.f32 %v2199_v25 }
 0x509   :  { %v8082_v28 = vpop.eup %8081 }
 0x50a   :  { %v2201_v21 = vmul.f32 %v8082_v28, %v2169_v27 }
 0x50c   :  { %v2205_v32 = vrot.slane %v2201_v21, %v8499_v29  ;;  %v7989_v21 = vld [vmem:[#allocation7 + $0x128] sm:$0xff]  }
 0x50e   :  { %v2206_v33 = vmul.f32 %v2205_v32, %v2181_v61  ;;  %v2207_v24 = vmul.f32 %v2205_v32, %v2182_v62  ;;  %v2208_v54 = vmul.f32 %v2205_v32, %v2183_v63  ;;  %v2209_v26 = vmul.f32 %v2205_v32, %v2184_v0  ;;  %v7983_v62 = vld [vmem:[#allocation7 + $0x170] sm:$0xff]   ;;  %v7990_v32 = vld [vmem:[#allocation7 + $0x1a8] sm:$0xff]  }
 0x50f   :  { %v7984_v0 = vld [vmem:[#allocation7 + $0x1f0] sm:$0xff]  }
 0x510   :  { %v2214_v30 = vadd.f32 %v7290_v19, %v2206_v33  ;;  %v2215_v9 = vadd.f32 %v7290_v19, %v2207_v24  ;;  %v2216_v11 = vadd.f32 %v7290_v19, %v2208_v54  ;;  %v2217_v34 = vadd.f32 %v7290_v19, %v2209_v26  ;;  %v7991_v26 = vld [vmem:[#allocation7 + $0x160] sm:$0xff]  }
 0x512   :  { %v8846_v39 = vmax.f32 %v2214_v30, 0.0  ;;  %v8848_v41 = vmax.f32 %v2216_v11, 0.0  ;;  %v8850_v42 = vmax.f32 %v2215_v9, 0.0  ;;  %v8852_v43 = vmax.f32 %v2217_v34, 0.0  ;;  %v7992_v30 = vld [vmem:[#allocation7 + $0x1e0] sm:$0xff]  }
 0x514   :  { %v2228_v44 = vrot.slane %v8846_v39, 1  ;;  %v2235_v49 = vrot.slane %v8846_v39, 3  ;;  %v2236_v38 = vrot.slane %v8848_v41, 2  ;;  %v2224_v50 = vrot.slane %v8848_v41, 7 }
 0x515   :  { %v2231_v10 = vrot.slane %v8846_v39, 2  ;;  %v2232_v51 = vrot.slane %v8848_v41, 1  ;;  %v2243_v8 = vrot.slane %v8846_v39, 5  ;;  %v2244_v47 = vrot.slane %v8848_v41, 4 }
 0x516   :  { %v2229_v52 = vsel %vm2225_vm14, %v8848_v41, %v2228_v44  ;;  %v2237_v45 = vsel %vm2225_vm14, %v2236_v38, %v2235_v49  ;;  %v2226_v31 = vsel %vm2225_vm14, %v2224_v50, %v8846_v39  ;;  %v2251_v46 = vrot.slane %v8846_v39, 7  ;;  %v7993_v50 = vld [vmem:[#allocation7 + $0x120] sm:$0xff]  }
 0x517   :  { %v2288_v37 = vpack.c.bf16 %v2229_v52, %v2229_v52  ;;  %v2290_v53 = vpack.c.bf16 %v2237_v45, %v2237_v45  ;;  %v2287_v56 = vpack.c.bf16 %v2226_v31, %v2226_v31  ;;  %v2233_v57 = vsel %vm2225_vm14, %v2232_v51, %v2231_v10  ;;  %v7994_v10 = vld [vmem:[#allocation7 + $0x1a0] sm:$0xff]   ;;  %v7998_v52 = vld [vmem:[#allocation7 + $0x198] sm:$0xff]   ;;  %v8000_v45 = vld [vmem:[#allocation7 + $0x1d0] sm:$0xff]  }
 0x518   :  { %v2289_v59 = vpack.c.bf16 %v2233_v57, %v2233_v57  ;;  %v2245_v60 = vsel %vm2225_vm14, %v2244_v47, %v2243_v8  ;;  %v2252_v61 = vrot.slane %v8848_v41, 6  ;;  %v2260_v6 = vrot.slane %v8850_v42, 1  ;;  %v7995_v8 = vld [vmem:[#allocation7 + $0x158] sm:$0xff]   ;;  %v8001_v31 = vld [vmem:[#allocation7 + $0x110] sm:$0xff]   ;;  %v8006_v57 = vld [vmem:[#allocation7 + $0x188] sm:$0xff]  }
 0x519   :  { %3364 = vmatprep.mubr.bf16.mxu0 %v2288_v37  ;;  %3404 = vmatprep.mubr.bf16.mxu1 %v2290_v53  ;;  %v2292_v63 = vpack.c.bf16 %v2245_v60, %v2245_v60  ;;  %v2267_v7 = vrot.slane %v8850_v42, 3  ;;  %v2268_v12 = vrot.slane %v8852_v43, 2  ;;  %v2257_v15 = vrot.slane %v8852_v43, 7  ;;  %v7996_v47 = vld [vmem:[#allocation7 + $0x1d8] sm:$0xff]   ;;  %v8003_v37 = vld [vmem:[#allocation7 + $0x148] sm:$0xff]  }
 0x51a   :  { %3365 = vmatmul.mubr.bf16.vlgmr.msra.gmra.mxu0 %v2287_v56  ;;  %3405 = vmatmul.mubr.bf16.vlgmr.msra.gmra.mxu1 %v2289_v59  ;;  %v2253_v4 = vsel %vm2225_vm14, %v2252_v61, %v2251_v46  ;;  %v8878_v16 = vsel %vm2225_vm14, %v8852_v43, %v2260_v6  ;;  %v2263_v17 = vrot.slane %v8850_v42, 2  ;;  %v2264_v25 = vrot.slane %v8852_v43, 1  ;;  %v8002_v46 = vld [vmem:[#allocation7 + $0x190] sm:$0xff]   ;;  %v8004_v53 = vld [vmem:[#allocation7 + $0x1c8] sm:$0xff]   ;;  %v8012_v6 = vld [vmem:[#allocation7 + $0x2f8] sm:$0xff]  }
 0x51b   :  { %7637 = vmatpush3.bf16.msra.mxu0 %v7981_v58  ;;  %7659 = vmatpush3.bf16.msra.mxu1 %v7982_v48  ;;  %v2294_v13 = vpack.c.bf16 %v2253_v4, %v2253_v4  ;;  %v8882_v22 = vsel %vm2225_vm14, %v2268_v12, %v2267_v7  ;;  %v8886_v23 = vsel %vm2225_vm14, %v2257_v15, %v8850_v42  ;;  %v2275_v27 = vrot.slane %v8850_v42, 5  ;;  %v8005_v56 = vld [vmem:[#allocation7 + $0x108] sm:$0xff]   ;;  %v8007_v58 = vld [vmem:[#allocation7 + $0x140] sm:$0xff]   ;;  %v8011_v4 = vld [vmem:[#allocation7 + $0x278] sm:$0xff]  }
 0x51c   :  { %3444 = vmatprep.mubr.bf16.mxu0 %v2292_v63  ;;  %7638 = vmatprep.subr.bf16.mxu0 %v7983_v62  ;;  %v2276_v28 = vrot.slane %v8852_v43, 4  ;;  %v8892_v19 = vsel %vm2225_vm14, %v2264_v25, %v2263_v17  ;;  %v2283_v33 = vrot.slane %v8850_v42, 7  ;;  %v2284_v24 = vrot.slane %v8852_v43, 6  ;;  %v8008_v48 = vld [vmem:[#allocation7 + $0x1c0] sm:$0xff]   ;;  %v8015_v15 = vld [vmem:[#allocation7 + $0x270] sm:$0xff]  }
 0x51d   :  { %3484 = vmatprep.mubr.bf16.mxu1 %v2294_v13  ;;  %7660 = vmatprep.subr.bf16.mxu1 %v7984_v0  ;;  %v2271_v54 = vrot.slane %v8850_v42, 4  ;;  %v2272_v11 = vrot.slane %v8852_v43, 3  ;;  %v2279_v34 = vrot.slane %v8850_v42, 6  ;;  %v2280_v49 = vrot.slane %v8852_v43, 5  ;;  %v7997_v42 = vld [vmem:[#allocation7 + $0x118] sm:$0xff]   ;;  %v7999_v43 = vld [vmem:[#allocation7 + $0x150] sm:$0xff]  }
 0x51e   :  { %v8898_v9 = vsel %vm2225_vm14, %v2276_v28, %v2275_v27  ;;  %v8903_v44 = vsel %vm2225_vm14, %v2284_v24, %v2283_v33  ;;  %v2239_v59 = vrot.slane %v8846_v39, 4  ;;  %v2240_v60 = vrot.slane %v8848_v41, 3  ;;  %v8009_v63 = vld [vmem:[#allocation7 + $0x100] sm:$0xff]   ;;  %v8013_v13 = vld [vmem:[#allocation7 + $0x238] sm:$0xff]   ;;  %v8017_v17 = vld [vmem:[#allocation7 + $0x230] sm:$0xff]  }
 0x51f   :  { %7639 = vmatpush3.bf16.msra.mxu0 %v7985_v2  ;;  %7661 = vmatpush3.bf16.msra.mxu1 %v7986_v14  ;;  %v8907_v38 = vsel %vm2225_vm14, %v2272_v11, %v2271_v54  ;;  %v8910_v51 = vsel %vm2225_vm14, %v2280_v49, %v2279_v34  ;;  %v2247_v61 = vrot.slane %v8846_v39, 6  ;;  %v2248_v62 = vrot.slane %v8848_v41, 5  ;;  %v8010_v0 = vld [vmem:[#allocation7 + $0x180] sm:$0xff]   ;;  %v8014_v39 = vld [vmem:[#allocation7 + $0x2b8] sm:$0xff]   ;;  %v8018_v25 = vld [vmem:[#allocation7 + $0x2b0] sm:$0xff]  }
 0x520   :  { %7640 = vmatprep.subr.bf16.mxu0 %v7987_v55  ;;  %7662 = vmatprep.subr.bf16.mxu1 %v7988_v20  ;;  %v2241_v7 = vsel %vm2225_vm14, %v2240_v60, %v2239_v59  ;;  %v2296_v41 = vpack.c.bf16 %v8878_v16, %v8878_v16  ;;  %v8016_v55 = vld [vmem:[#allocation7 + $0x2f0] sm:$0xff]   ;;  %v2298_v20 = vpack.c.bf16 %v8882_v22, %v8882_v22  ;;  %v8019_v27 = vld [vmem:[#allocation7 + $0x268] sm:$0xff]   ;;  %v8024_v33 = vld [vmem:[#allocation7 + $0x2e0] sm:$0xff]  }
 0x521   :  { %v2249_v12 = vsel %vm2225_vm14, %v2248_v62, %v2247_v61  ;;  %v2291_v2 = vpack.c.bf16 %v2241_v7, %v2241_v7  ;;  %v8020_v28 = vld [vmem:[#allocation7 + $0x2e8] sm:$0xff]   ;;  %v8025_v22 = vld [vmem:[#allocation7 + $0x220] sm:$0xff]   ;;  %v8027_v54 = vld [vmem:[#allocation7 + $0x258] sm:$0xff]   ;;  %v2300_v60 = vpack.c.bf16 %v8898_v9, %v8898_v9  ;;  %v2302_v62 = vpack.c.bf16 %v8903_v44, %v8903_v44 }
 0x522   :  { %v2293_v14 = vpack.c.bf16 %v2249_v12, %v2249_v12  ;;  %v8022_v16 = vld [vmem:[#allocation7 + $0x2a8] sm:$0xff]   ;;  %v8026_v24 = vld [vmem:[#allocation7 + $0x2a0] sm:$0xff]   ;;  %v8030_v11 = vld [vmem:[#allocation7 + $0x298] sm:$0xff]  }
 0x523   :  { %7641 = vmatpush3.bf16.msra.mxu0 %v7989_v21  ;;  %7663 = vmatpush3.bf16.msra.mxu1 %v7990_v32  ;;  %v8021_v21 = vld [vmem:[#allocation7 + $0x228] sm:$0xff]   ;;  %v8023_v32 = vld [vmem:[#allocation7 + $0x260] sm:$0xff]   ;;  %v8031_v34 = vld [vmem:[#allocation7 + $0x250] sm:$0xff]  }
 0x524   :  { %7642 = vmatprep.subr.bf16.mxu0 %v7991_v26  ;;  %7664 = vmatprep.subr.bf16.mxu1 %v7992_v30  ;;  %v8028_v26 = vld [vmem:[#allocation7 + $0x2d8] sm:$0xff]   ;;  %v8032_v49 = vld [vmem:[#allocation7 + $0x2d0] sm:$0xff]   ;;  %v8054_v9 = vld [vmem:[#allocation7 + $0x3a8] sm:$0xff]  }
 0x525   :  { %v8029_v30 = vld [vmem:[#allocation7 + $0x218] sm:$0xff]   ;;  %v8047_v59 = vld [vmem:[#allocation7 + $0x370] sm:$0xff]   ;;  %v8056_v7 = vld [vmem:[#allocation7 + $0x3e0] sm:$0xff]  }
 0x526   :  { %v8048_v61 = vld [vmem:[#allocation7 + $0x3f0] sm:$0xff]   ;;  %v8057_v12 = vld [vmem:[#allocation7 + $0x320] sm:$0xff]  }
 0x527   :  { %7643 = vmatpush3.bf16.msra.mxu0 %v7993_v50  ;;  %7665 = vmatpush3.bf16.msra.mxu1 %v7994_v10  ;;  %v8033_v50 = vld [vmem:[#allocation7 + $0x210] sm:$0xff]   ;;  %v8058_v44 = vld [vmem:[#allocation7 + $0x3a0] sm:$0xff]  }
 0x528   :  { %7644 = vmatprep.subr.bf16.mxu0 %v7995_v8  ;;  %7666 = vmatprep.subr.bf16.mxu1 %v7996_v47  ;;  %v8034_v10 = vld [vmem:[#allocation7 + $0x290] sm:$0xff]   ;;  %v8035_v8 = vld [vmem:[#allocation7 + $0x248] sm:$0xff]  }
 0x529   :  { %v8036_v47 = vld [vmem:[#allocation7 + $0x2c8] sm:$0xff]  }
 0x52b   :  { %7645 = vmatpush3.bf16.msra.mxu0 %v7997_v42  ;;  %7667 = vmatpush3.bf16.msra.mxu1 %v7998_v52  ;;  %v8037_v42 = vld [vmem:[#allocation7 + $0x208] sm:$0xff]  }
 0x52c   :  { %7646 = vmatprep.subr.bf16.mxu0 %v7999_v43  ;;  %7668 = vmatprep.subr.bf16.mxu1 %v8000_v45  ;;  %v8038_v52 = vld [vmem:[#allocation7 + $0x288] sm:$0xff]   ;;  %v8039_v43 = vld [vmem:[#allocation7 + $0x240] sm:$0xff]  }
 0x52d   :  { %v8040_v45 = vld [vmem:[#allocation7 + $0x2c0] sm:$0xff]  }
 0x52f   :  { %7647 = vmatpush3.bf16.msra.mxu0 %v8001_v31  ;;  %7669 = vmatpush3.bf16.msra.mxu1 %v8002_v46  ;;  %v8041_v31 = vld [vmem:[#allocation7 + $0x200] sm:$0xff]  }
 0x530   :  { %7648 = vmatprep.subr.bf16.mxu0 %v8003_v37  ;;  %7670 = vmatprep.subr.bf16.mxu1 %v8004_v53  ;;  %v8042_v46 = vld [vmem:[#allocation7 + $0x280] sm:$0xff]   ;;  %v8043_v37 = vld [vmem:[#allocation7 + $0x378] sm:$0xff]  }
 0x531   :  { %v8044_v53 = vld [vmem:[#allocation7 + $0x3f8] sm:$0xff]  }
 0x533   :  { %7649 = vmatpush3.bf16.msra.mxu0 %v8005_v56  ;;  %7671 = vmatpush3.bf16.msra.mxu1 %v8006_v57  ;;  %v8045_v56 = vld [vmem:[#allocation7 + $0x338] sm:$0xff]   ;;  %v2295_v57 = vpack.c.bf16 %v8886_v23, %v8886_v23  ;;  %v8050_v23 = vld [vmem:[#allocation7 + $0x3b0] sm:$0xff]  }
 0x534   :  { %7650 = vmatprep.subr.bf16.mxu0 %v8007_v58  ;;  %7672 = vmatprep.subr.bf16.mxu1 %v8008_v48  ;;  %v8046_v58 = vld [vmem:[#allocation7 + $0x3b8] sm:$0xff]   ;;  %v2297_v48 = vpack.c.bf16 %v8892_v19, %v8892_v19  ;;  %v8052_v19 = vld [vmem:[#allocation7 + $0x3e8] sm:$0xff]  }
 0x537   :  { %7651 = vmatpush3.bf16.msra.mxu0 %v8009_v63  ;;  %7673 = vmatpush3.bf16.msra.mxu1 %v8010_v0  ;;  %v8049_v63 = vld [vmem:[#allocation7 + $0x330] sm:$0xff]   ;;  %v8051_v0 = vld [vmem:[#allocation7 + $0x368] sm:$0xff]  }
 0x538   :  { %7680 = vmatprep.subr.bf16.mxu0 %v8011_v4  ;;  %7702 = vmatprep.subr.bf16.mxu1 %v8012_v6  ;;  %v8053_v4 = vld [vmem:[#allocation7 + $0x328] sm:$0xff]   ;;  %v8055_v6 = vld [vmem:[#allocation7 + $0x360] sm:$0xff]  }
 0x53a   :  { %3445 = vmatmul.mubr.bf16.vlgmr.msra.gmra.mxu0 %v2291_v2  ;;  %3485 = vmatmul.mubr.bf16.vlgmr.msra.gmra.mxu1 %v2293_v14  ;;  %v8060_v2 = vld [vmem:[#allocation7 + $0x3d8] sm:$0xff]  }
 0x53b   :  { %7681 = vmatpush3.bf16.msra.mxu0 %v8013_v13  ;;  %3524 = vmatprep.mubr.bf16.mxu0 %v2296_v41  ;;  %v8059_v13 = vld [vmem:[#allocation7 + $0x358] sm:$0xff]   ;;  %v8063_v41 = vld [vmem:[#allocation7 + $0x350] sm:$0xff]  }
 0x53c   :  { %7703 = vmatpush3.bf16.msra.mxu1 %v8014_v39  ;;  %3564 = vmatprep.mubr.bf16.mxu1 %v2298_v20  ;;  %v8061_v14 = vld [vmem:[#allocation7 + $0x318] sm:$0xff]   ;;  %v8066_v20 = vld [vmem:[#allocation7 + $0x390] sm:$0xff]  }
 0x53d   :  { %7682 = vmatprep.subr.bf16.mxu0 %v8015_v15  ;;  %7704 = vmatprep.subr.bf16.mxu1 %v8016_v55  ;;  %v8062_v39 = vld [vmem:[#allocation7 + $0x398] sm:$0xff]   ;;  %v8064_v15 = vld [vmem:[#allocation7 + $0x3d0] sm:$0xff]  }
 0x53e   :  { %v8065_v55 = vld [vmem:[#allocation7 + $0x310] sm:$0xff]  }
 0x53f   :  { %7683 = vmatpush3.bf16.msra.mxu0 %v8017_v17  ;;  %v8067_v17 = vld [vmem:[#allocation7 + $0x348] sm:$0xff]  }
 0x540   :  { %7705 = vmatpush3.bf16.msra.mxu1 %v8018_v25  ;;  %7684 = vmatprep.subr.bf16.mxu0 %v8019_v27  ;;  %v8068_v25 = vld [vmem:[#allocation7 + $0x3c8] sm:$0xff]  }
 0x541   :  { %7706 = vmatprep.subr.bf16.mxu1 %v8020_v28  ;;  %v8069_v27 = vld [vmem:[#allocation7 + $0x308] sm:$0xff]  }
 0x542   :  { %v8070_v28 = vld [vmem:[#allocation7 + $0x388] sm:$0xff]  }
 0x543   :  { %7685 = vmatpush3.bf16.msra.mxu0 %v8021_v21  ;;  %v8071_v21 = vld [vmem:[#allocation7 + $0x340] sm:$0xff]  }
 0x544   :  { %7707 = vmatpush3.bf16.msra.mxu1 %v8022_v16  ;;  %7686 = vmatprep.subr.bf16.mxu0 %v8023_v32  ;;  %v8072_v16 = vld [vmem:[#allocation7 + $0x3c0] sm:$0xff]  }
 0x545   :  { %7708 = vmatprep.subr.bf16.mxu1 %v8024_v33  ;;  %v8073_v32 = vld [vmem:[#allocation7 + $0x300] sm:$0xff]  }
 0x546   :  { %v8074_v33 = vld [vmem:[#allocation7 + $0x380] sm:$0xff]  }
 0x547   :  { %7687 = vmatpush3.bf16.msra.mxu0 %v8025_v22  ;;  %v2299_v22 = vpack.c.bf16 %v8907_v38, %v8907_v38 }
 0x548   :  { %7709 = vmatpush3.bf16.msra.mxu1 %v8026_v24  ;;  %7688 = vmatprep.subr.bf16.mxu0 %v8027_v54  ;;  %v2301_v24 = vpack.c.bf16 %v8910_v51, %v8910_v51  ;;  %v3765_v54 = vld [vmem:[#allocation8 + $0x380] sm:$0xff]  ;;  %v3734_v51 = vld [vmem:[#allocation8 + $0x288] sm:$0xff] }
 0x549   :  { %7710 = vmatprep.subr.bf16.mxu1 %v8028_v26  ;;  %v3773_v26 = vld [vmem:[#allocation8 + $0x3c0] sm:$0xff] }
 0x54b   :  { %7689 = vmatpush3.bf16.msra.mxu0 %v8029_v30  ;;  %v3766_v30 = vld [vmem:[#allocation8 + $0x388] sm:$0xff] }
 0x54c   :  { %7711 = vmatpush3.bf16.msra.mxu1 %v8030_v11  ;;  %7690 = vmatprep.subr.bf16.mxu0 %v8031_v34  ;;  %v7532_v11 = vcombine.low %v3765_v54, %v3773_v26  ;;  %v7533_v34 = vcombine.high %v3765_v54, %v3773_v26  ;;  %v8230_v54 = vmov 0  }
 0x54d   :  { %7712 = vmatprep.subr.bf16.mxu1 %v8032_v49  ;;  %v3774_v49 = vld [vmem:[#allocation8 + $0x3c8] sm:$0xff] }
 0x54f   :  { %7691 = vmatpush3.bf16.msra.mxu0 %v8033_v50  ;;  %v3749_v50 = vld [vmem:[#allocation8 + $0x300] sm:$0xff] }
 0x550   :  { %7713 = vmatpush3.bf16.msra.mxu1 %v8034_v10  ;;  %7692 = vmatprep.subr.bf16.mxu0 %v8035_v8  ;;  %v3757_v10 = vld [vmem:[#allocation8 + $0x340] sm:$0xff]  ;;  %v7534_v8 = vcombine.low %v3766_v30, %v3774_v49 }
 0x551   :  { %7714 = vmatprep.subr.bf16.mxu1 %v8036_v47  ;;  %v7535_v47 = vcombine.high %v3766_v30, %v3774_v49  ;;  %v3662_v49 = vld [vmem:[#allocation8 + $0x48] sm:$0xff] }
 0x553   :  { %7693 = vmatpush3.bf16.msra.mxu0 %v8037_v42  ;;  %v7517_v42 = vcombine.high %v3749_v50, %v3757_v10 }
 0x554   :  { %7715 = vmatpush3.bf16.msra.mxu1 %v8038_v52  ;;  %7694 = vmatprep.subr.bf16.mxu0 %v8039_v43  ;;  %v3750_v52 = vld [vmem:[#allocation8 + $0x308] sm:$0xff] }
 0x555   :  { %7716 = vmatprep.subr.bf16.mxu1 %v8040_v45  ;;  %v3758_v43 = vld [vmem:[#allocation8 + $0x348] sm:$0xff]  ;;  %v3733_v45 = vld [vmem:[#allocation8 + $0x280] sm:$0xff] }
 0x556   :  { %v7519_v38 = vcombine.high %v3750_v52, %v3758_v43 }
 0x557   :  { %7695 = vmatpush3.bf16.msra.mxu0 %v8041_v31  ;;  %v3741_v31 = vld [vmem:[#allocation8 + $0x2c0] sm:$0xff] }
 0x558   :  { %7717 = vmatpush3.bf16.msra.mxu1 %v8042_v46  ;;  %7724 = vmatprep.subr.bf16.mxu0 %v8043_v37  ;;  %v3742_v46 = vld [vmem:[#allocation8 + $0x2c8] sm:$0xff]  ;;  %v7516_v37 = vcombine.low %v3749_v50, %v3757_v10  ;;  %v8936_v50 = vld [vmem:[#allocation8 + $0x390] sm:$0xff] }
 0x559   :  { %7746 = vmatprep.subr.bf16.mxu1 %v8044_v53  ;;  %v7518_v53 = vcombine.low %v3750_v52, %v3758_v43 }
 0x55a   :  { %3525 = vmatmul.mubr.bf16.vlgmr.msra.gmra.mxu0 %v2295_v57  ;;  %v7503_v57 = vcombine.high %v3734_v51, %v3742_v46 }
 0x55b   :  { %3565 = vmatmul.mubr.bf16.vlgmr.msra.gmra.mxu1 %v2297_v48  ;;  %7725 = vmatpush3.bf16.msra.mxu0 %v8045_v56  ;;  %v7501_v56 = vcombine.high %v3733_v45, %v3741_v31  ;;  %v3725_v48 = vld [vmem:[#allocation8 + $0x240] sm:$0xff] }
 0x55c   :  { %3604 = vmatprep.mubr.bf16.mxu0 %v2300_v60  ;;  %7747 = vmatpush3.bf16.msra.mxu1 %v8046_v58  ;;  %v3717_v58 = vld [vmem:[#allocation8 + $0x200] sm:$0xff]  ;;  %v3726_v60 = vld [vmem:[#allocation8 + $0x248] sm:$0xff] }
 0x55d   :  { %3644 = vmatprep.mubr.bf16.mxu1 %v2302_v62  ;;  %7726 = vmatprep.subr.bf16.mxu0 %v8047_v59  ;;  %v3718_v59 = vld [vmem:[#allocation8 + $0x208] sm:$0xff]  ;;  %v7502_v62 = vcombine.low %v3734_v51, %v3742_v46 }
 0x55e   :  { %7748 = vmatprep.subr.bf16.mxu1 %v8048_v61  ;;  %v7500_v61 = vcombine.low %v3733_v45, %v3741_v31 }
 0x55f   :  { %7727 = vmatpush3.bf16.msra.mxu0 %v8049_v63  ;;  %v7485_v63 = vcombine.high %v3717_v58, %v3725_v48 }
 0x560   :  { %7749 = vmatpush3.bf16.msra.mxu1 %v8050_v23  ;;  %7728 = vmatprep.subr.bf16.mxu0 %v8051_v0  ;;  %v7487_v23 = vcombine.high %v3718_v59, %v3726_v60  ;;  %v3701_v0 = vld [vmem:[#allocation8 + $0x180] sm:$0xff] }
 0x561   :  { %7750 = vmatprep.subr.bf16.mxu1 %v8052_v19  ;;  %v3709_v19 = vld [vmem:[#allocation8 + $0x1c0] sm:$0xff] }
 0x563   :  { %7729 = vmatpush3.bf16.msra.mxu0 %v8053_v4  ;;  %v3702_v4 = vld [vmem:[#allocation8 + $0x188] sm:$0xff] }
 0x564   :  { %7751 = vmatpush3.bf16.msra.mxu1 %v8054_v9  ;;  %7730 = vmatprep.subr.bf16.mxu0 %v8055_v6  ;;  %v3710_v9 = vld [vmem:[#allocation8 + $0x1c8] sm:$0xff]  ;;  %v7484_v6 = vcombine.low %v3717_v58, %v3725_v48 }
 0x565   :  { %7752 = vmatprep.subr.bf16.mxu1 %v8056_v7  ;;  %v7486_v7 = vcombine.low %v3718_v59, %v3726_v60 }
 0x567   :  { %7731 = vmatpush3.bf16.msra.mxu0 %v8057_v12  ;;  %v7469_v12 = vcombine.high %v3701_v0, %v3709_v19 }
 0x568   :  { %7753 = vmatpush3.bf16.msra.mxu1 %v8058_v44  ;;  %7732 = vmatprep.subr.bf16.mxu0 %v8059_v13  ;;  %v7471_v44 = vcombine.high %v3702_v4, %v3710_v9  ;;  %v3685_v13 = vld [vmem:[#allocation8 + $0x100] sm:$0xff] }
 0x569   :  { %7754 = vmatprep.subr.bf16.mxu1 %v8060_v2  ;;  %v3693_v2 = vld [vmem:[#allocation8 + $0x140] sm:$0xff] }
 0x56b   :  { %7733 = vmatpush3.bf16.msra.mxu0 %v8061_v14  ;;  %v3686_v14 = vld [vmem:[#allocation8 + $0x108] sm:$0xff] }
 0x56c   :  { %7755 = vmatpush3.bf16.msra.mxu1 %v8062_v39  ;;  %7734 = vmatprep.subr.bf16.mxu0 %v8063_v41  ;;  %v3694_v39 = vld [vmem:[#allocation8 + $0x148] sm:$0xff]  ;;  %v7468_v41 = vcombine.low %v3701_v0, %v3709_v19 }
 0x56d   :  { %7756 = vmatprep.subr.bf16.mxu1 %v8064_v15  ;;  %v7470_v15 = vcombine.low %v3702_v4, %v3710_v9 }
 0x56f   :  { %7735 = vmatpush3.bf16.msra.mxu0 %v8065_v55  ;;  %v7453_v55 = vcombine.high %v3685_v13, %v3693_v2 }
 0x570   :  { %7757 = vmatpush3.bf16.msra.mxu1 %v8066_v20  ;;  %7736 = vmatprep.subr.bf16.mxu0 %v8067_v17  ;;  %v7455_v20 = vcombine.high %v3686_v14, %v3694_v39  ;;  %v7452_v17 = vcombine.low %v3685_v13, %v3693_v2 }
 0x571   :  { %7758 = vmatprep.subr.bf16.mxu1 %v8068_v25  ;;  %v7454_v25 = vcombine.low %v3686_v14, %v3694_v39 }
 0x573   :  { %7737 = vmatpush3.bf16.msra.mxu0 %v8069_v27  ;;  %v3669_v27 = vld [vmem:[#allocation8 + $0x80] sm:$0xff] }
 0x574   :  { %7759 = vmatpush3.bf16.msra.mxu1 %v8070_v28  ;;  %7738 = vmatprep.subr.bf16.mxu0 %v8071_v21  ;;  %v3677_v28 = vld [vmem:[#allocation8 + $0xc0] sm:$0xff]  ;;  %v3670_v21 = vld [vmem:[#allocation8 + $0x88] sm:$0xff] }
 0x575   :  { %7760 = vmatprep.subr.bf16.mxu1 %v8072_v16  ;;  %v7436_v16 = vcombine.low %v3669_v27, %v3677_v28 }
 0x577   :  { %7739 = vmatpush3.bf16.msra.mxu0 %v8073_v32  ;;  %v7437_v32 = vcombine.high %v3669_v27, %v3677_v28 }
 0x578   :  { %7761 = vmatpush3.bf16.msra.mxu1 %v8074_v33  ;;  %4421 = vmatprep.subr.bf16.mxu0 %v7533_v34  ;;  %v3678_v33 = vld [vmem:[#allocation8 + $0xc8] sm:$0xff] }
 0x579   :  { %4462 = vmatprep.subr.bf16.mxu1 %v7535_v47  ;;  %v7438_v26 = vcombine.low %v3670_v21, %v3678_v33  ;;  %v7439_v30 = vcombine.high %v3670_v21, %v3678_v33  ;;  %v3654_v34 = vld [vmem:[#allocation8 + $0x8] sm:$0xff]  ;;  %v8940_v47 = vld [vmem:[#allocation8 + $0x398] sm:$0xff] }
 0x57a   :  { %3605 = vmatmul.mubr.bf16.vlgmr.msra.gmra.mxu0 %v2299_v22  ;;  %v3653_v22 = vld [vmem:[#allocation8] sm:$0xff]  ;;  %v7423_v10 = vcombine.high %v3654_v34, %v3662_v49 }
 0x57b   :  { %3645 = vmatmul.mubr.bf16.vlgmr.msra.gmra.mxu1 %v2301_v24  ;;  %4422 = vmatpush1.bf16.msra.mxu0 %v7532_v11  ;;  %v3661_v24 = vld [vmem:[#allocation8 + $0x40] sm:$0xff] }
 0x57c   :  { %4463 = vmatpush1.bf16.msra.mxu1 %v7534_v8  ;;  %4423 = vmatprep.subr.bf16.mxu0 %v7517_v42  ;;  %v7421_v11 = vcombine.high %v3653_v22, %v3661_v24  ;;  %v8938_v8 = vld [vmem:[#allocation8 + $0x3d0] sm:$0xff]  ;;  %v8942_v42 = vld [vmem:[#allocation8 + $0x3d8] sm:$0xff]  ;;  %v7420_v52 = vcombine.low %v3653_v22, %v3661_v24 }
 0x57d   :  { %4464 = vmatprep.subr.bf16.mxu1 %v7519_v38  ;;  %4453 = vmatprep.mubr.bf16.mxu0 %v8230_v54  ;;  %v7536_v43 = vcombine.low %v8936_v50, %v8938_v8  ;;  %v7538_v45 = vcombine.low %v8940_v47, %v8942_v42  ;;  %v7422_v38 = vcombine.low %v3654_v34, %v3662_v49 }
 0x57e   :  { %4494 = vmatprep.mubr.bf16.mxu1 %v8230_v54  ;;  %v7537_v31 = vcombine.high %v8936_v50, %v8938_v8  ;;  %v7539_v51 = vcombine.high %v8940_v47, %v8942_v42 }
 0x57f   :  { %4424 = vmatpush1.bf16.msra.mxu0 %v7516_v37 }
 0x580   :  { %4465 = vmatpush1.bf16.msra.mxu1 %v7518_v53  ;;  %4425 = vmatprep.subr.bf16.mxu0 %v7501_v56  ;;  %v7291_v53 = vld [vmem:[#allocation10 + $0xe] ss:$0 sm:$0xff] }
 0x581   :  { %4466 = vmatprep.subr.bf16.mxu1 %v7503_v57 }
 0x583   :  { %4426 = vmatpush1.bf16.msra.mxu0 %v7500_v61 }
 0x584   :  { %4467 = vmatpush1.bf16.msra.mxu1 %v7502_v62  ;;  %4427 = vmatprep.subr.bf16.mxu0 %v7485_v63 }
 0x585   :  { %4468 = vmatprep.subr.bf16.mxu1 %v7487_v23 }
 0x587   :  { %4428 = vmatpush1.bf16.msra.mxu0 %v7484_v6 }
 0x588   :  { %4469 = vmatpush1.bf16.msra.mxu1 %v7486_v7  ;;  %4429 = vmatprep.subr.bf16.mxu0 %v7469_v12 }
 0x589   :  { %4470 = vmatprep.subr.bf16.mxu1 %v7471_v44 }
 0x58b   :  { %4430 = vmatpush1.bf16.msra.mxu0 %v7468_v41 }
 0x58c   :  { %4471 = vmatpush1.bf16.msra.mxu1 %v7470_v15  ;;  %4431 = vmatprep.subr.bf16.mxu0 %v7453_v55 }
 0x58d   :  { %4472 = vmatprep.subr.bf16.mxu1 %v7455_v20 }
 0x58f   :  { %4432 = vmatpush1.bf16.msra.mxu0 %v7452_v17 }
 0x590   :  { %4473 = vmatpush1.bf16.msra.mxu1 %v7454_v25  ;;  %4433 = vmatprep.subr.bf16.mxu0 %v7437_v32 }
 0x591   :  { %4474 = vmatprep.subr.bf16.mxu1 %v7439_v30 }
 0x593   :  { %4434 = vmatpush1.bf16.msra.mxu0 %v7436_v16 }
 0x594   :  { %4475 = vmatpush1.bf16.msra.mxu1 %v7438_v26  ;;  %4435 = vmatprep.subr.bf16.mxu0 %v7421_v11 }
 0x595   :  { %4476 = vmatprep.subr.bf16.mxu1 %v7423_v10 }
 0x597   :  { %4436 = vmatpush1.bf16.msra.mxu0 %v7420_v52 }
 0x598   :  { %4477 = vmatpush1.bf16.msra.mxu1 %v7422_v38  ;;  %4503 = vmatprep.subr.bf16.mxu0 %v7537_v31  ;;  %v3751_v38 = vld [vmem:[#allocation8 + $0x310] sm:$0xff] }
 0x599   :  { %4544 = vmatprep.subr.bf16.mxu1 %v7539_v51  ;;  %v3759_v51 = vld [vmem:[#allocation8 + $0x350] sm:$0xff] }
 0x5da   :  { %v7608_v46 = vpop.f32.mrf.mxu0  ;;  %v7630_v37 = vpop.f32.mrf.mxu1 }
 0x5dc   :  { %v7609_v56 = vpop.f32.mrf.mxu0  ;;  %v7631_v57 = vpop.f32.mrf.mxu1 }
 0x5dd   :  { %v7610_v58 = vadd.f32 %v7609_v56, %v7608_v46  ;;  %v7632_v48 = vadd.f32 %v7631_v57, %v7630_v37  ;;  %v3752_v46 = vld [vmem:[#allocation8 + $0x318] sm:$0xff] }
 0x5de   :  { %v7611_v59 = vpop.f32.mrf.mxu0  ;;  %v7633_v60 = vpop.f32.mrf.mxu1  ;;  %v3760_v37 = vld [vmem:[#allocation8 + $0x358] sm:$0xff] }
 0x5df   :  { %v3367_v61 = vadd.f32 %v7610_v58, %v7291_v53  ;;  %v7521_v58 = vcombine.high %v3751_v38, %v3759_v51  ;;  %v3735_v59 = vld [vmem:[#allocation8 + $0x290] sm:$0xff] }
 0x5e0   :  { %v7612_v62 = vpop.f32.mrf.mxu0  ;;  %v7634_v63 = vpop.f32.mrf.mxu1  ;;  %v3743_v60 = vld [vmem:[#allocation8 + $0x2d0] sm:$0xff] }
 0x5e1   :  { %v3407_v23 = vadd.f32 %v7632_v48, %v3367_v61  ;;  %v7523_v48 = vcombine.high %v3752_v46, %v3760_v37  ;;  %v3736_v61 = vld [vmem:[#allocation8 + $0x298] sm:$0xff]  ;;  %v7520_v63 = vcombine.low %v3751_v38, %v3759_v51  ;;  %v7504_v50 = vcombine.low %v3735_v59, %v3743_v60 }
 0x5e2   :  { %v3744_v62 = vld [vmem:[#allocation8 + $0x2d8] sm:$0xff] }
 0x5e3   :  { %v7506_v8 = vcombine.low %v3736_v61, %v3744_v62 }
 0x5fa   :  { %v7652_v0 = vpop.f32.mrf.mxu0  ;;  %v7674_v19 = vpop.f32.mrf.mxu1 }
 0x5fc   :  { %v7653_v4 = vpop.f32.mrf.mxu0  ;;  %v7675_v9 = vpop.f32.mrf.mxu1 }
 0x5fd   :  { %v7654_v17 = vadd.f32 %v7653_v4, %v7652_v0  ;;  %v7676_v27 = vadd.f32 %v7675_v9, %v7674_v19  ;;  %v7505_v0 = vcombine.high %v3735_v59, %v3743_v60  ;;  %v7507_v19 = vcombine.high %v3736_v61, %v3744_v62  ;;  %v3719_v4 = vld [vmem:[#allocation8 + $0x210] sm:$0xff]  ;;  %v3753_v61 = vld [vmem:[#allocation8 + $0x320] sm:$0xff] }
 0x5fe   :  { %v7655_v6 = vpop.f32.mrf.mxu0  ;;  %v7677_v7 = vpop.f32.mrf.mxu1  ;;  %v3727_v9 = vld [vmem:[#allocation8 + $0x250] sm:$0xff]  ;;  %v3761_v62 = vld [vmem:[#allocation8 + $0x360] sm:$0xff] }
 0x5ff   :  { %v3447_v25 = vadd.f32 %v7654_v17, %v3407_v23  ;;  %v7522_v23 = vcombine.low %v3752_v46, %v3760_v37  ;;  %v3720_v6 = vld [vmem:[#allocation8 + $0x218] sm:$0xff]  ;;  %v7489_v47 = vcombine.high %v3719_v4, %v3727_v9  ;;  %v3769_v46 = vld [vmem:[#allocation8 + $0x3a0] sm:$0xff] }
 0x600   :  { %v7656_v12 = vpop.f32.mrf.mxu0  ;;  %v7678_v44 = vpop.f32.mrf.mxu1  ;;  %v3728_v7 = vld [vmem:[#allocation8 + $0x258] sm:$0xff]  ;;  %v3777_v37 = vld [vmem:[#allocation8 + $0x3e0] sm:$0xff] }
 0x601   :  { %v3487_v21 = vadd.f32 %v7676_v27, %v3447_v25  ;;  %v7491_v42 = vcombine.high %v3720_v6, %v3728_v7  ;;  %v3704_v12 = vld [vmem:[#allocation8 + $0x198] sm:$0xff]  ;;  %v7541_v59 = vcombine.high %v3769_v46, %v3777_v37 }
 0x602   :  { %v3712_v44 = vld [vmem:[#allocation8 + $0x1d8] sm:$0xff] }
 0x603   :  { %v7474_v25 = vcombine.low %v3704_v12, %v3712_v44 }
 0x61a   :  { %v7696_v13 = vpop.f32.mrf.mxu0 }
 0x61b   :  { %v7718_v2 = vpop.f32.mrf.mxu1 }
 0x61c   :  { %v7697_v14 = vpop.f32.mrf.mxu0 }
 0x61d   :  { %v7719_v39 = vpop.f32.mrf.mxu1  ;;  %v7698_v28 = vadd.f32 %v7697_v14, %v7696_v13  ;;  %v7488_v13 = vcombine.low %v3719_v4, %v3727_v9  ;;  %v7525_v4 = vcombine.high %v3753_v61, %v3761_v62 }
 0x61e   :  { %v7699_v41 = vpop.f32.mrf.mxu0  ;;  %v7720_v33 = vadd.f32 %v7719_v39, %v7718_v2  ;;  %v7490_v2 = vcombine.low %v3720_v6, %v3728_v7  ;;  %v7475_v39 = vcombine.high %v3704_v12, %v3712_v44  ;;  %v3737_v6 = vld [vmem:[#allocation8 + $0x2a0] sm:$0xff] }
 0x61f   :  { %v7721_v15 = vpop.f32.mrf.mxu1  ;;  %v3527_v16 = vadd.f32 %v7698_v28, %v3487_v21  ;;  %v3687_v41 = vld [vmem:[#allocation8 + $0x110] sm:$0xff]  ;;  %v3745_v7 = vld [vmem:[#allocation8 + $0x2e0] sm:$0xff] }
 0x620   :  { %v7700_v55 = vpop.f32.mrf.mxu0  ;;  %v3695_v15 = vld [vmem:[#allocation8 + $0x150] sm:$0xff]  ;;  %v3721_v12 = vld [vmem:[#allocation8 + $0x220] sm:$0xff] }
 0x621   :  { %v7722_v20 = vpop.f32.mrf.mxu1  ;;  %v3567_v26 = vadd.f32 %v7720_v33, %v3527_v16  ;;  %v3688_v55 = vld [vmem:[#allocation8 + $0x118] sm:$0xff]  ;;  %v7457_v27 = vcombine.high %v3687_v41, %v3695_v15  ;;  %v3671_v21 = vld [vmem:[#allocation8 + $0x90] sm:$0xff]  ;;  %v3729_v44 = vld [vmem:[#allocation8 + $0x260] sm:$0xff] }
 0x622   :  { %v3696_v20 = vld [vmem:[#allocation8 + $0x158] sm:$0xff]  ;;  %v3679_v16 = vld [vmem:[#allocation8 + $0xd0] sm:$0xff] }
 0x623   :  { %v7459_v28 = vcombine.high %v3688_v55, %v3696_v20  ;;  %v3680_v33 = vld [vmem:[#allocation8 + $0xd8] sm:$0xff] }
 0x63a   :  { %v7740_v32 = vpop.f32.mrf.mxu0 }
 0x63b   :  { %v7762_v22 = vpop.f32.mrf.mxu1 }
 0x63c   :  { %v7741_v24 = vpop.f32.mrf.mxu0 }
 0x63d   :  { %v7742_v30 = vadd.f32 %v7741_v24, %v7740_v32  ;;  %v7763_v11 = vpop.f32.mrf.mxu1  ;;  %v3672_v32 = vld [vmem:[#allocation8 + $0x98] sm:$0xff]  ;;  %v7458_v24 = vcombine.low %v3688_v55, %v3696_v20  ;;  %v3705_v55 = vld [vmem:[#allocation8 + $0x1a0] sm:$0xff] }
 0x63e   :  { %v7743_v34 = vpop.f32.mrf.mxu0  ;;  %v7764_v10 = vadd.f32 %v7763_v11, %v7762_v22  ;;  %v7456_v22 = vcombine.low %v3687_v41, %v3695_v15  ;;  %v3655_v11 = vld [vmem:[#allocation8 + $0x10] sm:$0xff]  ;;  %v7442_v38 = vcombine.low %v3672_v32, %v3680_v33  ;;  %v7493_v41 = vcombine.high %v3721_v12, %v3729_v44  ;;  %v3713_v20 = vld [vmem:[#allocation8 + $0x1e0] sm:$0xff] }
 0x63f   :  { %v3607_v49 = vadd.f32 %v7742_v30, %v3567_v26  ;;  %v7765_v52 = vpop.f32.mrf.mxu1  ;;  %v7441_v26 = vcombine.high %v3671_v21, %v3679_v16  ;;  %v7443_v30 = vcombine.high %v3672_v32, %v3680_v33  ;;  %v3663_v34 = vld [vmem:[#allocation8 + $0x50] sm:$0xff]  ;;  %v3689_v32 = vld [vmem:[#allocation8 + $0x120] sm:$0xff] }
 0x640   :  { %v7744_v31 = vpop.f32.mrf.mxu0  ;;  %v7440_v52 = vcombine.low %v3671_v21, %v3679_v16  ;;  %v7477_v21 = vcombine.high %v3705_v55, %v3713_v20  ;;  %v3697_v33 = vld [vmem:[#allocation8 + $0x160] sm:$0xff] }
 0x641   :  { %v3647_v53 = vadd.f32 %v7764_v10, %v3607_v49  ;;  %v7766_v56 = vpop.f32.mrf.mxu1  ;;  %v3656_v49 = vld [vmem:[#allocation8 + $0x18] sm:$0xff]  ;;  %v7425_v31 = vcombine.high %v3655_v11, %v3663_v34 }
 0x642   :  { %v3664_v10 = vld [vmem:[#allocation8 + $0x58] sm:$0xff]  ;;  %v3778_v56 = vld [vmem:[#allocation8 + $0x3e8] sm:$0xff] }
 0x643   :  { %v8952_v57 = vpack.c.bf16 %v3647_v53, %v3647_v53  ;;  %v7427_v51 = vcombine.high %v3656_v49, %v3664_v10  ;;  %v3770_v53 = vld [vmem:[#allocation8 + $0x3a8] sm:$0xff] }
 0x644   :  { %v7543_v60 = vcombine.high %v3770_v53, %v3778_v56 }
 0x645   :  { %4454 = vmatmul.mubr.bf16.vlgmr.msra.gmra.mxu0 %v8952_v57  ;;  %4495 = vmatmul.mubr.bf16.vlgmr.msra.gmra.mxu1 %v8952_v57 }
 0x646   :  { %4504 = vmatpush1.bf16.msra.mxu0 %v7536_v43  ;;  %4545 = vmatpush1.bf16.msra.mxu1 %v7538_v45  ;;  %v3703_v43 = vld [vmem:[#allocation8 + $0x190] sm:$0xff] }
 0x647   :  { %4505 = vmatprep.subr.bf16.mxu0 %v7521_v58  ;;  %4546 = vmatprep.subr.bf16.mxu1 %v7523_v48  ;;  %v3711_v45 = vld [vmem:[#allocation8 + $0x1d0] sm:$0xff]  ;;  %v7424_v58 = vcombine.low %v3655_v11, %v3663_v34  ;;  %v7426_v48 = vcombine.low %v3656_v49, %v3664_v10  ;;  %v7461_v11 = vcombine.high %v3689_v32, %v3697_v33  ;;  %v3673_v49 = vld [vmem:[#allocation8 + $0xa0] sm:$0xff] }
 0x648   :  { %4535 = vmatprep.mubr.bf16.mxu0 %v8230_v54  ;;  %4576 = vmatprep.mubr.bf16.mxu1 %v8230_v54  ;;  %v7473_v14 = vcombine.high %v3703_v43, %v3711_v45  ;;  %v7472_v17 = vcombine.low %v3703_v43, %v3711_v45  ;;  %v7509_v43 = vcombine.high %v3737_v6, %v3745_v7  ;;  %v3681_v10 = vld [vmem:[#allocation8 + $0xe0] sm:$0xff] }
 0x64a   :  { %4506 = vmatpush1.bf16.msra.mxu0 %v7520_v63  ;;  %4547 = vmatpush1.bf16.msra.mxu1 %v7522_v23  ;;  %v3754_v63 = vld [vmem:[#allocation8 + $0x328] sm:$0xff] }
 0x64b   :  { %4507 = vmatprep.subr.bf16.mxu0 %v7505_v0  ;;  %4548 = vmatprep.subr.bf16.mxu1 %v7507_v19  ;;  %v3762_v23 = vld [vmem:[#allocation8 + $0x368] sm:$0xff]  ;;  %v7540_v0 = vcombine.low %v3769_v46, %v3777_v37  ;;  %v7542_v19 = vcombine.low %v3770_v53, %v3778_v56  ;;  %v7445_v46 = vcombine.high %v3673_v49, %v3681_v10  ;;  %v3657_v53 = vld [vmem:[#allocation8 + $0x20] sm:$0xff] }
 0x64c   :  { %v7527_v9 = vcombine.high %v3754_v63, %v3762_v23  ;;  %v3665_v56 = vld [vmem:[#allocation8 + $0x60] sm:$0xff] }
 0x64e   :  { %4508 = vmatpush1.bf16.msra.mxu0 %v7504_v50  ;;  %4549 = vmatpush1.bf16.msra.mxu1 %v7506_v8  ;;  %v3738_v50 = vld [vmem:[#allocation8 + $0x2a8] sm:$0xff] }
 0x64f   :  { %4509 = vmatprep.subr.bf16.mxu0 %v7489_v47  ;;  %4550 = vmatprep.subr.bf16.mxu1 %v7491_v42  ;;  %v3746_v8 = vld [vmem:[#allocation8 + $0x2e8] sm:$0xff]  ;;  %v7524_v47 = vcombine.low %v3753_v61, %v3761_v62  ;;  %v7526_v42 = vcombine.low %v3754_v63, %v3762_v23  ;;  %v7429_v61 = vcombine.high %v3657_v53, %v3665_v56  ;;  %v3771_v63 = vld [vmem:[#allocation8 + $0x3b0] sm:$0xff] }
 0x650   :  { %v7511_v45 = vcombine.high %v3738_v50, %v3746_v8  ;;  %v3779_v23 = vld [vmem:[#allocation8 + $0x3f0] sm:$0xff] }
 0x652   :  { %4510 = vmatpush1.bf16.msra.mxu0 %v7488_v13  ;;  %4551 = vmatpush1.bf16.msra.mxu1 %v7490_v2  ;;  %v3722_v13 = vld [vmem:[#allocation8 + $0x228] sm:$0xff] }
 0x653   :  { %4511 = vmatprep.subr.bf16.mxu0 %v7473_v14  ;;  %4552 = vmatprep.subr.bf16.mxu1 %v7475_v39  ;;  %v3730_v2 = vld [vmem:[#allocation8 + $0x268] sm:$0xff]  ;;  %v7508_v14 = vcombine.low %v3737_v6, %v3745_v7  ;;  %v7510_v39 = vcombine.low %v3738_v50, %v3746_v8  ;;  %v7545_v6 = vcombine.high %v3771_v63, %v3779_v23  ;;  %v3755_v50 = vld [vmem:[#allocation8 + $0x330] sm:$0xff] }
 0x654   :  { %v7495_v15 = vcombine.high %v3722_v13, %v3730_v2  ;;  %v3763_v8 = vld [vmem:[#allocation8 + $0x370] sm:$0xff] }
 0x656   :  { %4512 = vmatpush1.bf16.msra.mxu0 %v7472_v17  ;;  %4553 = vmatpush1.bf16.msra.mxu1 %v7474_v25  ;;  %v3706_v17 = vld [vmem:[#allocation8 + $0x1a8] sm:$0xff] }
 0x657   :  { %4513 = vmatprep.subr.bf16.mxu0 %v7457_v27  ;;  %4554 = vmatprep.subr.bf16.mxu1 %v7459_v28  ;;  %v3714_v25 = vld [vmem:[#allocation8 + $0x1e8] sm:$0xff]  ;;  %v7492_v27 = vcombine.low %v3721_v12, %v3729_v44  ;;  %v7494_v28 = vcombine.low %v3722_v13, %v3730_v2  ;;  %v7529_v12 = vcombine.high %v3755_v50, %v3763_v8  ;;  %v3739_v13 = vld [vmem:[#allocation8 + $0x2b0] sm:$0xff] }
 0x658   :  { %v7479_v16 = vcombine.high %v3706_v17, %v3714_v25  ;;  %v3747_v2 = vld [vmem:[#allocation8 + $0x2f0] sm:$0xff] }
 0x65a   :  { %4514 = vmatpush1.bf16.msra.mxu0 %v7456_v22  ;;  %4555 = vmatpush1.bf16.msra.mxu1 %v7458_v24  ;;  %v3690_v22 = vld [vmem:[#allocation8 + $0x128] sm:$0xff] }
 0x65b   :  { %4515 = vmatprep.subr.bf16.mxu0 %v7441_v26  ;;  %4556 = vmatprep.subr.bf16.mxu1 %v7443_v30  ;;  %v3698_v24 = vld [vmem:[#allocation8 + $0x168] sm:$0xff]  ;;  %v7476_v26 = vcombine.low %v3705_v55, %v3713_v20  ;;  %v7478_v30 = vcombine.low %v3706_v17, %v3714_v25  ;;  %v7513_v55 = vcombine.high %v3739_v13, %v3747_v2  ;;  %v3723_v17 = vld [vmem:[#allocation8 + $0x230] sm:$0xff] }
 0x65c   :  { %v7463_v34 = vcombine.high %v3690_v22, %v3698_v24  ;;  %v3731_v25 = vld [vmem:[#allocation8 + $0x270] sm:$0xff] }
 0x65e   :  { %4516 = vmatpush1.bf16.msra.mxu0 %v7440_v52  ;;  %4557 = vmatpush1.bf16.msra.mxu1 %v7442_v38  ;;  %v3674_v52 = vld [vmem:[#allocation8 + $0xa8] sm:$0xff] }
 0x65f   :  { %4517 = vmatprep.subr.bf16.mxu0 %v7425_v31  ;;  %4558 = vmatprep.subr.bf16.mxu1 %v7427_v51  ;;  %v3682_v38 = vld [vmem:[#allocation8 + $0xe8] sm:$0xff]  ;;  %v7460_v31 = vcombine.low %v3689_v32, %v3697_v33  ;;  %v7462_v51 = vcombine.low %v3690_v22, %v3698_v24  ;;  %v7497_v32 = vcombine.high %v3723_v17, %v3731_v25  ;;  %v3707_v22 = vld [vmem:[#allocation8 + $0x1b0] sm:$0xff] }
 0x660   :  { %v7447_v37 = vcombine.high %v3674_v52, %v3682_v38  ;;  %v3715_v24 = vld [vmem:[#allocation8 + $0x1f0] sm:$0xff] }
 0x662   :  { %4518 = vmatpush1.bf16.msra.mxu0 %v7424_v58  ;;  %4559 = vmatpush1.bf16.msra.mxu1 %v7426_v48  ;;  %v3658_v58 = vld [vmem:[#allocation8 + $0x28] sm:$0xff] }
 0x663   :  { %4585 = vmatprep.subr.bf16.mxu0 %v7541_v59  ;;  %4626 = vmatprep.subr.bf16.mxu1 %v7543_v60  ;;  %v3666_v48 = vld [vmem:[#allocation8 + $0x68] sm:$0xff]  ;;  %v7444_v59 = vcombine.low %v3673_v49, %v3681_v10  ;;  %v7446_v60 = vcombine.low %v3674_v52, %v3682_v38  ;;  %v7481_v49 = vcombine.high %v3707_v22, %v3715_v24  ;;  %v3691_v10 = vld [vmem:[#allocation8 + $0x130] sm:$0xff]  ;;  %v3692_v38 = vld [vmem:[#allocation8 + $0x138] sm:$0xff] }
 0x664   :  { %v7431_v62 = vcombine.high %v3658_v58, %v3666_v48  ;;  %v3699_v52 = vld [vmem:[#allocation8 + $0x170] sm:$0xff] }
 0x665   :  { %4536 = vmatmul.mubr.bf16.vlgmr.msra.gmra.mxu0 %v8952_v57  ;;  %4577 = vmatmul.mubr.bf16.vlgmr.msra.gmra.mxu1 %v8952_v57 }
 0x666   :  { %4586 = vmatpush1.bf16.msra.mxu0 %v7540_v0  ;;  %4627 = vmatpush1.bf16.msra.mxu1 %v7542_v19  ;;  %v3772_v0 = vld [vmem:[#allocation8 + $0x3b8] sm:$0xff] }
 0x667   :  { %4587 = vmatprep.subr.bf16.mxu0 %v7525_v4  ;;  %4628 = vmatprep.subr.bf16.mxu1 %v7527_v9  ;;  %v3780_v19 = vld [vmem:[#allocation8 + $0x3f8] sm:$0xff]  ;;  %v7428_v4 = vcombine.low %v3657_v53, %v3665_v56  ;;  %v7430_v9 = vcombine.low %v3658_v58, %v3666_v48  ;;  %v3675_v56 = vld [vmem:[#allocation8 + $0xb0] sm:$0xff] }
 0x668   :  { %4617 = vmatprep.mubr.bf16.mxu0 %v8230_v54  ;;  %4658 = vmatprep.mubr.bf16.mxu1 %v8230_v54  ;;  %v7547_v7 = vcombine.high %v3772_v0, %v3780_v19  ;;  %v3683_v58 = vld [vmem:[#allocation8 + $0xf0] sm:$0xff]  ;;  %v3676_v48 = vld [vmem:[#allocation8 + $0xb8] sm:$0xff] }
 0x66a   :  { %4588 = vmatpush1.bf16.msra.mxu0 %v7524_v47  ;;  %4629 = vmatpush1.bf16.msra.mxu1 %v7526_v42  ;;  %v3756_v47 = vld [vmem:[#allocation8 + $0x338] sm:$0xff] }
 0x66b   :  { %4589 = vmatprep.subr.bf16.mxu0 %v7509_v43  ;;  %4630 = vmatprep.subr.bf16.mxu1 %v7511_v45  ;;  %v3764_v42 = vld [vmem:[#allocation8 + $0x378] sm:$0xff]  ;;  %v7544_v43 = vcombine.low %v3771_v63, %v3779_v23  ;;  %v7546_v45 = vcombine.low %v3772_v0, %v3780_v19  ;;  %v3659_v23 = vld [vmem:[#allocation8 + $0x30] sm:$0xff] }
 0x66c   :  { %v7531_v44 = vcombine.high %v3756_v47, %v3764_v42  ;;  %v3667_v0 = vld [vmem:[#allocation8 + $0x70] sm:$0xff]  ;;  %v3660_v19 = vld [vmem:[#allocation8 + $0x38] sm:$0xff] }
 0x66e   :  { %4590 = vmatpush1.bf16.msra.mxu0 %v7508_v14  ;;  %4631 = vmatpush1.bf16.msra.mxu1 %v7510_v39  ;;  %v3740_v14 = vld [vmem:[#allocation8 + $0x2b8] sm:$0xff] }
 0x66f   :  { %4591 = vmatprep.subr.bf16.mxu0 %v7493_v41  ;;  %4632 = vmatprep.subr.bf16.mxu1 %v7495_v15  ;;  %v3748_v39 = vld [vmem:[#allocation8 + $0x2f8] sm:$0xff]  ;;  %v7528_v41 = vcombine.low %v3755_v50, %v3763_v8  ;;  %v7530_v15 = vcombine.low %v3756_v47, %v3764_v42  ;;  %v7432_v8 = vcombine.low %v3659_v23, %v3667_v0  ;;  %v5430_v42 = vld [vmem:[#allocation5 + $0x6e0] sm:$0xff] }
 0x670   :  { %v7515_v20 = vcombine.high %v3740_v14, %v3748_v39 }
 0x672   :  { %4592 = vmatpush1.bf16.msra.mxu0 %v7492_v27  ;;  %4633 = vmatpush1.bf16.msra.mxu1 %v7494_v28  ;;  %v3724_v27 = vld [vmem:[#allocation8 + $0x238] sm:$0xff] }
 0x673   :  { %4593 = vmatprep.subr.bf16.mxu0 %v7477_v21  ;;  %4634 = vmatprep.subr.bf16.mxu1 %v7479_v16  ;;  %v3732_v28 = vld [vmem:[#allocation8 + $0x278] sm:$0xff]  ;;  %v7512_v21 = vcombine.low %v3739_v13, %v3747_v2  ;;  %v7514_v16 = vcombine.low %v3740_v14, %v3748_v39  ;;  %v5421_v13 = vld [vmem:[#allocation5 + $0x698] sm:$0xff]  ;;  %v5422_v2 = vld [vmem:[#allocation5 + $0x6a0] sm:$0xff] }
 0x674   :  { %v7499_v33 = vcombine.high %v3724_v27, %v3732_v28  ;;  %v5420_v14 = vld [vmem:[#allocation5 + $0x690] sm:$0xff] }
 0x675   :  { %v5416_v39 = vld [vmem:[#allocation5 + $0x670] sm:$0xff] }
 0x676   :  { %4594 = vmatpush1.bf16.msra.mxu0 %v7476_v26  ;;  %4635 = vmatpush1.bf16.msra.mxu1 %v7478_v30  ;;  %v3708_v26 = vld [vmem:[#allocation8 + $0x1b8] sm:$0xff] }
 0x677   :  { %4595 = vmatprep.subr.bf16.mxu0 %v7461_v11  ;;  %4636 = vmatprep.subr.bf16.mxu1 %v7463_v34  ;;  %v3716_v30 = vld [vmem:[#allocation8 + $0x1f8] sm:$0xff]  ;;  %v7496_v11 = vcombine.low %v3723_v17, %v3731_v25  ;;  %v7498_v34 = vcombine.low %v3724_v27, %v3732_v28  ;;  %v5406_v25 = vld [vmem:[#allocation5 + $0x620] sm:$0xff] }
 0x678   :  { %v5408_v17 = vld [vmem:[#allocation5 + $0x630] sm:$0xff]  ;;  %v5402_v27 = vld [vmem:[#allocation5 + $0x600] sm:$0xff] }
 0x679   :  { %v5400_v28 = vld [vmem:[#allocation5 + $0x5f0] sm:$0xff] }
 0x67a   :  { %4596 = vmatpush1.bf16.msra.mxu0 %v7460_v31  ;;  %4637 = vmatpush1.bf16.msra.mxu1 %v7462_v51  ;;  %v3700_v31 = vld [vmem:[#allocation8 + $0x178] sm:$0xff]  ;;  %v7480_v51 = vcombine.low %v3707_v22, %v3715_v24  ;;  %v5394_v22 = vld [vmem:[#allocation5 + $0x5c0] sm:$0xff] }
 0x67b   :  { %4597 = vmatprep.subr.bf16.mxu0 %v7445_v46  ;;  %4638 = vmatprep.subr.bf16.mxu1 %v7447_v37  ;;  %v7482_v46 = vcombine.low %v3708_v26, %v3716_v30  ;;  %v7465_v37 = vcombine.high %v3691_v10, %v3699_v52  ;;  %v7467_v53 = vcombine.high %v3692_v38, %v3700_v31  ;;  %v5392_v24 = vld [vmem:[#allocation5 + $0x5b0] sm:$0xff] }
 0x67e   :  { %4598 = vmatpush1.bf16.msra.mxu0 %v7444_v59  ;;  %4639 = vmatpush1.bf16.msra.mxu1 %v7446_v60  ;;  %v3684_v59 = vld [vmem:[#allocation8 + $0xf8] sm:$0xff]  ;;  %v7464_v60 = vcombine.low %v3691_v10, %v3699_v52  ;;  %v5381_v10 = vld [vmem:[#allocation5 + $0x558] sm:$0xff] }
 0x67f   :  { %4599 = vmatprep.subr.bf16.mxu0 %v7429_v61  ;;  %4640 = vmatprep.subr.bf16.mxu1 %v7431_v62  ;;  %v7466_v61 = vcombine.low %v3692_v38, %v3700_v31  ;;  %v7449_v62 = vcombine.high %v3675_v56, %v3683_v58  ;;  %v7451_v63 = vcombine.high %v3676_v48, %v3684_v59  ;;  %v5379_v38 = vld [vmem:[#allocation5 + $0x548] sm:$0xff]  ;;  %v5380_v31 = vld [vmem:[#allocation5 + $0x550] sm:$0xff] }
 0x682   :  { %4600 = vmatpush1.bf16.msra.mxu0 %v7428_v4  ;;  %4641 = vmatpush1.bf16.msra.mxu1 %v7430_v9  ;;  %v3668_v4 = vld [vmem:[#allocation8 + $0x78] sm:$0xff]  ;;  %v7448_v9 = vcombine.low %v3675_v56, %v3683_v58 }
 0x683   :  { %4667 = vmatprep.subr.bf16.mxu0 %v7545_v6  ;;  %4708 = vmatprep.subr.bf16.mxu1 %v7547_v7  ;;  %v7450_v6 = vcombine.low %v3676_v48, %v3684_v59  ;;  %v7433_v7 = vcombine.high %v3659_v23, %v3667_v0  ;;  %v7435_v50 = vcombine.high %v3660_v19, %v3668_v4 }
 0x684   :  { %v7434_v47 = vcombine.low %v3660_v19, %v3668_v4 }
 0x685   :  { %4618 = vmatmul.mubr.bf16.vlgmr.msra.gmra.mxu0 %v8952_v57  ;;  %4659 = vmatmul.mubr.bf16.vlgmr.msra.gmra.mxu1 %v8952_v57 }
 0x686   :  { %4668 = vmatpush1.bf16.msra.mxu0 %v7544_v43  ;;  %4709 = vmatpush1.bf16.msra.mxu1 %v7546_v45  ;;  %v5428_v43 = vld [vmem:[#allocation5 + $0x6d0] sm:$0xff]  ;;  %v5429_v45 = vld [vmem:[#allocation5 + $0x6d8] sm:$0xff] }
 0x687   :  { %4669 = vmatprep.subr.bf16.mxu0 %v7529_v12  ;;  %4710 = vmatprep.subr.bf16.mxu1 %v7531_v44  ;;  %v5427_v12 = vld [vmem:[#allocation5 + $0x6c8] sm:$0xff] }
 0x688   :  { %4699 = vmatprep.mubr.bf16.mxu0 %v8230_v54  ;;  %4740 = vmatprep.mubr.bf16.mxu1 %v8230_v54  ;;  %v7483_v54 = vcombine.high %v3708_v26, %v3716_v30  ;;  %v5423_v44 = vld [vmem:[#allocation5 + $0x6a8] sm:$0xff]  ;;  %v5388_v26 = vld [vmem:[#allocation5 + $0x590] sm:$0xff]  ;;  %v8231_v30 = vmov 1966171168  }
 0x68a   :  { %4670 = vmatpush1.bf16.msra.mxu0 %v7528_v41  ;;  %4711 = vmatpush1.bf16.msra.mxu1 %v7530_v15  ;;  %v5414_v41 = vld [vmem:[#allocation5 + $0x660] sm:$0xff]  ;;  %v5413_v15 = vld [vmem:[#allocation5 + $0x658] sm:$0xff] }
 0x68b   :  { %4671 = vmatprep.subr.bf16.mxu0 %v7513_v55  ;;  %4712 = vmatprep.subr.bf16.mxu1 %v7515_v20  ;;  %v5409_v55 = vld [vmem:[#allocation5 + $0x638] sm:$0xff]  ;;  %v5407_v20 = vld [vmem:[#allocation5 + $0x628] sm:$0xff] }
 0x68e   :  { %4672 = vmatpush1.bf16.msra.mxu0 %v7512_v21  ;;  %4713 = vmatpush1.bf16.msra.mxu1 %v7514_v16  ;;  %v5401_v21 = vld [vmem:[#allocation5 + $0x5f8] sm:$0xff]  ;;  %v5399_v16 = vld [vmem:[#allocation5 + $0x5e8] sm:$0xff] }
 0x68f   :  { %4673 = vmatprep.subr.bf16.mxu0 %v7497_v32  ;;  %4714 = vmatprep.subr.bf16.mxu1 %v7499_v33  ;;  %v5395_v32 = vld [vmem:[#allocation5 + $0x5c8] sm:$0xff]  ;;  %v5393_v33 = vld [vmem:[#allocation5 + $0x5b8] sm:$0xff] }
 0x692   :  { %4674 = vmatpush1.bf16.msra.mxu0 %v7496_v11  ;;  %4715 = vmatpush1.bf16.msra.mxu1 %v7498_v34  ;;  %v4751_v11 = vunpack.c.l.s4 %v8231_v30  ;;  %v5386_v34 = vld [vmem:[#allocation5 + $0x580] sm:$0xff] }
 0x693   :  { %4675 = vmatprep.subr.bf16.mxu0 %v7481_v49  ;;  %4716 = vmatprep.subr.bf16.mxu1 %v7483_v54  ;;  %v5387_v49 = vld [vmem:[#allocation5 + $0x588] sm:$0xff]  ;;  %v5385_v54 = vld [vmem:[#allocation5 + $0x578] sm:$0xff] }
 0x694   :  { %v4752_v52 = vunpack.c.0.s8 %v4751_v11 }
 0x696   :  { %4676 = vmatpush1.bf16.msra.mxu0 %v7480_v51  ;;  %4717 = vmatpush1.bf16.msra.mxu1 %v7482_v46  ;;  %v5378_v51 = vld [vmem:[#allocation5 + $0x540] sm:$0xff]  ;;  %v8974_v46 = vld [vmem:[#allocation5 + $0x6f8] sm:$0xff] }
 0x697   :  { %4677 = vmatprep.subr.bf16.mxu0 %v7465_v37  ;;  %4718 = vmatprep.subr.bf16.mxu1 %v7467_v53  ;;  %v8977_v37 = vsub.s32 %v4752_v52, %v8284_v1  ;;  %v5432_v53 = vld [vmem:[#allocation5 + $0x6f0] sm:$0xff] }
 0x69a   :  { %4678 = vmatpush1.bf16.msra.mxu0 %v7464_v60  ;;  %4719 = vmatpush1.bf16.msra.mxu1 %v7466_v61 }
 0x69b   :  { %4679 = vmatprep.subr.bf16.mxu0 %v7449_v62  ;;  %4720 = vmatprep.subr.bf16.mxu1 %v7451_v63 }
 0x69e   :  { %4680 = vmatpush1.bf16.msra.mxu0 %v7448_v9  ;;  %4721 = vmatpush1.bf16.msra.mxu1 %v7450_v6 }
 0x69f   :  { %4681 = vmatprep.subr.bf16.mxu0 %v7433_v7  ;;  %4722 = vmatprep.subr.bf16.mxu1 %v7435_v50 }
 0x6a2   :  { %4682 = vmatpush1.bf16.msra.mxu0 %v7432_v8  ;;  %4723 = vmatpush1.bf16.msra.mxu1 %v7434_v47 }
 0x6a3   :  { %5535 = vmatprep.subr.mxu1 %v5430_v42  ;;  %5450 = vmatprep.subr.mxu0 %v5428_v43 }
 0x6a5   :  { %4700 = vmatmul.mubr.bf16.vlgmr.msra.gmra.mxu0 %v8952_v57  ;;  %4741 = vmatmul.mubr.bf16.vlgmr.msra.gmra.mxu1 %v8952_v57  ;;  %v5415_v57 = vld [vmem:[#allocation5 + $0x668] sm:$0xff] }
 0x6a6   :  { %5536 = vmatpush1.xpose.msra.mxu1 %v5429_v45  ;;  %5451 = vmatpush1.xpose.msra.mxu0 %v5427_v12 }
 0x6a7   :  { %5537 = vmatprep.subr.mxu1 %v5423_v44  ;;  %5452 = vmatprep.subr.mxu0 %v5421_v13 }
 0x6aa   :  { %5538 = vmatpush1.xpose.msra.mxu1 %v5422_v2  ;;  %5453 = vmatpush1.xpose.msra.mxu0 %v5420_v14 }
 0x6ab   :  { %5539 = vmatprep.subr.mxu1 %v5416_v39  ;;  %5454 = vmatprep.subr.mxu0 %v5414_v41 }
 0x6ae   :  { %5540 = vmatpush1.xpose.msra.mxu1 %v5415_v57  ;;  %5455 = vmatpush1.xpose.msra.mxu0 %v5413_v15 }
 0x6af   :  { %5541 = vmatprep.subr.mxu1 %v5409_v55  ;;  %5456 = vmatprep.subr.mxu0 %v5407_v20 }
 0x6b2   :  { %5542 = vmatpush1.xpose.msra.mxu1 %v5408_v17  ;;  %5457 = vmatpush1.xpose.msra.mxu0 %v5406_v25 }
 0x6b3   :  { %5543 = vmatprep.subr.mxu1 %v5402_v27  ;;  %5458 = vmatprep.subr.mxu0 %v5400_v28 }
 0x6b6   :  { %5544 = vmatpush1.xpose.msra.mxu1 %v5401_v21  ;;  %5459 = vmatpush1.xpose.msra.mxu0 %v5399_v16 }
 0x6b7   :  { %5545 = vmatprep.subr.mxu1 %v5395_v32  ;;  %5460 = vmatprep.subr.mxu0 %v5393_v33 }
 0x6ba   :  { %5546 = vmatpush1.xpose.msra.mxu1 %v5394_v22  ;;  %5461 = vmatpush1.xpose.msra.mxu0 %v5392_v24 }
 0x6bb   :  { %5547 = vmatprep.subr.mxu1 %v5388_v26  ;;  %5462 = vmatprep.subr.mxu0 %v5386_v34 }
 0x6be   :  { %5548 = vmatpush1.xpose.msra.mxu1 %v5387_v49  ;;  %5463 = vmatpush1.xpose.msra.mxu0 %v5385_v54 }
 0x6bf   :  { %5549 = vmatprep.subr.mxu1 %v5381_v10  ;;  %5464 = vmatprep.subr.mxu0 %v5379_v38 }
 0x6c2   :  { %5550 = vmatpush1.xpose.msra.mxu1 %v5380_v31  ;;  %5465 = vmatpush1.xpose.msra.mxu0 %v5378_v51 }
 0x6c3   :  { %7873 = vmatprep.subr.mxu1 %v8974_v46  ;;  %5620 = vmatprep.subr.mxu0 %v5432_v53 }
 0x705   :  { %v4455_v56 = vpop.f32.mrf.mxu0  ;;  %v4496_v58 = vpop.f32.mrf.mxu1 }
 0x706   :  { %v4804_v48 = vrot.slane %v4496_v58, %v8977_v37  ;;  %v4756_v59 = vrot.slane %v4455_v56, %v8977_v37 }
 0x707   :  { %v4457_v60 = vpop.f32.mrf.mxu0  ;;  %v4498_v61 = vpop.f32.mrf.mxu1 }
 0x708   :  { %v4805_v62 = vcombine.high %v4804_v48, %v4804_v48  ;;  %v4781_v63 = vrot.slane %v4457_v60, %v8977_v37  ;;  %v4827_v23 = vrot.slane %v4498_v61, %v8977_v37  ;;  %v4757_v4 = vcombine.high %v4756_v59, %v4756_v59 }
 0x709   :  { %v4459_v0 = vpop.f32.mrf.mxu0  ;;  %v4500_v19 = vpop.f32.mrf.mxu1  ;;  %v4812_v57 = vrot.slane %v4804_v48, %v8977_v37  ;;  %v4764_v15 = vrot.slane %v4756_v59, %v8977_v37 }
 0x70a   :  { %v4782_v9 = vcombine.high %v4781_v63, %v4781_v63  ;;  %v4828_v6 = vcombine.high %v4827_v23, %v4827_v23  ;;  %v4819_v8 = vrot.slane %v4805_v62, %v8977_v37  ;;  %v4771_v43 = vrot.slane %v4757_v4, %v8977_v37 }
 0x70b   :  { %v4460_v7 = vpop.f32.mrf.mxu0  ;;  %v4501_v50 = vpop.f32.mrf.mxu1  ;;  %v4789_v39 = vrot.slane %v4781_v63, %v8977_v37  ;;  %v4835_v20 = vrot.slane %v4827_v23, %v8977_v37  ;;  %v5134_v17 = vrot.slane %v4812_v57, %v8499_v29 }
 0x70c   :  { %v4796_v47 = vrot.slane %v4782_v9, %v8977_v37  ;;  %v4842_v42 = vrot.slane %v4828_v6, %v8977_v37  ;;  %v5138_v12 = vrot.slane %v4819_v8, %v8499_v29  ;;  %v5296_v50 = vld [vmem:[#allocation10 + $0x10] sm:$0xff] }
 0x70d   :  { %v5124_v41 = vrot.slane %v4789_v39, %v8499_v29  ;;  %v5144_v22 = vrot.slane %v4835_v20, %v8499_v29 }
 0x70e   :  { %v5128_v45 = vrot.slane %v4796_v47, %v8499_v29  ;;  %v5148_v13 = vrot.slane %v4842_v42, %v8499_v29 }
 0x70f   :  { %v5262_v55 = vsel %vm5261_vm15, %v4764_v15, %v5124_v41 }
 0x710   :  { %v5263_v44 = vsel %vm5261_vm15, %v4771_v43, %v5128_v45  ;;  %v5265_v16 = vsel %vm5264_vm0, %v5262_v55, %v5134_v17 }
 0x711   :  { %v5266_v2 = vsel %vm5264_vm0, %v5263_v44, %v5138_v12  ;;  %v5268_v10 = vsel %vm5267_vm3, %v5265_v16, %v5144_v22 }
 0x712   :  { %v5269_v14 = vsel %vm5267_vm3, %v5266_v2, %v5148_v13 }
 0x725   :  { %v4537_v25 = vpop.f32.mrf.mxu0  ;;  %v4578_v27 = vpop.f32.mrf.mxu1 }
 0x726   :  { %v4850_v28 = vrot.slane %v4537_v25, %v8977_v37  ;;  %v4896_v21 = vrot.slane %v4578_v27, %v8977_v37 }
 0x727   :  { %v4539_v32 = vpop.f32.mrf.mxu0  ;;  %v4580_v33 = vpop.f32.mrf.mxu1 }
 0x728   :  { %v4851_v24 = vcombine.high %v4850_v28, %v4850_v28  ;;  %v4858_v26 = vrot.slane %v4850_v28, %v8977_v37  ;;  %v4897_v30 = vcombine.high %v4896_v21, %v4896_v21  ;;  %v4873_v11 = vrot.slane %v4539_v32, %v8977_v37 }
 0x729   :  { %v4919_v34 = vrot.slane %v4580_v33, %v8977_v37  ;;  %v4541_v49 = vpop.f32.mrf.mxu0  ;;  %v4582_v54 = vpop.f32.mrf.mxu1  ;;  %v4904_v31 = vrot.slane %v4896_v21, %v8977_v37 }
 0x72a   :  { %v4865_v52 = vrot.slane %v4851_v24, %v8977_v37  ;;  %v5154_v38 = vrot.slane %v4858_v26, %v8499_v29  ;;  %v4874_v51 = vcombine.high %v4873_v11, %v4873_v11  ;;  %v4881_v53 = vrot.slane %v4873_v11, %v8977_v37 }
 0x72b   :  { %v4920_v56 = vcombine.high %v4919_v34, %v4919_v34  ;;  %v4927_v58 = vrot.slane %v4919_v34, %v8977_v37  ;;  %v4542_v48 = vpop.f32.mrf.mxu0  ;;  %v4583_v59 = vpop.f32.mrf.mxu1  ;;  %v4911_v62 = vrot.slane %v4897_v30, %v8977_v37  ;;  %v5174_v4 = vrot.slane %v4904_v31, %v8499_v29 }
 0x72c   :  { %v5158_v60 = vrot.slane %v4865_v52, %v8499_v29  ;;  %v5271_v61 = vsel %vm5270_vm4, %v5268_v10, %v5154_v38  ;;  %v4888_v63 = vrot.slane %v4874_v51, %v8977_v37  ;;  %v5164_v23 = vrot.slane %v4881_v53, %v8499_v29 }
 0x72d   :  { %v4934_v0 = vrot.slane %v4920_v56, %v8977_v37  ;;  %v5184_v7 = vrot.slane %v4927_v58, %v8499_v29  ;;  %v5178_v8 = vrot.slane %v4911_v62, %v8499_v29 }
 0x72e   :  { %v5272_v19 = vsel %vm5270_vm4, %v5269_v14, %v5158_v60  ;;  %v5168_v9 = vrot.slane %v4888_v63, %v8499_v29  ;;  %v5274_v6 = vsel %vm5273_vm5, %v5271_v61, %v5164_v23 }
 0x72f   :  { %v5277_v47 = vsel %vm5276_vm7, %v5274_v6, %v5174_v4  ;;  %v5188_v43 = vrot.slane %v4934_v0, %v8499_v29 }
 0x730   :  { %v5275_v42 = vsel %vm5273_vm5, %v5272_v19, %v5168_v9  ;;  %v5280_v45 = vsel %vm5279_vm8, %v5277_v47, %v5184_v7 }
 0x731   :  { %v5278_v12 = vsel %vm5276_vm7, %v5275_v42, %v5178_v8  ;;  %v5298_v44 = vadd.f32 %v5296_v50, %v5280_v45 }
 0x732   :  { %v5281_v13 = vsel %vm5279_vm8, %v5278_v12, %v5188_v43 }
 0x733   :  { %v9032_v2 = vadd.f32 %v5296_v50, %v5281_v13  ;;  %v9034_v14 = vmax.f32 %v5298_v44, 0.0 }
 0x735   :  { %5583 = vmatprep.mubr.f32.mxu1 %v9034_v14 }
 0x745   :  { %v4619_v39 = vpop.f32.mrf.mxu0  ;;  %v4660_v41 = vpop.f32.mrf.mxu1 }
 0x746   :  { %v4990_v16 = vrot.slane %v4660_v41, %v8977_v37  ;;  %v4942_v32 = vrot.slane %v4619_v39, %v8977_v37 }
 0x747   :  { %v4621_v57 = vpop.f32.mrf.mxu0  ;;  %v4662_v15 = vpop.f32.mrf.mxu1 }
 0x748   :  { %v4967_v27 = vrot.slane %v4621_v57, %v8977_v37  ;;  %v5013_v33 = vrot.slane %v4662_v15, %v8977_v37  ;;  %v4991_v26 = vcombine.high %v4990_v16, %v4990_v16  ;;  %v4998_v30 = vrot.slane %v4990_v16, %v8977_v37 }
 0x749   :  { %v4623_v55 = vpop.f32.mrf.mxu0  ;;  %v4664_v20 = vpop.f32.mrf.mxu1  ;;  %v4943_v11 = vcombine.high %v4942_v32, %v4942_v32  ;;  %v4950_v34 = vrot.slane %v4942_v32, %v8977_v37 }
 0x74a   :  { %v4968_v28 = vcombine.high %v4967_v27, %v4967_v27  ;;  %v4975_v21 = vrot.slane %v4967_v27, %v8977_v37  ;;  %v5014_v49 = vcombine.high %v5013_v33, %v5013_v33  ;;  %v5021_v52 = vrot.slane %v5013_v33, %v8977_v37 }
 0x74b   :  { %v4624_v17 = vpop.f32.mrf.mxu0  ;;  %v4665_v25 = vpop.f32.mrf.mxu1  ;;  %v5005_v38 = vrot.slane %v4991_v26, %v8977_v37  ;;  %v5204_v31 = vrot.slane %v4998_v30, %v8499_v29  ;;  %v4957_v51 = vrot.slane %v4943_v11, %v8977_v37 }
 0x74c   :  { %v4982_v22 = vrot.slane %v4968_v28, %v8977_v37  ;;  %v5194_v24 = vrot.slane %v4975_v21, %v8499_v29  ;;  %v5028_v53 = vrot.slane %v5014_v49, %v8977_v37  ;;  %v5214_v62 = vrot.slane %v5021_v52, %v8499_v29 }
 0x74d   :  { %v5208_v0 = vrot.slane %v5005_v38, %v8499_v29 }
 0x74e   :  { %v5198_v54 = vrot.slane %v4982_v22, %v8499_v29  ;;  %v5282_v10 = vsel %vm5261_vm15, %v4950_v34, %v5194_v24  ;;  %v5218_v6 = vrot.slane %v5028_v53, %v8499_v29  ;;  %v5297_v34 = vld [vmem:[#allocation10 + $0x18] sm:$0xff] }
 0x74f   :  { %v5284_v48 = vsel %vm5264_vm0, %v5282_v10, %v5204_v31 }
 0x750   :  { %v5283_v61 = vsel %vm5261_vm15, %v4957_v51, %v5198_v54  ;;  %v5286_v7 = vsel %vm5267_vm3, %v5284_v48, %v5214_v62  ;;  %v9100_v62 = vmax.f32 %v9032_v2, 0.0 }
 0x751   :  { %v5285_v43 = vsel %vm5264_vm0, %v5283_v61, %v5208_v0 }
 0x752   :  { %v5287_v27 = vsel %vm5267_vm3, %v5285_v43, %v5218_v6  ;;  %v5431_v6 = vld [vmem:[#allocation5 + $0x6e8] sm:$0xff]  ;;  %v5332_v43 = vrot.slane %v9100_v62, 7 }
 0x765   :  { %v4701_v56 = vpop.f32.mrf.mxu0  ;;  %v4742_v58 = vpop.f32.mrf.mxu1 }
 0x766   :  { %v5036_v59 = vrot.slane %v4701_v56, %v8977_v37  ;;  %v5082_v60 = vrot.slane %v4742_v58, %v8977_v37  ;;  %v5318_v56 = vrot.slane %v9034_v14, 6  ;;  %v5330_v58 = vrot.slane %v9034_v14, 7 }
 0x767   :  { %v4703_v63 = vpop.f32.mrf.mxu0  ;;  %v4744_v23 = vpop.f32.mrf.mxu1 }
 0x768   :  { %v5037_v19 = vcombine.high %v5036_v59, %v5036_v59  ;;  %v5044_v4 = vrot.slane %v5036_v59, %v8977_v37  ;;  %v5083_v9 = vcombine.high %v5082_v60, %v5082_v60  ;;  %v5059_v50 = vrot.slane %v4703_v63, %v8977_v37 }
 0x769   :  { %v5105_v8 = vrot.slane %v4744_v23, %v8977_v37  ;;  %v4705_v47 = vpop.f32.mrf.mxu0  ;;  %v4746_v42 = vpop.f32.mrf.mxu1  ;;  %v5090_v44 = vrot.slane %v5082_v60, %v8977_v37  ;;  %v5306_v60 = vrot.slane %v9034_v14, 5 }
 0x76a   :  { %v5051_v45 = vrot.slane %v5037_v19, %v8977_v37  ;;  %v5224_v12 = vrot.slane %v5044_v4, %v8499_v29  ;;  %v5060_v13 = vcombine.high %v5059_v50, %v5059_v50  ;;  %v5067_v39 = vrot.slane %v5059_v50, %v8977_v37  ;;  %v5426_v50 = vld [vmem:[#allocation5 + $0x6c0] sm:$0xff]  ;;  %v5425_v42 = vld [vmem:[#allocation5 + $0x6b8] sm:$0xff] }
 0x76b   :  { %v5106_v41 = vcombine.high %v5105_v8, %v5105_v8  ;;  %v5113_v57 = vrot.slane %v5105_v8, %v8977_v37  ;;  %v4706_v15 = vpop.f32.mrf.mxu0  ;;  %v4747_v55 = vpop.f32.mrf.mxu1  ;;  %v5097_v25 = vrot.slane %v5083_v9, %v8977_v37  ;;  %v5244_v33 = vrot.slane %v5090_v44, %v8499_v29 }
 0x76c   :  { %v5228_v20 = vrot.slane %v5051_v45, %v8499_v29  ;;  %v5288_v17 = vsel %vm5270_vm4, %v5286_v7, %v5224_v12  ;;  %v5074_v28 = vrot.slane %v5060_v13, %v8977_v37  ;;  %v5234_v21 = vrot.slane %v5067_v39, %v8499_v29  ;;  %v5424_v13 = vld [vmem:[#allocation5 + $0x6b0] sm:$0xff] }
 0x76d   :  { %v5120_v16 = vrot.slane %v5106_v41, %v8977_v37  ;;  %v5254_v26 = vrot.slane %v5113_v57, %v8499_v29  ;;  %v5248_v30 = vrot.slane %v5097_v25, %v8499_v29  ;;  %v5320_v47 = vrot.slane %v9100_v62, 6  ;;  %v5419_v57 = vld [vmem:[#allocation5 + $0x688] sm:$0xff] }
 0x76e   :  { %v5289_v32 = vsel %vm5270_vm4, %v5287_v27, %v5228_v20  ;;  %v5238_v22 = vrot.slane %v5074_v28, %v8499_v29  ;;  %v5290_v24 = vsel %vm5273_vm5, %v5288_v17, %v5234_v21  ;;  %v5308_v44 = vrot.slane %v9100_v62, 5  ;;  %v5418_v20 = vld [vmem:[#allocation5 + $0x680] sm:$0xff]  ;;  %v5417_v27 = vld [vmem:[#allocation5 + $0x678] sm:$0xff]  ;;  %v5412_v28 = vld [vmem:[#allocation5 + $0x650] sm:$0xff] }
 0x76f   :  { %v5292_v11 = vsel %vm5276_vm7, %v5290_v24, %v5244_v33  ;;  %v5258_v54 = vrot.slane %v5120_v16, %v8499_v29  ;;  %v5411_v21 = vld [vmem:[#allocation5 + $0x648] sm:$0xff]  ;;  %v5410_v24 = vld [vmem:[#allocation5 + $0x640] sm:$0xff] }
 0x770   :  { %v5291_v49 = vsel %vm5273_vm5, %v5289_v32, %v5238_v22  ;;  %v5294_v37 = vsel %vm5279_vm8, %v5292_v11, %v5254_v26  ;;  %v5366_v26 = vrot.slane %v9034_v14, 3  ;;  %v5354_v11 = vrot.slane %v9034_v14, 2 }
 0x771   :  { %v5293_v10 = vsel %vm5276_vm7, %v5291_v49, %v5248_v30  ;;  %v5299_v38 = vadd.f32 %v5297_v34, %v5294_v37 }
 0x772   :  { %v5295_v52 = vsel %vm5279_vm8, %v5293_v10, %v5258_v54  ;;  %v5404_v54 = vld [vmem:[#allocation5 + $0x610] sm:$0xff]  ;;  %v5403_v10 = vld [vmem:[#allocation5 + $0x608] sm:$0xff] }
 0x773   :  { %v5301_v31 = vadd.f32 %v5297_v34, %v5295_v52  ;;  %v9091_v53 = vmax.f32 %v5299_v38, 0.0  ;;  %v5405_v34 = vld [vmem:[#allocation5 + $0x618] sm:$0xff]  ;;  %v5398_v52 = vld [vmem:[#allocation5 + $0x5e0] sm:$0xff] }
 0x774   :  { %v5397_v38 = vld [vmem:[#allocation5 + $0x5d8] sm:$0xff] }
 0x775   :  { %v9089_v51 = vmax.f32 %v5301_v31, 0.0  ;;  %v5319_v2 = vrot.slane %v9091_v53, 6  ;;  %v5331_v7 = vrot.slane %v9091_v53, 7  ;;  %v5307_v8 = vrot.slane %v9091_v53, 5  ;;  %v5396_v31 = vld [vmem:[#allocation5 + $0x5d0] sm:$0xff] }
 0x776   :  { %v5367_v16 = vrot.slane %v9091_v53, 3  ;;  %v5355_v33 = vrot.slane %v9091_v53, 2 }
 0x777   :  { %v5321_v48 = vrot.slane %v9089_v51, 6  ;;  %v5333_v59 = vrot.slane %v9089_v51, 7  ;;  %v5309_v61 = vrot.slane %v9089_v51, 5  ;;  %v5324_v45 = vsel %vm186_vm2, %v5318_v56, %v5319_v2 }
 0x778   :  { %v5323_v12 = vsel %vm186_vm2, %v5319_v2, %v5320_v47  ;;  %v5335_v39 = vsel %vm199_vm6, %v5331_v7, %v5332_v43  ;;  %v5312_v41 = vsel %vm173_vm1, %v5306_v60, %v5307_v8  ;;  %v5311_v15 = vsel %vm173_vm1, %v5307_v8, %v5308_v44 }
 0x779   :  { %v5325_v63 = vsel %vm186_vm2, %v5321_v48, %v5318_v56  ;;  %v5337_v23 = vsel %vm199_vm6, %v5333_v59, %v5330_v58  ;;  %v5313_v0 = vsel %vm173_vm1, %v5309_v61, %v5306_v60  ;;  %v5328_v55 = vmul.f32 %v8291_v18, %v5323_v12  ;;  %v5391_v56 = vld [vmem:[#allocation5 + $0x5a8] sm:$0xff] }
 0x77a   :  { %v5326_v19 = vmul.f32 %v8291_v18, %v5325_v63  ;;  %v5338_v4 = vmul.f32 %v8323_v36, %v5337_v23  ;;  %v5314_v9 = vmul.f32 %v8319_v35, %v5313_v0  ;;  %v5340_v17 = vmul.f32 %v8323_v36, %v5335_v39  ;;  %v5383_v60 = vld [vmem:[#allocation5 + $0x568] sm:$0xff]  ;;  %v5382_v23 = vld [vmem:[#allocation5 + $0x560] sm:$0xff] }
 0x77b   :  { %v5316_v25 = vmul.f32 %v8319_v35, %v5311_v15  ;;  %v5322_v32 = vsel %vm186_vm2, %v5320_v47, %v5321_v48  ;;  %v5334_v22 = vsel %vm199_vm6, %v5332_v43, %v5333_v59  ;;  %v5310_v30 = vsel %vm173_vm1, %v5308_v44, %v5309_v61  ;;  %v5389_v48 = vld [vmem:[#allocation5 + $0x598] sm:$0xff]  ;;  %v5384_v59 = vld [vmem:[#allocation5 + $0x570] sm:$0xff] }
 0x77c   :  { %5498 = vmatprep.mubr.f32.mxu0 %v5326_v19  ;;  %5584 = vmatmul.mubr.f32.vlgmr.msra.gmra.mxu1 %v5338_v4  ;;  %v5372_v49 = vsel %vm238_vm9, %v5366_v26, %v5367_v16  ;;  %v5360_v37 = vsel %vm225_vm10, %v5354_v11, %v5355_v33  ;;  %v5368_v61 = vrot.slane %v9100_v62, 3  ;;  %v5369_v0 = vrot.slane %v9089_v51, 3  ;;  %v5926_v15 = vld [vmem:[#allocation5 + $0x7b8] sm:$0xff] }
 0x77d   :  { %7874 = vmatpush3.xpose.msra.mxu1 %v8974_v46  ;;  %5499 = vmatmul.mubr.f32.vlgmr.msra.gmra.mxu0 %v5314_v9  ;;  %v5336_v46 = vsel %vm199_vm6, %v5330_v58, %v5331_v7  ;;  %v5390_v58 = vld [vmem:[#allocation5 + $0x5a0] sm:$0xff]  ;;  %v5356_v19 = vrot.slane %v9100_v62, 2  ;;  %v5343_v4 = vrot.slane %v9091_v53, 1  ;;  %v5344_v7 = vrot.slane %v9100_v62, 1 }
 0x77e   :  { %5588 = vmatprep.mubr.f32.mxu1 %v9091_v53  ;;  %5621 = vmatpush1.xpose.msra.mxu0 %v5431_v6  ;;  %v5371_v63 = vsel %vm238_vm9, %v5367_v16, %v5368_v61  ;;  %v5342_v6 = vrot.slane %v9034_v14, 1  ;;  %v5370_v53 = vsel %vm238_vm9, %v5368_v61, %v5369_v0  ;;  %v5357_v14 = vrot.slane %v9089_v51, 2  ;;  %v5912_v16 = vld [vmem:[#allocation5 + $0x748] sm:$0xff] }
 0x77f   :  { %5503 = vmatprep.mubr.f32.mxu0 %v5324_v45  ;;  %7875 = vmatprep.subr.mxu1 %v5426_v50  ;;  %v5359_v9 = vsel %vm225_vm10, %v5355_v33, %v5356_v19  ;;  %v5375_v2 = vmul.f32 %v8330_v40, %v5371_v63  ;;  %v5345_v45 = vrot.slane %v9089_v51, 1  ;;  %v5906_v33 = vld [vmem:[#allocation5 + $0x718] sm:$0xff] }
 0x780   :  { %5589 = vmatmul.mubr.f32.gmra.mxu1 %v5336_v46  ;;  %5622 = vmatprep.subr.mxu0 %v5425_v42  ;;  %v5348_v8 = vsel %vm212_vm11, %v5342_v6, %v5343_v4  ;;  %v5363_v47 = vmul.f32 %v8367_v3, %v5359_v9  ;;  %v5347_v42 = vsel %vm212_vm11, %v5343_v4, %v5344_v7 }
 0x781   :  { %7876 = vmatpush3.xpose.msra.mxu1 %v5426_v50  ;;  %5504 = vmatmul.mubr.f32.gmra.mxu0 %v5312_v41  ;;  %v5373_v50 = vsel %vm238_vm9, %v5369_v0, %v5366_v26  ;;  %v5351_v43 = vmul.f32 %v8373_v5, %v5347_v42  ;;  %v5358_v12 = vsel %vm225_vm10, %v5356_v19, %v5357_v14  ;;  %v5927_v41 = vld [vmem:[#allocation5 + $0x7c0] sm:$0xff] }
 0x782   :  { %5593 = vmatprep.mubr.f32.mxu1 %v9100_v62  ;;  %5623 = vmatpush1.xpose.msra.mxu0 %v5424_v13  ;;  %v5377_v62 = vmul.f32 %v8330_v40, %v5373_v50  ;;  %v5361_v44 = vsel %vm225_vm10, %v5357_v14, %v5354_v11  ;;  %v5346_v46 = vsel %vm212_vm11, %v5344_v7, %v5345_v45  ;;  %v5903_v26 = vld [vmem:[#allocation5 + $0x700] sm:$0xff]  ;;  %v5929_v11 = vld [vmem:[#allocation5 + $0x7d0] sm:$0xff] }
 0x783   :  { %5508 = vmatprep.mubr.f32.mxu0 %v5328_v55  ;;  %7877 = vmatprep.subr.mxu1 %v5419_v57  ;;  %v5365_v13 = vmul.f32 %v8367_v3, %v5361_v44  ;;  %v5349_v39 = vsel %vm212_vm11, %v5345_v45, %v5342_v6  ;;  %v5924_v55 = vld [vmem:[#allocation5 + $0x7a8] sm:$0xff] }
 0x784   :  { %5594 = vmatmul.mubr.f32.gmra.mxu1 %v5340_v17  ;;  %5624 = vmatprep.subr.mxu0 %v5418_v20  ;;  %v5920_v20 = vld [vmem:[#allocation5 + $0x788] sm:$0xff]  ;;  %v5918_v17 = vld [vmem:[#allocation5 + $0x778] sm:$0xff] }
 0x785   :  { %7878 = vmatpush3.xpose.msra.mxu1 %v5419_v57  ;;  %5509 = vmatmul.mubr.f32.gmra.mxu0 %v5316_v25  ;;  %v5925_v57 = vld [vmem:[#allocation5 + $0x7b0] sm:$0xff]  ;;  %v5919_v25 = vld [vmem:[#allocation5 + $0x780] sm:$0xff] }
 0x786   :  { %5598 = vmatprep.mubr.f32.mxu1 %v9089_v51  ;;  %5625 = vmatpush1.xpose.msra.mxu0 %v5417_v27  ;;  %v5353_v51 = vmul.f32 %v8373_v5, %v5349_v39  ;;  %v5917_v27 = vld [vmem:[#allocation5 + $0x770] sm:$0xff] }
 0x787   :  { %5513 = vmatprep.mubr.f32.mxu0 %v5322_v32  ;;  %7879 = vmatprep.subr.mxu1 %v5412_v28  ;;  %v5910_v32 = vld [vmem:[#allocation5 + $0x738] sm:$0xff] }
 0x788   :  { %5599 = vmatmul.mubr.f32.gmra.mxu1 %v5334_v22  ;;  %5626 = vmatprep.subr.mxu0 %v5411_v21  ;;  %v5911_v21 = vld [vmem:[#allocation5 + $0x740] sm:$0xff]  ;;  %v5904_v22 = vld [vmem:[#allocation5 + $0x708] sm:$0xff] }
 0x789   :  { %7880 = vmatpush3.xpose.msra.mxu1 %v5412_v28  ;;  %5514 = vmatmul.mubr.f32.gmra.mxu0 %v5310_v30  ;;  %v5913_v28 = vld [vmem:[#allocation5 + $0x750] sm:$0xff]  ;;  %v9188_v30 = vld [vmem:[#allocation5 + $0x7d8] sm:$0xff] }
 0x78a   :  { %5627 = vmatpush1.xpose.msra.mxu0 %v5410_v24  ;;  %7889 = vmatprep.mubr.f32.mxu1 %v5372_v49  ;;  %v5905_v24 = vld [vmem:[#allocation5 + $0x710] sm:$0xff] }
 0x78b   :  { %5668 = vmatprep.mubr.f32.mxu0 %v5360_v37  ;;  %7881 = vmatprep.subr.mxu1 %v5405_v34 }
 0x78c   :  { %5628 = vmatprep.subr.mxu0 %v5404_v54 }
 0x78d   :  { %7882 = vmatpush3.xpose.msra.mxu1 %v5405_v34 }
 0x78e   :  { %5629 = vmatpush1.xpose.msra.mxu0 %v5403_v10  ;;  %7883 = vmatprep.subr.mxu1 %v5398_v52 }
 0x78f   :  { %5630 = vmatprep.subr.mxu0 %v5397_v38 }
 0x791   :  { %7884 = vmatpush3.xpose.msra.mxu1 %v5398_v52 }
 0x792   :  { %5631 = vmatpush1.xpose.msra.mxu0 %v5396_v31  ;;  %7885 = vmatprep.subr.mxu1 %v5391_v56 }
 0x793   :  { %5632 = vmatprep.subr.mxu0 %v5390_v58 }
 0x795   :  { %7886 = vmatpush3.xpose.msra.mxu1 %v5391_v56 }
 0x796   :  { %5633 = vmatpush1.xpose.msra.mxu0 %v5389_v48  ;;  %7887 = vmatprep.subr.mxu1 %v5384_v59 }
 0x797   :  { %5634 = vmatprep.subr.mxu0 %v5383_v60 }
 0x799   :  { %7888 = vmatpush3.xpose.msra.mxu1 %v5384_v59 }
 0x79a   :  { %5635 = vmatpush1.xpose.msra.mxu0 %v5382_v23  ;;  %6040 = vmatprep.subr.mxu1 %v5927_v41 }
 0x79b   :  { %5955 = vmatprep.subr.mxu0 %v5925_v57 }
 0x79c   :  { %7890 = vmatmul.mubr.f32.vlgmr.msra.gmra.mxu1 %v5375_v2 }
 0x79d   :  { %5669 = vmatmul.mubr.f32.vlgmr.msra.gmra.mxu0 %v5348_v8  ;;  %7892 = vmatprep.mubr.f32.mxu1 %v5370_v53 }
 0x79e   :  { %5673 = vmatprep.mubr.f32.mxu0 %v5363_v47  ;;  %6041 = vmatpush1.xpose.msra.mxu1 %v5926_v15 }
 0x79f   :  { %5956 = vmatpush1.xpose.msra.mxu0 %v5924_v55  ;;  %6042 = vmatprep.subr.mxu1 %v5920_v20 }
 0x7a0   :  { %7893 = vmatmul.mubr.f32.gmra.mxu1 %v5377_v62  ;;  %5957 = vmatprep.subr.mxu0 %v5918_v17 }
 0x7a1   :  { %5674 = vmatmul.mubr.f32.gmra.mxu0 %v5351_v43 }
 0x7a2   :  { %5678 = vmatprep.mubr.f32.mxu0 %v5358_v12  ;;  %6043 = vmatpush1.xpose.msra.mxu1 %v5919_v25 }
 0x7a3   :  { %5958 = vmatpush1.xpose.msra.mxu0 %v5917_v27  ;;  %6044 = vmatprep.subr.mxu1 %v5913_v28 }
 0x7a4   :  { %5959 = vmatprep.subr.mxu0 %v5911_v21 }
 0x7a5   :  { %5679 = vmatmul.mubr.f32.gmra.mxu0 %v5346_v46 }
 0x7a6   :  { %5683 = vmatprep.mubr.f32.mxu0 %v5365_v13  ;;  %6045 = vmatpush1.xpose.msra.mxu1 %v5912_v16 }
 0x7a7   :  { %5960 = vmatpush1.xpose.msra.mxu0 %v5910_v32  ;;  %6046 = vmatprep.subr.mxu1 %v5906_v33 }
 0x7a8   :  { %5961 = vmatprep.subr.mxu0 %v5904_v22 }
 0x7a9   :  { %5684 = vmatmul.mubr.f32.gmra.mxu0 %v5353_v51 }
 0x7aa   :  { %6047 = vmatpush1.xpose.msra.mxu1 %v5905_v24 }
 0x7ab   :  { %5962 = vmatpush1.xpose.msra.mxu0 %v5903_v26  ;;  %7895 = vmatprep.subr.mxu1 %v9188_v30 }
 0x7ac   :  { %6125 = vmatprep.subr.mxu0 %v5929_v11 }
 0x83c   :  { %v5585_v34 = vpop.f32.mrf.mxu1 }
 0x83d   :  { %v5500_v49 = vpop.f32.mrf.mxu0 }
 0x83e   :  { %v5587_v54 = vpop.f32.mrf.mxu1  ;;  %v5586_v2 = vadd.f32 %v5585_v34, %v5500_v49 }
 0x83f   :  { %v5502_v37 = vpop.f32.mrf.mxu0 }
 0x840   :  { %v5590_v10 = vpop.f32.mrf.mxu1 }
 0x841   :  { %v5505_v52 = vpop.f32.mrf.mxu0 }
 0x842   :  { %v5592_v38 = vpop.f32.mrf.mxu1  ;;  %v5591_v6 = vadd.f32 %v5590_v10, %v5505_v52 }
 0x843   :  { %v5507_v31 = vpop.f32.mrf.mxu0 }
 0x844   :  { %v5595_v56 = vpop.f32.mrf.mxu1 }
 0x845   :  { %v5510_v58 = vpop.f32.mrf.mxu0 }
 0x846   :  { %v5597_v48 = vpop.f32.mrf.mxu1  ;;  %v5596_v42 = vadd.f32 %v5595_v56, %v5510_v58 }
 0x847   :  { %v5512_v59 = vpop.f32.mrf.mxu0 }
 0x848   :  { %v5600_v60 = vpop.f32.mrf.mxu1 }
 0x849   :  { %v5515_v61 = vpop.f32.mrf.mxu0 }
 0x84a   :  { %v5602_v63 = vpop.f32.mrf.mxu1  ;;  %v5601_v46 = vadd.f32 %v5600_v60, %v5515_v61 }
 0x84b   :  { %v5517_v23 = vpop.f32.mrf.mxu0 }
 0x85c   :  { %v7891_v0 = vpop.f32.mrf.mxu1 }
 0x85d   :  { %v5670_v19 = vpop.f32.mrf.mxu0 }
 0x85e   :  { %v5755_v4 = vpop.f32.mrf.mxu1  ;;  %v5671_v50 = vadd.f32 %v5670_v19, %v5586_v2 }
 0x85f   :  { %v5672_v9 = vpop.f32.mrf.mxu0 }
 0x860   :  { %v7894_v53 = vpop.f32.mrf.mxu1  ;;  %v5756_v43 = vadd.f32 %v5755_v4, %v5671_v50  ;;  %v5778_v4 = vld [vmem:[#allocation10 + $0x4] sm:$0x1] }
 0x861   :  { %v5675_v7 = vpop.f32.mrf.mxu0 }
 0x862   :  { %v5676_v8 = vadd.f32 %v5675_v7, %v5591_v6  ;;  %v5765_v12 = vpop.f32.mrf.mxu1  ;;  %v5774_v41 = vsel %vm1639_vm13, %v5756_v43, 0.0  ;;  %v7548_v7 = vld [vmem:[#allocation10 + $0xb] ss:$0 sm:$0xff] }
 0x863   :  { %v5677_v47 = vpop.f32.mrf.mxu0 }
 0x864   :  { %v5761_v14 = vadd.f32 %v7891_v0, %v5676_v8 }
 0x865   :  { %v5680_v62 = vpop.f32.mrf.mxu0 }
 0x866   :  { %v5681_v45 = vadd.f32 %v5680_v62, %v5596_v42  ;;  %v5775_v13 = vsel %vm1639_vm13, %v5761_v14, 0.0 }
 0x867   :  { %v5682_v44 = vpop.f32.mrf.mxu0  ;;  %v5780_v55 = vadd.f32 %v5775_v13, %v5774_v41 }
 0x868   :  { %v5766_v39 = vadd.f32 %v5765_v12, %v5681_v45 }
 0x869   :  { %v5685_v51 = vpop.f32.mrf.mxu0 }
 0x86a   :  { %v5776_v57 = vsel %vm1639_vm13, %v5766_v39, 0.0  ;;  %v5686_v15 = vadd.f32 %v5685_v51, %v5601_v46 }
 0x86b   :  { %v5687_v20 = vpop.f32.mrf.mxu0  ;;  %v5781_v25 = vadd.f32 %v5780_v55, %v5776_v57 }
 0x86c   :  { %v5771_v17 = vadd.f32 %v7894_v53, %v5686_v15 }
 0x86e   :  { %v5777_v27 = vsel %vm1639_vm13, %v5771_v17, 0.0 }
 0x86f   :  { %v5782_v28 = vadd.f32 %v5781_v25, %v5777_v27 }
 0x871   :  { %v5783_v21 = vrot.slane %v5782_v28, 4 }
 0x873   :  { %v5784_v16 = vadd.f32 %v5783_v21, %v5782_v28 }
 0x875   :  { %v5785_v32 = vrot.slane %v5784_v16, 2 }
 0x877   :  { %v5786_v33 = vadd.f32 %v5785_v32, %v5784_v16 }
 0x879   :  { %v5787_v22 = vrot.slane %v5786_v33, 1 }
 0x87b   :  { %v5788_v24 = vadd.f32 %v5787_v22, %v5786_v33  ;;  %v5928_v33 = vld [vmem:[#allocation5 + $0x7c8] sm:$0xff]  ;;  %v5923_v22 = vld [vmem:[#allocation5 + $0x7a0] sm:$0xff] }
 0x87d   :  { %v5789_v26 = vmul.f32 0.03125, %v5788_v24 }
 0x87f   :  { %v5790_v11 = vsub.f32 %v5774_v41, %v5789_v26  ;;  %v5791_v34 = vsub.f32 %v5775_v13, %v5789_v26  ;;  %v5792_v49 = vsub.f32 %v5776_v57, %v5789_v26  ;;  %v5793_v54 = vsub.f32 %v5777_v27, %v5789_v26 }
 0x881   :  { %v5794_v37 = vmul.f32 %v5790_v11, %v5790_v11  ;;  %v5795_v10 = vmul.f32 %v5791_v34, %v5791_v34  ;;  %v5796_v52 = vmul.f32 %v5792_v49, %v5792_v49  ;;  %v5797_v31 = vmul.f32 %v5793_v54, %v5793_v54 }
 0x883   :  { %v5798_v38 = vadd.f32 %v5795_v10, %v5794_v37 }
 0x885   :  { %v5799_v56 = vadd.f32 %v5798_v38, %v5796_v52 }
 0x887   :  { %v5800_v58 = vadd.f32 %v5799_v56, %v5797_v31  ;;  %v5921_v31 = vld [vmem:[#allocation5 + $0x790] sm:$0xff]  ;;  %v5916_v56 = vld [vmem:[#allocation5 + $0x768] sm:$0xff] }
 0x889   :  { %v5801_v48 = vrot.slane %v5800_v58, 4 }
 0x88b   :  { %v5802_v59 = vadd.f32 %v5801_v48, %v5800_v58  ;;  %v5915_v58 = vld [vmem:[#allocation5 + $0x760] sm:$0xff] }
 0x88d   :  { %v5803_v60 = vrot.slane %v5802_v59, 2 }
 0x88f   :  { %v5804_v61 = vadd.f32 %v5803_v60, %v5802_v59  ;;  %v5914_v60 = vld [vmem:[#allocation5 + $0x758] sm:$0xff] }
 0x891   :  { %v5805_v63 = vrot.slane %v5804_v61, 1 }
 0x893   :  { %v5806_v23 = vadd.f32 %v5805_v63, %v5804_v61  ;;  %v5909_v61 = vld [vmem:[#allocation5 + $0x730] sm:$0xff] }
 0x895   :  { %v5807_v0 = vmul.f32 0.03125, %v5806_v23 }
 0x897   :  { %v5808_v19 = vadd.f32 1e-05, %v5807_v0 }
 0x899   :  { %8083 = vrsqrt.f32 %v5808_v19 }
 0x8a6   :  { %v8084_v9 = vpop.eup %8083 }
 0x8a7   :  { %v5810_v2 = vmul.f32 %v8084_v9, %v5778_v4  ;;  %v5908_v4 = vld [vmem:[#allocation5 + $0x728] sm:$0xff] }
 0x8a9   :  { %v5814_v6 = vrot.slane %v5810_v2, %v8499_v29 }
 0x8ab   :  { %v5815_v50 = vmul.f32 %v5814_v6, %v5790_v11  ;;  %v5816_v8 = vmul.f32 %v5814_v6, %v5791_v34  ;;  %v5817_v53 = vmul.f32 %v5814_v6, %v5792_v49  ;;  %v5818_v47 = vmul.f32 %v5814_v6, %v5793_v54  ;;  %v5922_v49 = vld [vmem:[#allocation5 + $0x798] sm:$0xff] }
 0x8ad   :  { %v5823_v42 = vadd.f32 %v7548_v7, %v5815_v50  ;;  %v5824_v14 = vadd.f32 %v7548_v7, %v5816_v8  ;;  %v5825_v62 = vadd.f32 %v7548_v7, %v5817_v53  ;;  %v5826_v43 = vadd.f32 %v7548_v7, %v5818_v47  ;;  %v5907_v47 = vld [vmem:[#allocation5 + $0x720] sm:$0xff] }
 0x8af   :  { %v9196_v45 = vmax.f32 %v5823_v42, 0.0  ;;  %v9198_v12 = vmax.f32 %v5824_v14, 0.0  ;;  %v9200_v44 = vmax.f32 %v5825_v62, 0.0  ;;  %v9202_v46 = vmax.f32 %v5826_v43, 0.0 }
 0x8b1   :  { %6080 = vmatprep.mubr.f32.mxu1 %v9196_v45  ;;  %v5843_v13 = vrot.slane %v9196_v45, 6  ;;  %v5846_v39 = vrot.slane %v9202_v46, 6  ;;  %v5855_v51 = vrot.slane %v9196_v45, 7  ;;  %v5858_v41 = vrot.slane %v9202_v46, 7 }
 0x8b2   :  { %v5831_v57 = vrot.slane %v9196_v45, 5  ;;  %v5834_v15 = vrot.slane %v9202_v46, 5  ;;  %v5844_v17 = vrot.slane %v9198_v12, 6  ;;  %v5845_v25 = vrot.slane %v9200_v44, 6 }
 0x8b3   :  { %v5850_v55 = vsel %vm186_vm2, %v5846_v39, %v5843_v13  ;;  %v5862_v20 = vsel %vm199_vm6, %v5858_v41, %v5855_v51  ;;  %v5856_v32 = vrot.slane %v9198_v12, 7  ;;  %v5832_v24 = vrot.slane %v9198_v12, 5 }
 0x8b4   :  { %v5851_v27 = vmul.f32 %v8291_v18, %v5850_v55  ;;  %v5863_v28 = vmul.f32 %v8323_v36, %v5862_v20  ;;  %v5838_v21 = vsel %vm173_vm1, %v5834_v15, %v5831_v57  ;;  %v5857_v26 = vrot.slane %v9200_v44, 7 }
 0x8b5   :  { %v5839_v16 = vmul.f32 %v8319_v35, %v5838_v21  ;;  %v5833_v11 = vrot.slane %v9200_v44, 5  ;;  %v5849_v34 = vsel %vm186_vm2, %v5843_v13, %v5844_v17  ;;  %v5848_v54 = vsel %vm186_vm2, %v5844_v17, %v5845_v25 }
 0x8b6   :  { %5995 = vmatprep.mubr.f32.mxu0 %v5851_v27  ;;  %6081 = vmatmul.mubr.f32.vlgmr.msra.gmra.mxu1 %v5863_v28  ;;  %v5861_v37 = vsel %vm199_vm6, %v5855_v51, %v5856_v32  ;;  %v5860_v10 = vsel %vm199_vm6, %v5856_v32, %v5857_v26  ;;  %v5837_v52 = vsel %vm173_vm1, %v5831_v57, %v5832_v24  ;;  %v5891_v63 = vrot.slane %v9196_v45, 3  ;;  %v6424_v32 = vld [vmem:[#allocation5 + $0x8a0] sm:$0xff] }
 0x8b7   :  { %5996 = vmatmul.mubr.f32.vlgmr.msra.gmra.mxu0 %v5839_v16  ;;  %6085 = vmatprep.mubr.f32.mxu1 %v9198_v12  ;;  %v5853_v38 = vmul.f32 %v8291_v18, %v5848_v54  ;;  %v5865_v48 = vmul.f32 %v8323_v36, %v5860_v10  ;;  %v5892_v23 = vrot.slane %v9198_v12, 3  ;;  %v5893_v0 = vrot.slane %v9200_v44, 3  ;;  %v6410_v54 = vld [vmem:[#allocation5 + $0x830] sm:$0xff]  ;;  %v6409_v10 = vld [vmem:[#allocation5 + $0x828] sm:$0xff] }
 0x8b8   :  { %7896 = vmatpush3.xpose.msra.mxu1 %v9188_v30  ;;  %6000 = vmatprep.mubr.f32.mxu0 %v5849_v34  ;;  %v5836_v30 = vsel %vm173_vm1, %v5832_v24, %v5833_v11  ;;  %v5847_v19 = vsel %vm186_vm2, %v5845_v25, %v5846_v39  ;;  %v5879_v9 = vrot.slane %v9196_v45, 2  ;;  %v5880_v2 = vrot.slane %v9198_v12, 2  ;;  %v6421_v24 = vld [vmem:[#allocation5 + $0x888] sm:$0xff]  ;;  %v6416_v34 = vld [vmem:[#allocation5 + $0x860] sm:$0xff] }
 0x8b9   :  { %6126 = vmatpush1.xpose.msra.mxu0 %v5928_v33  ;;  %7897 = vmatprep.subr.mxu1 %v5923_v22  ;;  %v5841_v59 = vmul.f32 %v8319_v35, %v5836_v30  ;;  %v5881_v6 = vrot.slane %v9200_v44, 2  ;;  %v5859_v7 = vsel %vm199_vm6, %v5857_v26, %v5858_v41  ;;  %v5835_v50 = vsel %vm173_vm1, %v5833_v11, %v5834_v15  ;;  %v6422_v33 = vld [vmem:[#allocation5 + $0x890] sm:$0xff]  ;;  %v6417_v26 = vld [vmem:[#allocation5 + $0x868] sm:$0xff]  ;;  %v6415_v11 = vld [vmem:[#allocation5 + $0x858] sm:$0xff] }
 0x8ba   :  { %6086 = vmatmul.mubr.f32.gmra.mxu1 %v5861_v37  ;;  %6127 = vmatprep.subr.mxu0 %v5922_v49  ;;  %v5896_v8 = vsel %vm238_vm9, %v5892_v23, %v5893_v0  ;;  %v5897_v53 = vsel %vm238_vm9, %v5891_v63, %v5892_v23  ;;  %v5894_v42 = vrot.slane %v9202_v46, 3  ;;  %v5885_v14 = vsel %vm225_vm10, %v5879_v9, %v5880_v2  ;;  %v6414_v49 = vld [vmem:[#allocation5 + $0x850] sm:$0xff]  ;;  %v6408_v37 = vld [vmem:[#allocation5 + $0x820] sm:$0xff] }
 0x8bb   :  { %6001 = vmatmul.mubr.f32.gmra.mxu0 %v5837_v52  ;;  %6090 = vmatprep.mubr.f32.mxu1 %v9200_v44  ;;  %v5867_v62 = vrot.slane %v9196_v45, 1  ;;  %v5868_v43 = vrot.slane %v9198_v12, 1  ;;  %v5869_v13 = vrot.slane %v9200_v44, 1  ;;  %v5884_v39 = vsel %vm225_vm10, %v5880_v2, %v5881_v6  ;;  %v6407_v52 = vld [vmem:[#allocation5 + $0x818] sm:$0xff]  ;;  %v6400_v30 = vld [vmem:[#allocation5 + $0x7e0] sm:$0xff] }
 0x8bc   :  { %7898 = vmatpush3.xpose.msra.mxu1 %v5923_v22  ;;  %6005 = vmatprep.mubr.f32.mxu0 %v5853_v38  ;;  %v5900_v51 = vmul.f32 %v8330_v40, %v5896_v8  ;;  %v5898_v41 = vsel %vm238_vm9, %v5894_v42, %v5891_v63  ;;  %v5895_v45 = vsel %vm238_vm9, %v5893_v0, %v5894_v42  ;;  %v5882_v15 = vrot.slane %v9202_v46, 2  ;;  %v6423_v22 = vld [vmem:[#allocation5 + $0x898] sm:$0xff] }
 0x8bd   :  { %6128 = vmatpush1.xpose.msra.mxu0 %v5921_v31  ;;  %7899 = vmatprep.subr.mxu1 %v5916_v56  ;;  %v5873_v57 = vsel %vm212_vm11, %v5867_v62, %v5868_v43  ;;  %v5888_v12 = vmul.f32 %v8367_v3, %v5884_v39  ;;  %v5872_v44 = vsel %vm212_vm11, %v5868_v43, %v5869_v13  ;;  %v5870_v17 = vrot.slane %v9202_v46, 1  ;;  %v6403_v38 = vld [vmem:[#allocation5 + $0x7f8] sm:$0xff]  ;;  %v6401_v31 = vld [vmem:[#allocation5 + $0x7e8] sm:$0xff] }
 0x8be   :  { %6091 = vmatmul.mubr.f32.gmra.mxu1 %v5865_v48  ;;  %6129 = vmatprep.subr.mxu0 %v5915_v58  ;;  %v5902_v55 = vmul.f32 %v8330_v40, %v5898_v41  ;;  %v5876_v20 = vmul.f32 %v8373_v5, %v5872_v44  ;;  %v5883_v25 = vsel %vm225_vm10, %v5881_v6, %v5882_v15  ;;  %v9301_v58 = vld [vmem:[#allocation5 + $0x8b8] sm:$0xff]  ;;  %v6426_v48 = vld [vmem:[#allocation5 + $0x8b0] sm:$0xff] }
 0x8bf   :  { %6006 = vmatmul.mubr.f32.gmra.mxu0 %v5841_v59  ;;  %6095 = vmatprep.mubr.f32.mxu1 %v9202_v46  ;;  %v5886_v27 = vsel %vm225_vm10, %v5882_v15, %v5879_v9  ;;  %v5871_v28 = vsel %vm212_vm11, %v5869_v13, %v5870_v17  ;;  %v5874_v16 = vsel %vm212_vm11, %v5870_v17, %v5867_v62 }
 0x8c0   :  { %7900 = vmatpush3.xpose.msra.mxu1 %v5916_v56  ;;  %6010 = vmatprep.mubr.f32.mxu0 %v5847_v19  ;;  %v5890_v21 = vmul.f32 %v8367_v3, %v5886_v27  ;;  %v5878_v46 = vmul.f32 %v8373_v5, %v5874_v16  ;;  %v6402_v56 = vld [vmem:[#allocation5 + $0x7f0] sm:$0xff] }
 0x8c1   :  { %6130 = vmatpush1.xpose.msra.mxu0 %v5914_v60  ;;  %7901 = vmatprep.subr.mxu1 %v5909_v61 }
 0x8c2   :  { %6096 = vmatmul.mubr.f32.gmra.mxu1 %v5859_v7  ;;  %6131 = vmatprep.subr.mxu0 %v5908_v4 }
 0x8c3   :  { %6011 = vmatmul.mubr.f32.gmra.mxu0 %v5835_v50  ;;  %7903 = vmatprep.mubr.f32.mxu1 %v5897_v53 }
 0x8c4   :  { %7902 = vmatpush3.xpose.msra.mxu1 %v5909_v61  ;;  %6165 = vmatprep.mubr.f32.mxu0 %v5885_v14 }
 0x8c5   :  { %6132 = vmatpush1.xpose.msra.mxu0 %v5907_v47  ;;  %6537 = vmatprep.subr.mxu1 %v6424_v32 }
 0x8c6   :  { %6452 = vmatprep.subr.mxu0 %v6422_v33 }
 0x8c7   :  { %7904 = vmatmul.mubr.f32.vlgmr.msra.gmra.mxu1 %v5900_v51 }
 0x8c8   :  { %6166 = vmatmul.mubr.f32.vlgmr.msra.gmra.mxu0 %v5873_v57  ;;  %7906 = vmatprep.mubr.f32.mxu1 %v5895_v45 }
 0x8c9   :  { %6170 = vmatprep.mubr.f32.mxu0 %v5888_v12  ;;  %6538 = vmatpush1.xpose.msra.mxu1 %v6423_v22 }
 0x8ca   :  { %6453 = vmatpush1.xpose.msra.mxu0 %v6421_v24  ;;  %6539 = vmatprep.subr.mxu1 %v6417_v26 }
 0x8cb   :  { %7907 = vmatmul.mubr.f32.gmra.mxu1 %v5902_v55  ;;  %6454 = vmatprep.subr.mxu0 %v6415_v11 }
 0x8cc   :  { %6171 = vmatmul.mubr.f32.gmra.mxu0 %v5876_v20 }
 0x8cd   :  { %6175 = vmatprep.mubr.f32.mxu0 %v5883_v25  ;;  %6540 = vmatpush1.xpose.msra.mxu1 %v6416_v34 }
 0x8ce   :  { %6455 = vmatpush1.xpose.msra.mxu0 %v6414_v49  ;;  %6541 = vmatprep.subr.mxu1 %v6410_v54 }
 0x8cf   :  { %6456 = vmatprep.subr.mxu0 %v6408_v37 }
 0x8d0   :  { %6176 = vmatmul.mubr.f32.gmra.mxu0 %v5871_v28 }
 0x8d1   :  { %6180 = vmatprep.mubr.f32.mxu0 %v5890_v21  ;;  %6542 = vmatpush1.xpose.msra.mxu1 %v6409_v10 }
 0x8d2   :  { %6457 = vmatpush1.xpose.msra.mxu0 %v6407_v52  ;;  %6543 = vmatprep.subr.mxu1 %v6403_v38 }
 0x8d3   :  { %6458 = vmatprep.subr.mxu0 %v6401_v31 }
 0x8d4   :  { %6181 = vmatmul.mubr.f32.gmra.mxu0 %v5878_v46 }
 0x8d5   :  { %6544 = vmatpush1.xpose.msra.mxu1 %v6402_v56 }
 0x8d6   :  { %6459 = vmatpush1.xpose.msra.mxu0 %v6400_v30  ;;  %7909 = vmatprep.subr.mxu1 %v9301_v58 }
 0x8d7   :  { %6622 = vmatprep.subr.mxu0 %v6426_v48 }
 0x976   :  { %v6082_v59 = vpop.f32.mrf.mxu1 }
 0x977   :  { %v5997_v60 = vpop.f32.mrf.mxu0 }
 0x978   :  { %v6084_v61 = vpop.f32.mrf.mxu1  ;;  %v6083_v13 = vadd.f32 %v6082_v59, %v5997_v60 }
 0x979   :  { %v5999_v63 = vpop.f32.mrf.mxu0 }
 0x97a   :  { %v6087_v23 = vpop.f32.mrf.mxu1 }
 0x97b   :  { %v6002_v0 = vpop.f32.mrf.mxu0 }
 0x97c   :  { %v6089_v19 = vpop.f32.mrf.mxu1  ;;  %v6088_v39 = vadd.f32 %v6087_v23, %v6002_v0 }
 0x97d   :  { %v6004_v4 = vpop.f32.mrf.mxu0 }
 0x97e   :  { %v6092_v9 = vpop.f32.mrf.mxu1 }
 0x97f   :  { %v6007_v2 = vpop.f32.mrf.mxu0 }
 0x980   :  { %v6094_v6 = vpop.f32.mrf.mxu1  ;;  %v6093_v44 = vadd.f32 %v6092_v9, %v6007_v2 }
 0x981   :  { %v6009_v7 = vpop.f32.mrf.mxu0 }
 0x982   :  { %v6097_v50 = vpop.f32.mrf.mxu1 }
 0x983   :  { %v6012_v8 = vpop.f32.mrf.mxu0 }
 0x984   :  { %v6099_v53 = vpop.f32.mrf.mxu1  ;;  %v6098_v28 = vadd.f32 %v6097_v50, %v6012_v8 }
 0x985   :  { %v6014_v47 = vpop.f32.mrf.mxu0 }
 0x987   :  { %v7905_v42 = vpop.f32.mrf.mxu1 }
 0x988   :  { %v6167_v14 = vpop.f32.mrf.mxu0 }
 0x989   :  { %v6252_v62 = vpop.f32.mrf.mxu1  ;;  %v6168_v41 = vadd.f32 %v6167_v14, %v6083_v13 }
 0x98a   :  { %v6169_v43 = vpop.f32.mrf.mxu0 }
 0x98b   :  { %v7908_v45 = vpop.f32.mrf.mxu1  ;;  %v6253_v20 = vadd.f32 %v6252_v62, %v6168_v41  ;;  %v6275_v62 = vld [vmem:[#allocation10 + $0x5] sm:$0x1] }
 0x98c   :  { %v6172_v51 = vpop.f32.mrf.mxu0 }
 0x98d   :  { %v6173_v57 = vadd.f32 %v6172_v51, %v6088_v39  ;;  %v6262_v25 = vpop.f32.mrf.mxu1  ;;  %v6271_v32 = vsel %vm615_vm12, %v6253_v20, 0.0  ;;  %v7549_v51 = vld [vmem:[#allocation10 + $0xc] ss:$0 sm:$0xff] }
 0x98e   :  { %v6174_v12 = vpop.f32.mrf.mxu0 }
 0x98f   :  { %v6258_v15 = vadd.f32 %v7905_v42, %v6173_v57 }
 0x990   :  { %v6177_v55 = vpop.f32.mrf.mxu0 }
 0x991   :  { %v6178_v17 = vadd.f32 %v6177_v55, %v6093_v44  ;;  %v6272_v21 = vsel %vm615_vm12, %v6258_v15, 0.0 }
 0x992   :  { %v6179_v27 = vpop.f32.mrf.mxu0  ;;  %v6277_v24 = vadd.f32 %v6272_v21, %v6271_v32 }
 0x993   :  { %v6263_v16 = vadd.f32 %v6262_v25, %v6178_v17 }
 0x994   :  { %v6182_v46 = vpop.f32.mrf.mxu0 }
 0x995   :  { %v6273_v33 = vsel %vm615_vm12, %v6263_v16, 0.0  ;;  %v6183_v22 = vadd.f32 %v6182_v46, %v6098_v28 }
 0x996   :  { %v6184_v26 = vpop.f32.mrf.mxu0  ;;  %v6278_v34 = vadd.f32 %v6277_v24, %v6273_v33 }
 0x997   :  { %v6268_v11 = vadd.f32 %v7908_v45, %v6183_v22 }
 0x999   :  { %v6274_v49 = vsel %vm615_vm12, %v6268_v11, 0.0 }
 0x99a   :  { %v6279_v54 = vadd.f32 %v6278_v34, %v6274_v49 }
 0x99c   :  { %v6280_v37 = vrot.slane %v6279_v54, 4 }
 0x99e   :  { %v6281_v10 = vadd.f32 %v6280_v37, %v6279_v54 }
 0x9a0   :  { %v6282_v52 = vrot.slane %v6281_v10, 2 }
 0x9a2   :  { %v6283_v38 = vadd.f32 %v6282_v52, %v6281_v10 }
 0x9a4   :  { %v6284_v31 = vrot.slane %v6283_v38, 1 }
 0x9a6   :  { %v6285_v56 = vadd.f32 %v6284_v31, %v6283_v38  ;;  %v6425_v38 = vld [vmem:[#allocation5 + $0x8a8] sm:$0xff]  ;;  %v6420_v31 = vld [vmem:[#allocation5 + $0x880] sm:$0xff] }
 0x9a8   :  { %v6286_v30 = vmul.f32 0.03125, %v6285_v56 }
 0x9aa   :  { %v6287_v48 = vsub.f32 %v6271_v32, %v6286_v30  ;;  %v6288_v59 = vsub.f32 %v6272_v21, %v6286_v30  ;;  %v6289_v60 = vsub.f32 %v6273_v33, %v6286_v30  ;;  %v6290_v61 = vsub.f32 %v6274_v49, %v6286_v30 }
 0x9ac   :  { %v6291_v63 = vmul.f32 %v6287_v48, %v6287_v48  ;;  %v6292_v23 = vmul.f32 %v6288_v59, %v6288_v59  ;;  %v6293_v0 = vmul.f32 %v6289_v60, %v6289_v60  ;;  %v6294_v4 = vmul.f32 %v6290_v61, %v6290_v61 }
 0x9ae   :  { %v6295_v19 = vadd.f32 %v6292_v23, %v6291_v63 }
 0x9b0   :  { %v6296_v9 = vadd.f32 %v6295_v19, %v6293_v0 }
 0x9b2   :  { %v6297_v2 = vadd.f32 %v6296_v9, %v6294_v4  ;;  %v6418_v4 = vld [vmem:[#allocation5 + $0x870] sm:$0xff]  ;;  %v6413_v9 = vld [vmem:[#allocation5 + $0x848] sm:$0xff] }
 0x9b4   :  { %v6298_v6 = vrot.slane %v6297_v2, 4 }
 0x9b6   :  { %v6299_v7 = vadd.f32 %v6298_v6, %v6297_v2  ;;  %v6412_v2 = vld [vmem:[#allocation5 + $0x840] sm:$0xff] }
 0x9b8   :  { %v6300_v50 = vrot.slane %v6299_v7, 2 }
 0x9ba   :  { %v6301_v8 = vadd.f32 %v6300_v50, %v6299_v7  ;;  %v6411_v50 = vld [vmem:[#allocation5 + $0x838] sm:$0xff] }
 0x9bc   :  { %v6302_v53 = vrot.slane %v6301_v8, 1 }
 0x9be   :  { %v6303_v47 = vadd.f32 %v6302_v53, %v6301_v8  ;;  %v6406_v8 = vld [vmem:[#allocation5 + $0x810] sm:$0xff] }
 0x9c0   :  { %v6304_v42 = vmul.f32 0.03125, %v6303_v47 }
 0x9c2   :  { %v6305_v14 = vadd.f32 1e-05, %v6304_v42 }
 0x9c4   :  { %8085 = vrsqrt.f32 %v6305_v14 }
 0x9d1   :  { %v8086_v43 = vpop.eup %8085 }
 0x9d2   :  { %v6307_v13 = vmul.f32 %v8086_v43, %v6275_v62  ;;  %v6405_v62 = vld [vmem:[#allocation5 + $0x808] sm:$0xff] }
 0x9d4   :  { %v6311_v39 = vrot.slane %v6307_v13, %v8499_v29 }
 0x9d6   :  { %v6312_v41 = vmul.f32 %v6311_v39, %v6287_v48  ;;  %v6313_v57 = vmul.f32 %v6311_v39, %v6288_v59  ;;  %v6314_v45 = vmul.f32 %v6311_v39, %v6289_v60  ;;  %v6315_v12 = vmul.f32 %v6311_v39, %v6290_v61  ;;  %v6419_v60 = vld [vmem:[#allocation5 + $0x878] sm:$0xff] }
 0x9d8   :  { %v6320_v44 = vadd.f32 %v7549_v51, %v6312_v41  ;;  %v6321_v15 = vadd.f32 %v7549_v51, %v6313_v57  ;;  %v6322_v55 = vadd.f32 %v7549_v51, %v6314_v45  ;;  %v6323_v20 = vadd.f32 %v7549_v51, %v6315_v12  ;;  %v6404_v12 = vld [vmem:[#allocation5 + $0x800] sm:$0xff] }
 0x9da   :  { %v9309_v17 = vmax.f32 %v6320_v44, 0.0  ;;  %v9311_v25 = vmax.f32 %v6321_v15, 0.0  ;;  %v9313_v27 = vmax.f32 %v6322_v55, 0.0  ;;  %v9315_v28 = vmax.f32 %v6323_v20, 0.0 }
 0x9dc   :  { %6577 = vmatprep.mubr.f32.mxu1 %v9309_v17  ;;  %v6340_v21 = vrot.slane %v9309_v17, 6  ;;  %v6343_v16 = vrot.slane %v9315_v28, 6  ;;  %v6352_v46 = vrot.slane %v9309_v17, 7  ;;  %v6355_v32 = vrot.slane %v9315_v28, 7 }
 0x9dd   :  { %v6328_v33 = vrot.slane %v9309_v17, 5  ;;  %v6331_v22 = vrot.slane %v9315_v28, 5  ;;  %v6341_v11 = vrot.slane %v9311_v25, 6  ;;  %v6342_v34 = vrot.slane %v9313_v27, 6 }
 0x9de   :  { %v6347_v24 = vsel %vm186_vm2, %v6343_v16, %v6340_v21  ;;  %v6359_v26 = vsel %vm199_vm6, %v6355_v32, %v6352_v46  ;;  %v6353_v52 = vrot.slane %v9311_v25, 7  ;;  %v6329_v56 = vrot.slane %v9311_v25, 5 }
 0x9df   :  { %v6348_v49 = vmul.f32 %v8291_v18, %v6347_v24  ;;  %v6360_v54 = vmul.f32 %v8323_v36, %v6359_v26  ;;  %v6335_v37 = vsel %vm173_vm1, %v6331_v22, %v6328_v33  ;;  %v6354_v30 = vrot.slane %v9313_v27, 7 }
 0x9e0   :  { %v6336_v10 = vmul.f32 %v8319_v35, %v6335_v37  ;;  %v6330_v48 = vrot.slane %v9313_v27, 5  ;;  %v6346_v59 = vsel %vm186_vm2, %v6340_v21, %v6341_v11  ;;  %v6345_v61 = vsel %vm186_vm2, %v6341_v11, %v6342_v34 }
 0x9e1   :  { %6492 = vmatprep.mubr.f32.mxu0 %v6348_v49  ;;  %6578 = vmatmul.mubr.f32.vlgmr.msra.gmra.mxu1 %v6360_v54  ;;  %v6358_v63 = vsel %vm199_vm6, %v6352_v46, %v6353_v52  ;;  %v6357_v23 = vsel %vm199_vm6, %v6353_v52, %v6354_v30  ;;  %v6334_v0 = vsel %vm173_vm1, %v6328_v33, %v6329_v56  ;;  %v6388_v53 = vrot.slane %v9309_v17, 3  ;;  %v6898_v52 = vld [vmem:[#allocation5 + $0x8c8] sm:$0xf] }
 0x9e2   :  { %6493 = vmatmul.mubr.f32.vlgmr.msra.gmra.mxu0 %v6336_v10  ;;  %6582 = vmatprep.mubr.f32.mxu1 %v9311_v25  ;;  %v6350_v19 = vmul.f32 %v8291_v18, %v6345_v61  ;;  %v6362_v6 = vmul.f32 %v8323_v36, %v6357_v23  ;;  %v6389_v47 = vrot.slane %v9311_v25, 3  ;;  %v6390_v42 = vrot.slane %v9313_v27, 3 }
 0x9e3   :  { %7910 = vmatpush3.xpose.msra.mxu1 %v9301_v58  ;;  %6497 = vmatprep.mubr.f32.mxu0 %v6346_v59  ;;  %v6333_v58 = vsel %vm173_vm1, %v6329_v56, %v6330_v48  ;;  %v6344_v14 = vsel %vm186_vm2, %v6342_v34, %v6343_v16  ;;  %v6376_v43 = vrot.slane %v9309_v17, 2  ;;  %v6377_v13 = vrot.slane %v9311_v25, 2  ;;  %v6899_v56 = vld [vmem:[#allocation5 + $0x8d0] sm:$0xf] }
 0x9e4   :  { %6623 = vmatpush1.xpose.msra.mxu0 %v6425_v38  ;;  %7911 = vmatprep.subr.mxu1 %v6420_v31  ;;  %v6338_v7 = vmul.f32 %v8319_v35, %v6333_v58  ;;  %v6378_v39 = vrot.slane %v9313_v27, 2  ;;  %v6356_v51 = vsel %vm199_vm6, %v6354_v30, %v6355_v32  ;;  %v6332_v41 = vsel %vm173_vm1, %v6330_v48, %v6331_v22  ;;  %v6900_v38 = vld [vmem:[#allocation5 + $0x8d8] sm:$0xf]  ;;  %v6902_v30 = vld [vmem:[#allocation5 + $0x8e8] sm:$0xf] }
 0x9e5   :  { %6583 = vmatmul.mubr.f32.gmra.mxu1 %v6358_v63  ;;  %6624 = vmatprep.subr.mxu0 %v6419_v60  ;;  %v6393_v57 = vsel %vm238_vm9, %v6389_v47, %v6390_v42  ;;  %v6394_v45 = vsel %vm238_vm9, %v6388_v53, %v6389_v47  ;;  %v6391_v44 = vrot.slane %v9315_v28, 3  ;;  %v6382_v15 = vsel %vm225_vm10, %v6376_v43, %v6377_v13  ;;  %v9414_v48 = vld [vmem:[#allocation5 + $0x8f0] sm:$0xf] }
 0x9e6   :  { %6498 = vmatmul.mubr.f32.gmra.mxu0 %v6334_v0  ;;  %6587 = vmatprep.mubr.f32.mxu1 %v9313_v27  ;;  %v6364_v55 = vrot.slane %v9309_v17, 1  ;;  %v6365_v20 = vrot.slane %v9311_v25, 1  ;;  %v6366_v21 = vrot.slane %v9313_v27, 1  ;;  %v6381_v16 = vsel %vm225_vm10, %v6377_v13, %v6378_v39 }
 0x9e7   :  { %7912 = vmatpush3.xpose.msra.mxu1 %v6420_v31  ;;  %6502 = vmatprep.mubr.f32.mxu0 %v6350_v19  ;;  %v6397_v46 = vmul.f32 %v8330_v40, %v6393_v57  ;;  %v6395_v32 = vsel %vm238_vm9, %v6391_v44, %v6388_v53  ;;  %v6392_v17 = vsel %vm238_vm9, %v6390_v42, %v6391_v44  ;;  %v6379_v22 = vrot.slane %v9315_v28, 2  ;;  %v6897_v31 = vld [vmem:[#allocation5 + $0x8c0] sm:$0xf] }
 0x9e8   :  { %6625 = vmatpush1.xpose.msra.mxu0 %v6418_v4  ;;  %7913 = vmatprep.subr.mxu1 %v6413_v9  ;;  %v6370_v33 = vsel %vm212_vm11, %v6364_v55, %v6365_v20  ;;  %v6385_v25 = vmul.f32 %v8367_v3, %v6381_v16  ;;  %v6369_v27 = vsel %vm212_vm11, %v6365_v20, %v6366_v21  ;;  %v6367_v11 = vrot.slane %v9315_v28, 1 }
 0x9e9   :  { %6588 = vmatmul.mubr.f32.gmra.mxu1 %v6362_v6  ;;  %6626 = vmatprep.subr.mxu0 %v6412_v2  ;;  %v6399_v24 = vmul.f32 %v8330_v40, %v6395_v32  ;;  %v6373_v26 = vmul.f32 %v8373_v5, %v6369_v27  ;;  %v6380_v34 = vsel %vm225_vm10, %v6378_v39, %v6379_v22 }
 0x9ea   :  { %6503 = vmatmul.mubr.f32.gmra.mxu0 %v6338_v7  ;;  %6592 = vmatprep.mubr.f32.mxu1 %v9315_v28  ;;  %v6383_v49 = vsel %vm225_vm10, %v6379_v22, %v6376_v43  ;;  %v6368_v54 = vsel %vm212_vm11, %v6366_v21, %v6367_v11  ;;  %v6371_v10 = vsel %vm212_vm11, %v6367_v11, %v6364_v55 }
 0x9eb   :  { %7914 = vmatpush3.xpose.msra.mxu1 %v6413_v9  ;;  %6507 = vmatprep.mubr.f32.mxu0 %v6344_v14  ;;  %v6387_v37 = vmul.f32 %v8367_v3, %v6383_v49  ;;  %v6375_v28 = vmul.f32 %v8373_v5, %v6371_v10 }
 0x9ec   :  { %6627 = vmatpush1.xpose.msra.mxu0 %v6411_v50  ;;  %7915 = vmatprep.subr.mxu1 %v6406_v8 }
 0x9ed   :  { %6593 = vmatmul.mubr.f32.gmra.mxu1 %v6356_v51  ;;  %6628 = vmatprep.subr.mxu0 %v6405_v62 }
 0x9ee   :  { %6508 = vmatmul.mubr.f32.gmra.mxu0 %v6332_v41  ;;  %7917 = vmatprep.mubr.f32.mxu1 %v6394_v45 }
 0x9ef   :  { %7916 = vmatpush3.xpose.msra.mxu1 %v6406_v8  ;;  %6662 = vmatprep.mubr.f32.mxu0 %v6382_v15 }
 0x9f0   :  { %6629 = vmatpush1.xpose.msra.mxu0 %v6404_v12  ;;  %6934 = vmatprep.subr.mxu1 %v6898_v52 }
 0x9f1   :  { %7019 = vmatprep.subr.mxu0 %v6900_v38 }
 0x9f2   :  { %7918 = vmatmul.mubr.f32.vlgmr.msra.gmra.mxu1 %v6397_v46 }
 0x9f3   :  { %6663 = vmatmul.mubr.f32.vlgmr.msra.gmra.mxu0 %v6370_v33  ;;  %7920 = vmatprep.mubr.f32.mxu1 %v6392_v17 }
 0x9f4   :  { %6667 = vmatprep.mubr.f32.mxu0 %v6385_v25  ;;  %6935 = vmatpush1.xpose.msra.mxu1 %v6897_v31 }
 0x9f5   :  { %7020 = vmatpush1.xpose.msra.mxu0 %v6899_v56  ;;  %7104 = vmatprep.subr.mxu1 %v6902_v30 }
 0x9f6   :  { %7921 = vmatmul.mubr.f32.gmra.mxu1 %v6399_v24  ;;  %7923 = vmatprep.subr.mxu0 %v9414_v48 }
 0x9f7   :  { %6668 = vmatmul.mubr.f32.gmra.mxu0 %v6373_v26 }
 0x9f8   :  { %6672 = vmatprep.mubr.f32.mxu0 %v6380_v34 }
 0x9fb   :  { %6673 = vmatmul.mubr.f32.gmra.mxu0 %v6368_v54 }
 0x9fc   :  { %6677 = vmatprep.mubr.f32.mxu0 %v6387_v37 }
 0x9ff   :  { %6678 = vmatmul.mubr.f32.gmra.mxu0 %v6375_v28 }
 0xaa1   :  { %v6579_v59 = vpop.f32.mrf.mxu1 }
 0xaa2   :  { %v6494_v60 = vpop.f32.mrf.mxu0 }
 0xaa3   :  { %v6581_v61 = vpop.f32.mrf.mxu1  ;;  %v6580_v43 = vadd.f32 %v6579_v59, %v6494_v60 }
 0xaa4   :  { %v6496_v63 = vpop.f32.mrf.mxu0 }
 0xaa5   :  { %v6584_v23 = vpop.f32.mrf.mxu1 }
 0xaa6   :  { %v6499_v0 = vpop.f32.mrf.mxu0 }
 0xaa7   :  { %v6586_v19 = vpop.f32.mrf.mxu1  ;;  %v6585_v13 = vadd.f32 %v6584_v23, %v6499_v0 }
 0xaa8   :  { %v6501_v4 = vpop.f32.mrf.mxu0 }
 0xaa9   :  { %v6589_v9 = vpop.f32.mrf.mxu1 }
 0xaaa   :  { %v6504_v58 = vpop.f32.mrf.mxu0 }
 0xaab   :  { %v6591_v2 = vpop.f32.mrf.mxu1  ;;  %v6590_v12 = vadd.f32 %v6589_v9, %v6504_v58 }
 0xaac   :  { %v6506_v6 = vpop.f32.mrf.mxu0 }
 0xaad   :  { %v6594_v7 = vpop.f32.mrf.mxu1 }
 0xaae   :  { %v6509_v50 = vpop.f32.mrf.mxu0 }
 0xaaf   :  { %v6596_v8 = vpop.f32.mrf.mxu1  ;;  %v6595_v46 = vadd.f32 %v6594_v7, %v6509_v50 }
 0xab0   :  { %v6511_v53 = vpop.f32.mrf.mxu0 }
 0xab2   :  { %v7919_v47 = vpop.f32.mrf.mxu1 }
 0xab3   :  { %v6664_v42 = vpop.f32.mrf.mxu0 }
 0xab4   :  { %v6749_v14 = vpop.f32.mrf.mxu1  ;;  %v6665_v51 = vadd.f32 %v6664_v42, %v6580_v43 }
 0xab5   :  { %v6666_v62 = vpop.f32.mrf.mxu0 }
 0xab6   :  { %v7922_v57 = vpop.f32.mrf.mxu1  ;;  %v6750_v55 = vadd.f32 %v6749_v14, %v6665_v51  ;;  %v6772_v14 = vld [vmem:[#allocation10 + $0x6] sm:$0x1] }
 0xab7   :  { %v6669_v39 = vpop.f32.mrf.mxu0 }
 0xab8   :  { %v6670_v41 = vadd.f32 %v6669_v39, %v6585_v13  ;;  %v6759_v21 = vpop.f32.mrf.mxu1  ;;  %v6768_v25 = vsel %vm615_vm12, %v6750_v55, 0.0  ;;  %v7550_v39 = vld [vmem:[#allocation10 + $0xd] ss:$0 sm:$0xff] }
 0xab9   :  { %v6671_v45 = vpop.f32.mrf.mxu0 }
 0xaba   :  { %v6755_v44 = vadd.f32 %v7919_v47, %v6670_v41 }
 0xabb   :  { %v6674_v15 = vpop.f32.mrf.mxu0 }
 0xabc   :  { %v6675_v20 = vadd.f32 %v6674_v15, %v6590_v12  ;;  %v6769_v32 = vsel %vm615_vm12, %v6755_v44, 0.0 }
 0xabd   :  { %v6676_v16 = vpop.f32.mrf.mxu0  ;;  %v6774_v24 = vadd.f32 %v6769_v32, %v6768_v25 }
 0xabe   :  { %v6760_v33 = vadd.f32 %v6759_v21, %v6675_v20 }
 0xabf   :  { %v6679_v17 = vpop.f32.mrf.mxu0 }
 0xac0   :  { %v6770_v27 = vsel %vm615_vm12, %v6760_v33, 0.0  ;;  %v6680_v22 = vadd.f32 %v6679_v17, %v6595_v46 }
 0xac1   :  { %v6681_v26 = vpop.f32.mrf.mxu0  ;;  %v6775_v34 = vadd.f32 %v6774_v24, %v6770_v27 }
 0xac2   :  { %v6765_v11 = vadd.f32 %v7922_v57, %v6680_v22 }
 0xac4   :  { %v6771_v49 = vsel %vm615_vm12, %v6765_v11, 0.0 }
 0xac5   :  { %v6776_v54 = vadd.f32 %v6775_v34, %v6771_v49 }
 0xac7   :  { %v6777_v37 = vrot.slane %v6776_v54, 4 }
 0xac9   :  { %v6778_v10 = vadd.f32 %v6777_v37, %v6776_v54 }
 0xacb   :  { %v6779_v28 = vrot.slane %v6778_v10, 2 }
 0xacd   :  { %v6780_v52 = vadd.f32 %v6779_v28, %v6778_v10  ;;  %v6901_v10 = vld [vmem:[#allocation5 + $0x8e0] sm:$0xf] }
 0xacf   :  { %v6781_v38 = vrot.slane %v6780_v52, 1 }
 0xad1   :  { %v6782_v31 = vadd.f32 %v6781_v38, %v6780_v52 }
 0xad3   :  { %v6783_v56 = vmul.f32 0.03125, %v6782_v31 }
 0xad5   :  { %v6784_v30 = vsub.f32 %v6768_v25, %v6783_v56  ;;  %v6785_v59 = vsub.f32 %v6769_v32, %v6783_v56  ;;  %v6786_v60 = vsub.f32 %v6770_v27, %v6783_v56  ;;  %v6787_v61 = vsub.f32 %v6771_v49, %v6783_v56 }
 0xad7   :  { %v6788_v63 = vmul.f32 %v6784_v30, %v6784_v30  ;;  %v6789_v23 = vmul.f32 %v6785_v59, %v6785_v59  ;;  %v6790_v0 = vmul.f32 %v6786_v60, %v6786_v60  ;;  %v6791_v4 = vmul.f32 %v6787_v61, %v6787_v61 }
 0xad9   :  { %v6792_v19 = vadd.f32 %v6789_v23, %v6788_v63 }
 0xadb   :  { %v6793_v9 = vadd.f32 %v6792_v19, %v6790_v0 }
 0xadd   :  { %v6794_v58 = vadd.f32 %v6793_v9, %v6791_v4 }
 0xadf   :  { %v6795_v2 = vrot.slane %v6794_v58, 4 }
 0xae1   :  { %v6796_v6 = vadd.f32 %v6795_v2, %v6794_v58 }
 0xae3   :  { %v6797_v7 = vrot.slane %v6796_v6, 2 }
 0xae5   :  { %v6798_v50 = vadd.f32 %v6797_v7, %v6796_v6 }
 0xae7   :  { %v6799_v8 = vrot.slane %v6798_v50, 1 }
 0xae9   :  { %v6800_v53 = vadd.f32 %v6799_v8, %v6798_v50 }
 0xaeb   :  { %v6801_v47 = vmul.f32 0.03125, %v6800_v53 }
 0xaed   :  { %v6802_v42 = vadd.f32 1e-05, %v6801_v47 }
 0xaef   :  { %8087 = vrsqrt.f32 %v6802_v42 }
 0xafc   :  { %v8088_v62 = vpop.eup %8087 }
 0xafd   :  { %v6804_v43 = vmul.f32 %v8088_v62, %v6772_v14 }
 0xaff   :  { %v6808_v13 = vrot.slane %v6804_v43, %v8499_v29 }
 0xb01   :  { %v6809_v51 = vmul.f32 %v6808_v13, %v6784_v30  ;;  %v6810_v41 = vmul.f32 %v6808_v13, %v6785_v59  ;;  %v6811_v57 = vmul.f32 %v6808_v13, %v6786_v60  ;;  %v6812_v45 = vmul.f32 %v6808_v13, %v6787_v61 }
 0xb03   :  { %v6817_v12 = vadd.f32 %v7550_v39, %v6809_v51  ;;  %v6818_v44 = vadd.f32 %v7550_v39, %v6810_v41  ;;  %v6819_v15 = vadd.f32 %v7550_v39, %v6811_v57  ;;  %v6820_v55 = vadd.f32 %v7550_v39, %v6812_v45 }
 0xb05   :  { %v9422_v20 = vmax.f32 %v6817_v12, 0.0  ;;  %v9424_v21 = vmax.f32 %v6818_v44, 0.0  ;;  %v9426_v16 = vmax.f32 %v6819_v15, 0.0  ;;  %v9428_v46 = vmax.f32 %v6820_v55, 0.0 }
 0xb07   :  { %7053 = vmatprep.mubr.f32.mxu0 %v9422_v20  ;;  %v6837_v29 = vrot.slane %v9422_v20, 6  ;;  %v6840_v32 = vrot.slane %v9428_v46, 6  ;;  %v6849_v33 = vrot.slane %v9422_v20, 7  ;;  %v6852_v17 = vrot.slane %v9428_v46, 7 }
 0xb08   :  { %v6825_v25 = vrot.slane %v9422_v20, 5  ;;  %v6828_v27 = vrot.slane %v9428_v46, 5  ;;  %v6838_v26 = vrot.slane %v9424_v21, 6  ;;  %v6839_v11 = vrot.slane %v9426_v16, 6 }
 0xb09   :  { %v6844_v22 = vsel %vm186_vm2, %v6840_v32, %v6837_v29  ;;  %v6856_v24 = vsel %vm199_vm6, %v6852_v17, %v6849_v33  ;;  %v6850_v28 = vrot.slane %v9424_v21, 7  ;;  %v6826_v52 = vrot.slane %v9424_v21, 5 }
 0xb0a   :  { %v6845_v34 = vmul.f32 %v8291_v18, %v6844_v22  ;;  %v6857_v49 = vmul.f32 %v8323_v36, %v6856_v24  ;;  %v6832_v54 = vsel %vm173_vm1, %v6828_v27, %v6825_v25  ;;  %v6851_v38 = vrot.slane %v9426_v16, 7 }
 0xb0b   :  { %v6833_v37 = vmul.f32 %v8319_v35, %v6832_v54  ;;  %v6827_v31 = vrot.slane %v9426_v16, 5  ;;  %v6843_v56 = vsel %vm186_vm2, %v6837_v29, %v6838_v26  ;;  %v6842_v30 = vsel %vm186_vm2, %v6838_v26, %v6839_v11 }
 0xb0c   :  { %6968 = vmatprep.mubr.f32.mxu1 %v6845_v34  ;;  %7054 = vmatmul.mubr.f32.vlgmr.msra.gmra.mxu0 %v6857_v49  ;;  %v6855_v59 = vsel %vm199_vm6, %v6849_v33, %v6850_v28  ;;  %v6854_v60 = vsel %vm199_vm6, %v6850_v28, %v6851_v38  ;;  %v6831_v61 = vsel %vm173_vm1, %v6825_v25, %v6826_v52  ;;  %v6886_v4 = vrot.slane %v9424_v21, 3 }
 0xb0d   :  { %6969 = vmatmul.mubr.f32.vlgmr.msra.gmra.mxu1 %v6833_v37  ;;  %7058 = vmatprep.mubr.f32.mxu0 %v9424_v21  ;;  %v6847_v63 = vmul.f32 %v8291_v18, %v6842_v30  ;;  %v6830_v23 = vsel %vm173_vm1, %v6826_v52, %v6827_v31  ;;  %v6859_v0 = vmul.f32 %v8323_v36, %v6854_v60  ;;  %v6885_v9 = vrot.slane %v9422_v20, 3 }
 0xb0e   :  { %6973 = vmatprep.mubr.f32.mxu1 %v6843_v56  ;;  %7105 = vmatpush1.xpose.msra.mxu1 %v6901_v10  ;;  %v6835_v19 = vmul.f32 %v8319_v35, %v6830_v23  ;;  %v6841_v18 = vsel %vm186_vm2, %v6839_v11, %v6840_v32  ;;  %v6873_v58 = vrot.slane %v9422_v20, 2  ;;  %v6874_v2 = vrot.slane %v9424_v21, 2 }
 0xb0f   :  { %7924 = vmatpush3.xpose.msra.mxu0 %v9414_v48  ;;  %v6887_v48 = vrot.slane %v9426_v16, 3  ;;  %v6875_v36 = vrot.slane %v9426_v16, 2  ;;  %v6853_v35 = vsel %vm199_vm6, %v6851_v38, %v6852_v17  ;;  %v6829_v6 = vsel %vm173_vm1, %v6827_v31, %v6828_v27 }
 0xb10   :  { %7059 = vmatmul.mubr.f32.gmra.mxu0 %v6855_v59  ;;  %v6888_v50 = vrot.slane %v9428_v46, 3  ;;  %v6891_v8 = vsel %vm238_vm9, %v6885_v9, %v6886_v4  ;;  %v6861_v53 = vrot.slane %v9422_v20, 1  ;;  %v6862_v47 = vrot.slane %v9424_v21, 1  ;;  %v7551_v59 = vld [vmem:[#allocation10 + $0xf] ss:$0 sm:$0xff] }
 0xb11   :  { %6974 = vmatmul.mubr.f32.gmra.mxu1 %v6831_v61  ;;  %7063 = vmatprep.mubr.f32.mxu0 %v9426_v16  ;;  %v6890_v7 = vsel %vm238_vm9, %v6886_v4, %v6887_v48  ;;  %v6863_v42 = vrot.slane %v9426_v16, 1  ;;  %v6879_v14 = vsel %vm225_vm10, %v6873_v58, %v6874_v2  ;;  %v6878_v62 = vsel %vm225_vm10, %v6874_v2, %v6875_v36 }
 0xb12   :  { %6978 = vmatprep.mubr.f32.mxu1 %v6847_v63  ;;  %v6894_v43 = vmul.f32 %v8330_v40, %v6890_v7  ;;  %v6892_v13 = vsel %vm238_vm9, %v6888_v50, %v6885_v9  ;;  %v6867_v39 = vsel %vm212_vm11, %v6861_v53, %v6862_v47  ;;  %v6889_v51 = vsel %vm238_vm9, %v6887_v48, %v6888_v50 }
 0xb13   :  { %v6882_v41 = vmul.f32 %v8367_v3, %v6878_v62  ;;  %v6866_v57 = vsel %vm212_vm11, %v6862_v47, %v6863_v42  ;;  %v6876_v45 = vrot.slane %v9428_v46, 2  ;;  %v6896_v12 = vmul.f32 %v8330_v40, %v6892_v13 }
 0xb14   :  { %7064 = vmatmul.mubr.f32.gmra.mxu0 %v6859_v0  ;;  %v6870_v44 = vmul.f32 %v8373_v5, %v6866_v57  ;;  %v6864_v15 = vrot.slane %v9428_v46, 1  ;;  %vm7244_vm1 = vcmask 31744  }
 0xb15   :  { %6979 = vmatmul.mubr.f32.gmra.mxu1 %v6835_v19  ;;  %7068 = vmatprep.mubr.f32.mxu0 %v9428_v46  ;;  %v6877_v55 = vsel %vm225_vm10, %v6875_v36, %v6876_v45  ;;  %v6880_v20 = vsel %vm225_vm10, %v6876_v45, %v6873_v58 }
 0xb16   :  { %6983 = vmatprep.mubr.f32.mxu1 %v6841_v18  ;;  %v6865_v21 = vsel %vm212_vm11, %v6863_v42, %v6864_v15  ;;  %v6884_v16 = vmul.f32 %v8367_v3, %v6880_v20  ;;  %v6868_v40 = vsel %vm212_vm11, %v6864_v15, %v6861_v53 }
 0xb17   :  { %v6872_v46 = vmul.f32 %v8373_v5, %v6868_v40 }
 0xb18   :  { %7069 = vmatmul.mubr.f32.gmra.mxu0 %v6853_v35 }
 0xb19   :  { %6984 = vmatmul.mubr.f32.gmra.mxu1 %v6829_v6  ;;  %7925 = vmatprep.mubr.f32.mxu0 %v6891_v8 }
 0xb1a   :  { %7138 = vmatprep.mubr.f32.mxu1 %v6879_v14 }
 0xb1c   :  { %7926 = vmatmul.mubr.f32.vlgmr.msra.gmra.mxu0 %v6894_v43 }
 0xb1d   :  { %7139 = vmatmul.mubr.f32.vlgmr.msra.gmra.mxu1 %v6867_v39  ;;  %7928 = vmatprep.mubr.f32.mxu0 %v6889_v51 }
 0xb1e   :  { %7143 = vmatprep.mubr.f32.mxu1 %v6882_v41 }
 0xb20   :  { %7929 = vmatmul.mubr.f32.gmra.mxu0 %v6896_v12 }
 0xb21   :  { %7144 = vmatmul.mubr.f32.gmra.mxu1 %v6870_v44 }
 0xb22   :  { %7148 = vmatprep.mubr.f32.mxu1 %v6877_v55 }
 0xb25   :  { %7149 = vmatmul.mubr.f32.gmra.mxu1 %v6865_v21 }
 0xb26   :  { %7153 = vmatprep.mubr.f32.mxu1 %v6884_v16 }
 0xb29   :  { %7154 = vmatmul.mubr.f32.gmra.mxu1 %v6872_v46 }
 0xbcc   :  { %v7055_v29 = vpop.f32.mrf.mxu0 }
 0xbcd   :  { %v6970_v32 = vpop.f32.mrf.mxu1 }
 0xbce   :  { %v7057_v33 = vpop.f32.mrf.mxu0  ;;  %v7056_v10 = vadd.f32 %v7055_v29, %v6970_v32 }
 0xbcf   :  { %v6972_v17 = vpop.f32.mrf.mxu1 }
 0xbd0   :  { %v7060_v25 = vpop.f32.mrf.mxu0 }
 0xbd1   :  { %v6975_v27 = vpop.f32.mrf.mxu1 }
 0xbd2   :  { %v7062_v22 = vpop.f32.mrf.mxu0  ;;  %v7061_v56 = vadd.f32 %v7060_v25, %v6975_v27 }
 0xbd3   :  { %v6977_v24 = vpop.f32.mrf.mxu1 }
 0xbd4   :  { %v7065_v26 = vpop.f32.mrf.mxu0 }
 0xbd5   :  { %v6980_v11 = vpop.f32.mrf.mxu1 }
 0xbd6   :  { %v7067_v34 = vpop.f32.mrf.mxu0  ;;  %v7066_v4 = vadd.f32 %v7065_v26, %v6980_v11 }
 0xbd7   :  { %v6982_v3 = vpop.f32.mrf.mxu1 }
 0xbd8   :  { %v7070_v49 = vpop.f32.mrf.mxu0 }
 0xbd9   :  { %v6985_v1 = vpop.f32.mrf.mxu1 }
 0xbda   :  { %v7072_v54 = vpop.f32.mrf.mxu0  ;;  %v7071_v6 = vadd.f32 %v7070_v49, %v6985_v1 }
 0xbdb   :  { %v6987_v37 = vpop.f32.mrf.mxu1 }
 0xbdc   :  { %v7927_v28 = vpop.f32.mrf.mxu0 }
 0xbdd   :  { %v7140_v5 = vpop.f32.mrf.mxu1 }
 0xbde   :  { %v7141_v52 = vadd.f32 %v7140_v5, %v7056_v10  ;;  %v7225_v38 = vpop.f32.mrf.mxu0 }
 0xbdf   :  { %v7142_v31 = vpop.f32.mrf.mxu1 }
 0xbe0   :  { %v7226_v30 = vadd.f32 %v7225_v38, %v7141_v52  ;;  %v7930_v0 = vpop.f32.mrf.mxu0 }
 0xbe1   :  { %v7145_v60 = vpop.f32.mrf.mxu1 }
 0xbe2   :  { %v7245_v61 = vsel %vm7244_vm1, %v7226_v30, 0.0  ;;  %v7146_v63 = vadd.f32 %v7145_v60, %v7061_v56  ;;  %v7235_v36 = vpop.f32.mrf.mxu0 }
 0xbe3   :  { %v7254_v23 = vadd.f32 %v7551_v59, %v7245_v61  ;;  %v7147_v19 = vpop.f32.mrf.mxu1 }
 0xbe4   :  { %v7231_v48 = vadd.f32 %v7927_v28, %v7146_v63 }
 0xbe5   :  { %7258 = vst [vmem:[#allocation11] sm:$0xff] %v7254_v23  ;;  %v7150_v9 = vpop.f32.mrf.mxu1 }
 0xbe6   :  { %v7246_v18 = vsel %vm7244_vm1, %v7231_v48, 0.0  ;;  %v7151_v58 = vadd.f32 %v7150_v9, %v7066_v4 }
 0xbe7   :  { %v7255_v2 = vadd.f32 %v7551_v59, %v7246_v18  ;;  %v7152_v35 = vpop.f32.mrf.mxu1 }
 0xbe8   :  { %v7236_v7 = vadd.f32 %v7235_v36, %v7151_v58 }
 0xbe9   :  { %7259 = vst [vmem:[#allocation11 + $0x8] sm:$0xff] %v7255_v2  ;;  %v7155_v50 = vpop.f32.mrf.mxu1 }
 0xbea   :  { %v7247_v8 = vsel %vm7244_vm1, %v7236_v7, 0.0  ;;  %v7156_v53 = vadd.f32 %v7155_v50, %v7071_v6 }
 0xbeb   :  { %v7256_v47 = vadd.f32 %v7551_v59, %v7247_v8  ;;  %v7157_v42 = vpop.f32.mrf.mxu1 }
 0xbec   :  { %v7241_v14 = vadd.f32 %v7930_v0, %v7156_v53 }
 0xbed   :  { %7260 = vst [vmem:[#allocation11 + $0x10] sm:$0xff] %v7256_v47 }
 0xbee   :  { %v7248_v62 = vsel %vm7244_vm1, %v7241_v14, 0.0 }
 0xbef   :  { %v7257_v43 = vadd.f32 %v7551_v59, %v7248_v62 }
 0xbf1   :  { %7261 = vst [vmem:[#allocation11 + $0x18] sm:$0xff] %v7257_v43 }
 0xbf2   :  { %8200 = shalt.err (!%p8197_p1)
}
 0xbf3   :  { %7273 = dma.vmem_to_hbm [thread:$0]  %s7268_s4, 512, %s9534_s5, [#allocation4], %s8224_s9, %s8224_s9, %s8225_s10  }
 0xbf4   :  { %8215 = dma.done.wait [#allocation4], 512  }
 0xbf5   :  { %8216 = vsyncadd [#allocation4], 4294966784 }
 0xbf6   :  { %7277 = vsyncpa [#allocation3], 1 }
 0xbf7   :  { %7278 = vsyncpa [#allocation6], 1 }
 0xbf8   :  { %7279 = vsyncpa [#allocation9], 1 }
 0xbf9   :  { %7280 = vsyncpa [#allocation4], 1 }

</bundles_post_ra>
